<compile_context>
chip_gen: v6e
topology: v6e:2x2x1
jax: 0.10.0
libtpu: 0.0.40
codegen_flags: <defaults>
</compile_context>

<pallas_src>
import functools

import jax
import jax.numpy as jnp
from jax import lax
from jax.experimental import pallas as pl
from jax.experimental.pallas import tpu as pltpu


def _round_up(x, m):
    return ((x + m - 1) // m) * m


def _same_pads(k):
    # PyTorch padding='same' (stride=1): left = (k-1)//2, right = (k-1) - left
    total = k - 1
    left = total // 2
    return left, total - left


PAD = 16  # body row offset inside the deep-K slabs (16-sublane aligned for bf16)


def fcnn_kernel(x_ref,
                w1_ref, b1_ref,
                w2_ref, b2_ref,
                w3_ref, b3_ref,
                w4_ref, b4_ref,
                o_ref,
                slab2, slab3,
                *, L, TB, Cin):
    M = TB * L

    # ---- layer 1: Conv1d(Cin -> 128, k=8, 'same') + BN + ReLU ----------------
    # In-kernel im2col: per-tap accumulation from the halo-padded input block.
    # K = Cin is tiny, so these matmuls stay in f32 (negligible FLOPs).
    acc1 = None
    for t in range(8):                                   # tap shift s = t - 3
        xt = x_ref[:, t:t + L, :].reshape(M, Cin)
        d = jnp.dot(xt, w1_ref[t], preferred_element_type=jnp.float32)
        acc1 = d if acc1 is None else acc1 + d
    h1 = jnp.maximum(acc1 + b1_ref[...], 0.0)            # BN scale folded into w1

    # ---- layer 2: Conv1d(128 -> 256, k=5, 'same') + BN + ReLU ----------------
    # One shifted copy per tap: scatter h1 (bf16) into 128-lane-aligned columns
    # of the slab at row offset PAD - s, zero only the uncovered body rows,
    # then a single deep-K matmul (M, 640) @ (640, 256).
    h1b = h1.astype(jnp.bfloat16).reshape(TB, L, 128)
    for t in range(5):                                   # tap shift s = t - 2
        s = t - 2
        c0 = t * 128
        slab2[:, PAD - s:PAD - s + L, c0:c0 + 128] = h1b
        if s > 0:
            slab2[:, PAD + L - s:PAD + L, c0:c0 + 128] = jnp.zeros(
                (TB, s, 128), jnp.bfloat16)
        elif s < 0:
            slab2[:, PAD:PAD - s, c0:c0 + 128] = jnp.zeros(
                (TB, -s, 128), jnp.bfloat16)
    x2 = slab2[:, PAD:PAD + L, :].reshape(M, 5 * 128)
    acc2 = jnp.dot(x2, w2_ref[...], preferred_element_type=jnp.float32)
    h2 = jnp.maximum(acc2 + b2_ref[...], 0.0)

    # ---- layer 3: Conv1d(256 -> 128, k=3, 'same') + BN + ReLU ----------------
    h2b = h2.astype(jnp.bfloat16).reshape(TB, L, 256)
    for t in range(3):                                   # tap shift s = t - 1
        s = t - 1
        c0 = t * 256
        slab3[:, PAD - s:PAD - s + L, c0:c0 + 256] = h2b
        if s > 0:
            slab3[:, PAD + L - s:PAD + L, c0:c0 + 256] = jnp.zeros(
                (TB, s, 256), jnp.bfloat16)
        elif s < 0:
            slab3[:, PAD:PAD - s, c0:c0 + 256] = jnp.zeros(
                (TB, -s, 256), jnp.bfloat16)
    x3 = slab3[:, PAD:PAD + L, :].reshape(M, 3 * 256)
    acc3 = jnp.dot(x3, w3_ref[...], preferred_element_type=jnp.float32)
    h3 = jnp.maximum(acc3 + b3_ref[...], 0.0)            # stays f32

    # ---- layer 4: Conv1d(128 -> F, k=1) + AdaptiveAvgPool1d(1) ---------------
    # Pool first (sum; 1/L folded into w4f), then a tiny f32 matmul.
    pooled = jnp.sum(h3.reshape(TB, L, 128), axis=1)     # (TB, 128) f32
    o_ref[...] = (jnp.dot(pooled, w4_ref[...],
                          preferred_element_type=jnp.float32)
                  + b4_ref[...])


def _pick_tb(batch, length):
    """Rows per grid step: TB*L ~ 1024 and TB a multiple of 8."""
    b8 = _round_up(max(batch, 1), 8)
    tb = max(8, (1024 // max(length, 1)) // 8 * 8)
    tb = min(tb, b8)
    # v7x megacore: prefer at least 2 grid steps when the batch allows it.
    if tb >= b8 and b8 >= 16:
        tb = _round_up(b8 // 2, 8)
    return tb


def fcnn_forward(x_ncl, params, tb=None):
    """x_ncl: (B, C_in, L) float32, the PyTorch Conv1d NCL input layout."""
    B, Cin, L = x_ncl.shape
    F = params['w4'].shape[-1]
    Fp = _round_up(F, 128)                      # lane-dense padded output width

    TB = tb if tb is not None else _pick_tb(B, L)
    TB = max(8, _round_up(TB, 8))
    B_pad = _round_up(B, TB)

    lp, rp = _same_pads(8)                      # (3, 4) for the k=8 conv
    L_in = _round_up(L + lp + rp, 8)            # halo-padded input rows

    # channels-last, batch zero-padded to whole TB tiles, L halo-padded (zeros)
    x = jnp.transpose(x_ncl, (0, 2, 1))                            # (B, L, Cin)
    x = jnp.pad(x, ((0, B_pad - B), (lp, L_in - L - lp), (0, 0)))  # (B_pad, L_in, Cin)

    # BN scale folded into the conv weights; shift applied in-kernel.
    w1f = (params['w1'] * params['s1']).astype(jnp.float32)             # (8, Cin, 128)
    w2f = (params['w2'] * params['s2']).reshape(5 * 128, 256).astype(jnp.bfloat16)
    w3f = (params['w3'] * params['s3']).reshape(3 * 256, 128).astype(jnp.bfloat16)
    # 1x1 conv: fold the 1/L of the average pool into the f32 weight.
    w4f = (jnp.zeros((128, Fp), jnp.float32)
           .at[:, :F].set(params['w4'][0] / float(L)))
    b4f = jnp.zeros((1, Fp), jnp.float32).at[:, :F].set(params['b4'])

    def const_spec(a):
        nd = a.ndim
        return pl.BlockSpec(a.shape, lambda g, nd=nd: (0,) * nd)

    flops = (2 * B_pad * L * (8 * Cin * 128 + 5 * 128 * 256 + 3 * 256 * 128)
             + 2 * B_pad * 128 * Fp)
    bytes_accessed = int(x.size * 4 + w1f.size * 4
                         + (w2f.size + w3f.size) * 2
                         + (w4f.size + b4f.size) * 4
                         + (params['b1'].size + params['b2'].size
                            + params['b3'].size) * 4
                         + B_pad * Fp * 4)

    kern = functools.partial(fcnn_kernel, L=L, TB=TB, Cin=Cin)
    out = pl.pallas_call(
        kern,
        out_shape=jax.ShapeDtypeStruct((B_pad, Fp), jnp.float32),
        grid=(B_pad // TB,),
        in_specs=[
            pl.BlockSpec((TB, L_in, Cin), lambda g: (g, 0, 0)),
            const_spec(w1f), const_spec(params['b1']),
            const_spec(w2f), const_spec(params['b2']),
            const_spec(w3f), const_spec(params['b3']),
            const_spec(w4f), const_spec(b4f),
        ],
        out_specs=pl.BlockSpec((TB, Fp), lambda g: (g, 0)),
        scratch_shapes=[
            pltpu.VMEM((TB, L + 2 * PAD, 5 * 128), jnp.bfloat16),  # layer-2 deep-K slab
            pltpu.VMEM((TB, L + 2 * PAD, 3 * 256), jnp.bfloat16),  # layer-3 deep-K slab
        ],
        compiler_params=pltpu.CompilerParams(
            dimension_semantics=("parallel",),
            vmem_limit_bytes=48 * 1024 * 1024),
        cost_estimate=pl.CostEstimate(
            flops=int(flops), transcendentals=0,
            bytes_accessed=bytes_accessed),
    )(x,
      w1f, params['b1'],
      w2f, params['b2'],
      w3f, params['b3'],
      w4f, b4f)
    return out[:B, :F]


# ---------------- deterministic parameter construction ----------------

def _conv_init(key, k, cin, cout):
    kw, kb = jax.random.split(key)
    bound = 1.0 / (cin * k) ** 0.5
    w = jax.random.uniform(kw, (k, cin, cout), jnp.float32, -bound, bound)   # (K, I, O)
    b = jax.random.uniform(kb, (cout,), jnp.float32, -bound, bound)
    return w, b


def _bn_init(key, c):
    k1, k2, k3, k4 = jax.random.split(key, 4)
    gamma = 1.0 + 0.1 * jax.random.normal(k1, (c,), jnp.float32)
    beta = 0.1 * jax.random.normal(k2, (c,), jnp.float32)
    mean = 0.1 * jax.random.normal(k3, (c,), jnp.float32)
    var = 1.0 + 0.1 * jax.random.uniform(k4, (c,), jnp.float32)
    return gamma, beta, mean, var


def _fold_bn(gamma, beta, mean, var, conv_bias, eps=1e-5):
    scale = gamma / jnp.sqrt(var + eps)
    shift = beta + scale * (conv_bias - mean)
    return scale.reshape(1, -1), shift.reshape(1, -1)


def make_params(key, input_channels, num_features):
    keys = jax.random.split(key, 8)
    w1, cb1 = _conv_init(keys[0], 8, input_channels, 128)
    w2, cb2 = _conv_init(keys[1], 5, 128, 256)
    w3, cb3 = _conv_init(keys[2], 3, 256, 128)
    w4, cb4 = _conv_init(keys[3], 1, 128, num_features)
    s1, b1 = _fold_bn(*_bn_init(keys[4], 128), cb1)
    s2, b2 = _fold_bn(*_bn_init(keys[5], 256), cb2)
    s3, b3 = _fold_bn(*_bn_init(keys[6], 128), cb3)
    return dict(w1=w1, s1=s1, b1=b1,
                w2=w2, s2=s2, b2=b2,
                w3=w3, s3=s3, b3=b3,
                w4=w4, b4=cb4.reshape(1, -1))


# ---------------- pure-JAX reference (lax.conv, NCL layout, f32) ----------------

def ref_forward(x_ncl, params):
    def conv_same(x, w_kio, k):
        w = jnp.transpose(w_kio, (2, 1, 0))            # (O, I, K)
        lp, rp = _same_pads(k)
        return lax.conv_general_dilated(
            x, w, window_strides=(1,), padding=[(lp, rp)],
            dimension_numbers=('NCH', 'OIH', 'NCH'))

    def affine(y, s, b):
        return y * s.reshape(1, -1, 1) + b.reshape(1, -1, 1)

    h = jnp.maximum(affine(conv_same(x_ncl, params['w1'], 8), params['s1'], params['b1']), 0.0)
    h = jnp.maximum(affine(conv_same(h, params['w2'], 5), params['s2'], params['b2']), 0.0)
    h = jnp.maximum(affine(conv_same(h, params['w3'], 3), params['s3'], params['b3']), 0.0)
    h = conv_same(h, params['w4'], 1) + params['b4'].reshape(1, -1, 1)
    return jnp.mean(h, axis=-1)                         # (B, F) == AdaptiveAvgPool1d(1) + reshape


if __name__ == "__main__":
    B, C_IN, L, NUM_FEATURES = 2, 4, 16, 32

    key = jax.random.PRNGKey(0)
    kx, kp = jax.random.split(key)
    x = jax.random.normal(kx, (B, C_IN, L), jnp.float32)     # PyTorch Conv1d NCL input
    params = make_params(kp, C_IN, NUM_FEATURES)

    out = fcnn_forward(x, params)
    out = jax.block_until_ready(out)

    ref = ref_forward(x, params)
    assert out.shape == (B, NUM_FEATURES)
    # bf16 matmul operands (layers 2/3) with f32 accumulation vs f32 reference
    assert jnp.allclose(out, ref, atol=2e-2, rtol=2e-2), (out, ref)

    print("KERNEL_OK")
</pallas_src>

<mosaic_0001>
module attributes {stable_mosaic.version = 11 : i64} {
  func.func @fcnn_kernel(%arg0: i32, %arg1: memref<8x24x4xf32, #tpu.memory_space<vmem>>, %arg2: memref<8x4x128xf32, #tpu.memory_space<vmem>>, %arg3: memref<1x128xf32, #tpu.memory_space<vmem>>, %arg4: memref<640x256xbf16, #tpu.memory_space<vmem>>, %arg5: memref<1x256xf32, #tpu.memory_space<vmem>>, %arg6: memref<768x128xbf16, #tpu.memory_space<vmem>>, %arg7: memref<1x128xf32, #tpu.memory_space<vmem>>, %arg8: memref<128x128xf32, #tpu.memory_space<vmem>>, %arg9: memref<1x128xf32, #tpu.memory_space<vmem>>, %arg10: memref<8x128xf32, #tpu.memory_space<vmem>>, %arg11: memref<8x48x640xbf16, #tpu.memory_space<vmem>>, %arg12: memref<8x48x768xbf16, #tpu.memory_space<vmem>>) attributes {dimension_semantics = [#tpu.dimension_semantics<parallel>], iteration_bounds = array<i64: 1>, scalar_prefetch = 0 : i64, scratch_operands = 2 : i64, tpu.core_type = #tpu.core_type<tc>, window_params = [{transform_indices = @transform_0, window_bounds = array<i64: 8, 24, 4>}, {pipeline_mode = #tpu.pipeline_mode<synchronous>, transform_indices = @transform_1, window_bounds = array<i64: 8, 4, 128>}, {pipeline_mode = #tpu.pipeline_mode<synchronous>, transform_indices = @transform_2, window_bounds = array<i64: 1, 128>}, {pipeline_mode = #tpu.pipeline_mode<synchronous>, transform_indices = @transform_3, window_bounds = array<i64: 640, 256>}, {pipeline_mode = #tpu.pipeline_mode<synchronous>, transform_indices = @transform_4, window_bounds = array<i64: 1, 256>}, {pipeline_mode = #tpu.pipeline_mode<synchronous>, transform_indices = @transform_5, window_bounds = array<i64: 768, 128>}, {pipeline_mode = #tpu.pipeline_mode<synchronous>, transform_indices = @transform_6, window_bounds = array<i64: 1, 128>}, {pipeline_mode = #tpu.pipeline_mode<synchronous>, transform_indices = @transform_7, window_bounds = array<i64: 128, 128>}, {pipeline_mode = #tpu.pipeline_mode<synchronous>, transform_indices = @transform_8, window_bounds = array<i64: 1, 128>}, {transform_indices = @transform_9, window_bounds = array<i64: 8, 128>}]} {
    %c0 = arith.constant 0 : index
    %c0_0 = arith.constant 0 : index
    %c0_1 = arith.constant 0 : index
    %0 = vector.load %arg1[%c0, %c0_0, %c0_1] : memref<8x24x4xf32, #tpu.memory_space<vmem>>, vector<8x16x4xf32>
    %1 = vector.shape_cast %0 : vector<8x16x4xf32> to vector<128x4xf32>
    %c0_2 = arith.constant 0 : index
    %c0_3 = arith.constant 0 : index
    %c0_4 = arith.constant 0 : index
    %2 = vector.load %arg2[%c0_2, %c0_3, %c0_4] : memref<8x4x128xf32, #tpu.memory_space<vmem>>, vector<1x4x128xf32>
    %3 = vector.shape_cast %2 : vector<1x4x128xf32> to vector<4x128xf32>
    %cst = arith.constant dense<0.000000e+00> : vector<128x128xf32>
    %4 = tpu.matmul %1, %3, %cst {dimension_numbers = #tpu.dot_dimension_numbers<[1], [0], [0], [1], [0, 0, 1, 1], [], []>} : vector<128x4xf32>, vector<4x128xf32>, vector<128x128xf32> -> vector<128x128xf32>
    %c0_5 = arith.constant 0 : index
    %c1 = arith.constant 1 : index
    %c0_6 = arith.constant 0 : index
    %5 = vector.load %arg1[%c0_5, %c1, %c0_6] : memref<8x24x4xf32, #tpu.memory_space<vmem>>, vector<8x16x4xf32>
    %6 = vector.shape_cast %5 : vector<8x16x4xf32> to vector<128x4xf32>
    %c1_7 = arith.constant 1 : index
    %c0_8 = arith.constant 0 : index
    %c0_9 = arith.constant 0 : index
    %7 = vector.load %arg2[%c1_7, %c0_8, %c0_9] : memref<8x4x128xf32, #tpu.memory_space<vmem>>, vector<1x4x128xf32>
    %8 = vector.shape_cast %7 : vector<1x4x128xf32> to vector<4x128xf32>
    %cst_10 = arith.constant dense<0.000000e+00> : vector<128x128xf32>
    %9 = tpu.matmul %6, %8, %cst_10 {dimension_numbers = #tpu.dot_dimension_numbers<[1], [0], [0], [1], [0, 0, 1, 1], [], []>} : vector<128x4xf32>, vector<4x128xf32>, vector<128x128xf32> -> vector<128x128xf32>
    %10 = arith.addf %4, %9 : vector<128x128xf32>
    %c0_11 = arith.constant 0 : index
    %c2 = arith.constant 2 : index
    %c0_12 = arith.constant 0 : index
    %11 = vector.load %arg1[%c0_11, %c2, %c0_12] : memref<8x24x4xf32, #tpu.memory_space<vmem>>, vector<8x16x4xf32>
    %12 = vector.shape_cast %11 : vector<8x16x4xf32> to vector<128x4xf32>
    %c2_13 = arith.constant 2 : index
    %c0_14 = arith.constant 0 : index
    %c0_15 = arith.constant 0 : index
    %13 = vector.load %arg2[%c2_13, %c0_14, %c0_15] : memref<8x4x128xf32, #tpu.memory_space<vmem>>, vector<1x4x128xf32>
    %14 = vector.shape_cast %13 : vector<1x4x128xf32> to vector<4x128xf32>
    %cst_16 = arith.constant dense<0.000000e+00> : vector<128x128xf32>
    %15 = tpu.matmul %12, %14, %cst_16 {dimension_numbers = #tpu.dot_dimension_numbers<[1], [0], [0], [1], [0, 0, 1, 1], [], []>} : vector<128x4xf32>, vector<4x128xf32>, vector<128x128xf32> -> vector<128x128xf32>
    %16 = arith.addf %10, %15 : vector<128x128xf32>
    %c0_17 = arith.constant 0 : index
    %c3 = arith.constant 3 : index
    %c0_18 = arith.constant 0 : index
    %17 = vector.load %arg1[%c0_17, %c3, %c0_18] : memref<8x24x4xf32, #tpu.memory_space<vmem>>, vector<8x16x4xf32>
    %18 = vector.shape_cast %17 : vector<8x16x4xf32> to vector<128x4xf32>
    %c3_19 = arith.constant 3 : index
    %c0_20 = arith.constant 0 : index
    %c0_21 = arith.constant 0 : index
    %19 = vector.load %arg2[%c3_19, %c0_20, %c0_21] : memref<8x4x128xf32, #tpu.memory_space<vmem>>, vector<1x4x128xf32>
    %20 = vector.shape_cast %19 : vector<1x4x128xf32> to vector<4x128xf32>
    %cst_22 = arith.constant dense<0.000000e+00> : vector<128x128xf32>
    %21 = tpu.matmul %18, %20, %cst_22 {dimension_numbers = #tpu.dot_dimension_numbers<[1], [0], [0], [1], [0, 0, 1, 1], [], []>} : vector<128x4xf32>, vector<4x128xf32>, vector<128x128xf32> -> vector<128x128xf32>
    %22 = arith.addf %16, %21 : vector<128x128xf32>
    %c0_23 = arith.constant 0 : index
    %c4 = arith.constant 4 : index
    %c0_24 = arith.constant 0 : index
    %23 = vector.load %arg1[%c0_23, %c4, %c0_24] : memref<8x24x4xf32, #tpu.memory_space<vmem>>, vector<8x16x4xf32>
    %24 = vector.shape_cast %23 : vector<8x16x4xf32> to vector<128x4xf32>
    %c4_25 = arith.constant 4 : index
    %c0_26 = arith.constant 0 : index
    %c0_27 = arith.constant 0 : index
    %25 = vector.load %arg2[%c4_25, %c0_26, %c0_27] : memref<8x4x128xf32, #tpu.memory_space<vmem>>, vector<1x4x128xf32>
    %26 = vector.shape_cast %25 : vector<1x4x128xf32> to vector<4x128xf32>
    %cst_28 = arith.constant dense<0.000000e+00> : vector<128x128xf32>
    %27 = tpu.matmul %24, %26, %cst_28 {dimension_numbers = #tpu.dot_dimension_numbers<[1], [0], [0], [1], [0, 0, 1, 1], [], []>} : vector<128x4xf32>, vector<4x128xf32>, vector<128x128xf32> -> vector<128x128xf32>
    %28 = arith.addf %22, %27 : vector<128x128xf32>
    %c0_29 = arith.constant 0 : index
    %c5 = arith.constant 5 : index
    %c0_30 = arith.constant 0 : index
    %29 = vector.load %arg1[%c0_29, %c5, %c0_30] : memref<8x24x4xf32, #tpu.memory_space<vmem>>, vector<8x16x4xf32>
    %30 = vector.shape_cast %29 : vector<8x16x4xf32> to vector<128x4xf32>
    %c5_31 = arith.constant 5 : index
    %c0_32 = arith.constant 0 : index
    %c0_33 = arith.constant 0 : index
    %31 = vector.load %arg2[%c5_31, %c0_32, %c0_33] : memref<8x4x128xf32, #tpu.memory_space<vmem>>, vector<1x4x128xf32>
    %32 = vector.shape_cast %31 : vector<1x4x128xf32> to vector<4x128xf32>
    %cst_34 = arith.constant dense<0.000000e+00> : vector<128x128xf32>
    %33 = tpu.matmul %30, %32, %cst_34 {dimension_numbers = #tpu.dot_dimension_numbers<[1], [0], [0], [1], [0, 0, 1, 1], [], []>} : vector<128x4xf32>, vector<4x128xf32>, vector<128x128xf32> -> vector<128x128xf32>
    %34 = arith.addf %28, %33 : vector<128x128xf32>
    %c0_35 = arith.constant 0 : index
    %c6 = arith.constant 6 : index
    %c0_36 = arith.constant 0 : index
    %35 = vector.load %arg1[%c0_35, %c6, %c0_36] : memref<8x24x4xf32, #tpu.memory_space<vmem>>, vector<8x16x4xf32>
    %36 = vector.shape_cast %35 : vector<8x16x4xf32> to vector<128x4xf32>
    %c6_37 = arith.constant 6 : index
    %c0_38 = arith.constant 0 : index
    %c0_39 = arith.constant 0 : index
    %37 = vector.load %arg2[%c6_37, %c0_38, %c0_39] : memref<8x4x128xf32, #tpu.memory_space<vmem>>, vector<1x4x128xf32>
    %38 = vector.shape_cast %37 : vector<1x4x128xf32> to vector<4x128xf32>
    %cst_40 = arith.constant dense<0.000000e+00> : vector<128x128xf32>
    %39 = tpu.matmul %36, %38, %cst_40 {dimension_numbers = #tpu.dot_dimension_numbers<[1], [0], [0], [1], [0, 0, 1, 1], [], []>} : vector<128x4xf32>, vector<4x128xf32>, vector<128x128xf32> -> vector<128x128xf32>
    %40 = arith.addf %34, %39 : vector<128x128xf32>
    %c0_41 = arith.constant 0 : index
    %c7 = arith.constant 7 : index
    %c0_42 = arith.constant 0 : index
    %41 = vector.load %arg1[%c0_41, %c7, %c0_42] : memref<8x24x4xf32, #tpu.memory_space<vmem>>, vector<8x16x4xf32>
    %42 = vector.shape_cast %41 : vector<8x16x4xf32> to vector<128x4xf32>
    %c7_43 = arith.constant 7 : index
    %c0_44 = arith.constant 0 : index
    %c0_45 = arith.constant 0 : index
    %43 = vector.load %arg2[%c7_43, %c0_44, %c0_45] : memref<8x4x128xf32, #tpu.memory_space<vmem>>, vector<1x4x128xf32>
    %44 = vector.shape_cast %43 : vector<1x4x128xf32> to vector<4x128xf32>
    %cst_46 = arith.constant dense<0.000000e+00> : vector<128x128xf32>
    %45 = tpu.matmul %42, %44, %cst_46 {dimension_numbers = #tpu.dot_dimension_numbers<[1], [0], [0], [1], [0, 0, 1, 1], [], []>} : vector<128x4xf32>, vector<4x128xf32>, vector<128x128xf32> -> vector<128x128xf32>
    %46 = arith.addf %40, %45 : vector<128x128xf32>
    %c0_47 = arith.constant 0 : index
    %c0_48 = arith.constant 0 : index
    %47 = vector.load %arg3[%c0_47, %c0_48] : memref<1x128xf32, #tpu.memory_space<vmem>>, vector<1x128xf32>
    %48 = vector.broadcast %47 : vector<1x128xf32> to vector<128x128xf32>
    %49 = arith.addf %46, %48 : vector<128x128xf32>
    %cst_49 = arith.constant 0.000000e+00 : f32
    %50 = vector.broadcast %cst_49 : f32 to vector<128x128xf32>
    %51 = arith.maximumf %49, %50 : vector<128x128xf32>
    %52 = arith.truncf %51 : vector<128x128xf32> to vector<128x128xbf16>
    %53 = vector.shape_cast %52 : vector<128x128xbf16> to vector<8x16x128xbf16>
    %c0_50 = arith.constant 0 : index
    %c18 = arith.constant 18 : index
    %c0_51 = arith.constant 0 : index
    %54 = vector.load %arg11[%c0_50, %c18, %c0_51] : memref<8x48x640xbf16, #tpu.memory_space<vmem>>, vector<8x16x128xbf16>
    tpu.vector_store %arg11[%c0_50, %c18, %c0_51], %53 {strides = array<i32>} : memref<8x48x640xbf16, #tpu.memory_space<vmem>>, vector<8x16x128xbf16>,
    %cst_52 = arith.constant 0.000000e+00 : bf16
    %55 = vector.broadcast %cst_52 : bf16 to vector<8x2x128xbf16>
    %c0_53 = arith.constant 0 : index
    %c16 = arith.constant 16 : index
    %c0_54 = arith.constant 0 : index
    %56 = vector.load %arg11[%c0_53, %c16, %c0_54] : memref<8x48x640xbf16, #tpu.memory_space<vmem>>, vector<8x2x128xbf16>
    tpu.vector_store %arg11[%c0_53, %c16, %c0_54], %55 {strides = array<i32>} : memref<8x48x640xbf16, #tpu.memory_space<vmem>>, vector<8x2x128xbf16>,
    %c0_55 = arith.constant 0 : index
    %c17 = arith.constant 17 : index
    %c128 = arith.constant 128 : index
    %57 = vector.load %arg11[%c0_55, %c17, %c128] : memref<8x48x640xbf16, #tpu.memory_space<vmem>>, vector<8x16x128xbf16>
    tpu.vector_store %arg11[%c0_55, %c17, %c128], %53 {strides = array<i32>} : memref<8x48x640xbf16, #tpu.memory_space<vmem>>, vector<8x16x128xbf16>,
    %cst_56 = arith.constant 0.000000e+00 : bf16
    %58 = vector.broadcast %cst_56 : bf16 to vector<8x1x128xbf16>
    %c0_57 = arith.constant 0 : index
    %c16_58 = arith.constant 16 : index
    %c128_59 = arith.constant 128 : index
    %59 = vector.load %arg11[%c0_57, %c16_58, %c128_59] : memref<8x48x640xbf16, #tpu.memory_space<vmem>>, vector<8x1x128xbf16>
    tpu.vector_store %arg11[%c0_57, %c16_58, %c128_59], %58 {strides = array<i32>} : memref<8x48x640xbf16, #tpu.memory_space<vmem>>, vector<8x1x128xbf16>,
    %c0_60 = arith.constant 0 : index
    %c16_61 = arith.constant 16 : index
    %c256 = arith.constant 256 : index
    %60 = vector.load %arg11[%c0_60, %c16_61, %c256] : memref<8x48x640xbf16, #tpu.memory_space<vmem>>, vector<8x16x128xbf16>
    tpu.vector_store %arg11[%c0_60, %c16_61, %c256], %53 {strides = array<i32>} : memref<8x48x640xbf16, #tpu.memory_space<vmem>>, vector<8x16x128xbf16>,
    %c0_62 = arith.constant 0 : index
    %c15 = arith.constant 15 : index
    %c384 = arith.constant 384 : index
    %61 = vector.load %arg11[%c0_62, %c15, %c384] : memref<8x48x640xbf16, #tpu.memory_space<vmem>>, vector<8x16x128xbf16>
    tpu.vector_store %arg11[%c0_62, %c15, %c384], %53 {strides = array<i32>} : memref<8x48x640xbf16, #tpu.memory_space<vmem>>, vector<8x16x128xbf16>,
    %cst_63 = arith.constant 0.000000e+00 : bf16
    %62 = vector.broadcast %cst_63 : bf16 to vector<8x1x128xbf16>
    %c0_64 = arith.constant 0 : index
    %c31 = arith.constant 31 : index
    %c384_65 = arith.constant 384 : index
    %63 = vector.load %arg11[%c0_64, %c31, %c384_65] : memref<8x48x640xbf16, #tpu.memory_space<vmem>>, vector<8x1x128xbf16>
    tpu.vector_store %arg11[%c0_64, %c31, %c384_65], %62 {strides = array<i32>} : memref<8x48x640xbf16, #tpu.memory_space<vmem>>, vector<8x1x128xbf16>,
    %c0_66 = arith.constant 0 : index
    %c14 = arith.constant 14 : index
    %c512 = arith.constant 512 : index
    %64 = vector.load %arg11[%c0_66, %c14, %c512] : memref<8x48x640xbf16, #tpu.memory_space<vmem>>, vector<8x16x128xbf16>
    tpu.vector_store %arg11[%c0_66, %c14, %c512], %53 {strides = array<i32>} : memref<8x48x640xbf16, #tpu.memory_space<vmem>>, vector<8x16x128xbf16>,
    %cst_67 = arith.constant 0.000000e+00 : bf16
    %65 = vector.broadcast %cst_67 : bf16 to vector<8x2x128xbf16>
    %c0_68 = arith.constant 0 : index
    %c30 = arith.constant 30 : index
    %c512_69 = arith.constant 512 : index
    %66 = vector.load %arg11[%c0_68, %c30, %c512_69] : memref<8x48x640xbf16, #tpu.memory_space<vmem>>, vector<8x2x128xbf16>
    tpu.vector_store %arg11[%c0_68, %c30, %c512_69], %65 {strides = array<i32>} : memref<8x48x640xbf16, #tpu.memory_space<vmem>>, vector<8x2x128xbf16>,
    %c0_70 = arith.constant 0 : index
    %c16_71 = arith.constant 16 : index
    %c0_72 = arith.constant 0 : index
    %67 = vector.load %arg11[%c0_70, %c16_71, %c0_72] : memref<8x48x640xbf16, #tpu.memory_space<vmem>>, vector<8x16x640xbf16>
    %68 = vector.shape_cast %67 : vector<8x16x640xbf16> to vector<128x640xbf16>
    %c0_73 = arith.constant 0 : index
    %c0_74 = arith.constant 0 : index
    %69 = vector.load %arg4[%c0_73, %c0_74] : memref<640x256xbf16, #tpu.memory_space<vmem>>, vector<640x256xbf16>
    %cst_75 = arith.constant dense<0.000000e+00> : vector<128x256xf32>
    %70 = tpu.matmul %68, %69, %cst_75 {dimension_numbers = #tpu.dot_dimension_numbers<[1], [0], [0], [1], [0, 0, 1, 1], [], []>} : vector<128x640xbf16>, vector<640x256xbf16>, vector<128x256xf32> -> vector<128x256xf32>
    %c0_76 = arith.constant 0 : index
    %c0_77 = arith.constant 0 : index
    %71 = vector.load %arg5[%c0_76, %c0_77] : memref<1x256xf32, #tpu.memory_space<vmem>>, vector<1x256xf32>
    %72 = vector.broadcast %71 : vector<1x256xf32> to vector<128x256xf32>
    %73 = arith.addf %70, %72 : vector<128x256xf32>
    %cst_78 = arith.constant 0.000000e+00 : f32
    %74 = vector.broadcast %cst_78 : f32 to vector<128x256xf32>
    %75 = arith.maximumf %73, %74 : vector<128x256xf32>
    %76 = arith.truncf %75 : vector<128x256xf32> to vector<128x256xbf16>
    %77 = vector.shape_cast %76 : vector<128x256xbf16> to vector<8x16x256xbf16>
    %c0_79 = arith.constant 0 : index
    %c17_80 = arith.constant 17 : index
    %c0_81 = arith.constant 0 : index
    %78 = vector.load %arg12[%c0_79, %c17_80, %c0_81] : memref<8x48x768xbf16, #tpu.memory_space<vmem>>, vector<8x16x256xbf16>
    tpu.vector_store %arg12[%c0_79, %c17_80, %c0_81], %77 {strides = array<i32>} : memref<8x48x768xbf16, #tpu.memory_space<vmem>>, vector<8x16x256xbf16>,
    %cst_82 = arith.constant 0.000000e+00 : bf16
    %79 = vector.broadcast %cst_82 : bf16 to vector<8x1x256xbf16>
    %c0_83 = arith.constant 0 : index
    %c16_84 = arith.constant 16 : index
    %c0_85 = arith.constant 0 : index
    %80 = vector.load %arg12[%c0_83, %c16_84, %c0_85] : memref<8x48x768xbf16, #tpu.memory_space<vmem>>, vector<8x1x256xbf16>
    tpu.vector_store %arg12[%c0_83, %c16_84, %c0_85], %79 {strides = array<i32>} : memref<8x48x768xbf16, #tpu.memory_space<vmem>>, vector<8x1x256xbf16>,
    %c0_86 = arith.constant 0 : index
    %c16_87 = arith.constant 16 : index
    %c256_88 = arith.constant 256 : index
    %81 = vector.load %arg12[%c0_86, %c16_87, %c256_88] : memref<8x48x768xbf16, #tpu.memory_space<vmem>>, vector<8x16x256xbf16>
    tpu.vector_store %arg12[%c0_86, %c16_87, %c256_88], %77 {strides = array<i32>} : memref<8x48x768xbf16, #tpu.memory_space<vmem>>, vector<8x16x256xbf16>,
    %c0_89 = arith.constant 0 : index
    %c15_90 = arith.constant 15 : index
    %c512_91 = arith.constant 512 : index
    %82 = vector.load %arg12[%c0_89, %c15_90, %c512_91] : memref<8x48x768xbf16, #tpu.memory_space<vmem>>, vector<8x16x256xbf16>
    tpu.vector_store %arg12[%c0_89, %c15_90, %c512_91], %77 {strides = array<i32>} : memref<8x48x768xbf16, #tpu.memory_space<vmem>>, vector<8x16x256xbf16>,
    %cst_92 = arith.constant 0.000000e+00 : bf16
    %83 = vector.broadcast %cst_92 : bf16 to vector<8x1x256xbf16>
    %c0_93 = arith.constant 0 : index
    %c31_94 = arith.constant 31 : index
    %c512_95 = arith.constant 512 : index
    %84 = vector.load %arg12[%c0_93, %c31_94, %c512_95] : memref<8x48x768xbf16, #tpu.memory_space<vmem>>, vector<8x1x256xbf16>
    tpu.vector_store %arg12[%c0_93, %c31_94, %c512_95], %83 {strides = array<i32>} : memref<8x48x768xbf16, #tpu.memory_space<vmem>>, vector<8x1x256xbf16>,
    %c0_96 = arith.constant 0 : index
    %c16_97 = arith.constant 16 : index
    %c0_98 = arith.constant 0 : index
    %85 = vector.load %arg12[%c0_96, %c16_97, %c0_98] : memref<8x48x768xbf16, #tpu.memory_space<vmem>>, vector<8x16x768xbf16>
    %86 = vector.shape_cast %85 : vector<8x16x768xbf16> to vector<128x768xbf16>
    %c0_99 = arith.constant 0 : index
    %c0_100 = arith.constant 0 : index
    %87 = vector.load %arg6[%c0_99, %c0_100] : memref<768x128xbf16, #tpu.memory_space<vmem>>, vector<768x128xbf16>
    %cst_101 = arith.constant dense<0.000000e+00> : vector<128x128xf32>
    %88 = tpu.matmul %86, %87, %cst_101 {dimension_numbers = #tpu.dot_dimension_numbers<[1], [0], [0], [1], [0, 0, 1, 1], [], []>} : vector<128x768xbf16>, vector<768x128xbf16>, vector<128x128xf32> -> vector<128x128xf32>
    %c0_102 = arith.constant 0 : index
    %c0_103 = arith.constant 0 : index
    %89 = vector.load %arg7[%c0_102, %c0_103] : memref<1x128xf32, #tpu.memory_space<vmem>>, vector<1x128xf32>
    %90 = vector.broadcast %89 : vector<1x128xf32> to vector<128x128xf32>
    %91 = arith.addf %88, %90 : vector<128x128xf32>
    %cst_104 = arith.constant 0.000000e+00 : f32
    %92 = vector.broadcast %cst_104 : f32 to vector<128x128xf32>
    %93 = arith.maximumf %91, %92 : vector<128x128xf32>
    %94 = vector.shape_cast %93 : vector<128x128xf32> to vector<8x16x128xf32>
    %cst_105 = arith.constant dense<0.000000e+00> : vector<8x128xf32>
    %95 = vector.multi_reduction <add>, %94, %cst_105 [1] : vector<8x16x128xf32> to vector<8x128xf32>
    %c0_106 = arith.constant 0 : index
    %c0_107 = arith.constant 0 : index
    %96 = vector.load %arg8[%c0_106, %c0_107] : memref<128x128xf32, #tpu.memory_space<vmem>>, vector<128x128xf32>
    %cst_108 = arith.constant dense<0.000000e+00> : vector<8x128xf32>
    %97 = tpu.matmul %95, %96, %cst_108 {dimension_numbers = #tpu.dot_dimension_numbers<[1], [0], [0], [1], [0, 0, 1, 1], [], []>} : vector<8x128xf32>, vector<128x128xf32>, vector<8x128xf32> -> vector<8x128xf32>
    %c0_109 = arith.constant 0 : index
    %c0_110 = arith.constant 0 : index
    %98 = vector.load %arg9[%c0_109, %c0_110] : memref<1x128xf32, #tpu.memory_space<vmem>>, vector<1x128xf32>
    %99 = vector.broadcast %98 : vector<1x128xf32> to vector<8x128xf32>
    %100 = arith.addf %97, %99 : vector<8x128xf32>
    %c0_111 = arith.constant 0 : index
    %c0_112 = arith.constant 0 : index
    %101 = vector.load %arg10[%c0_111, %c0_112] : memref<8x128xf32, #tpu.memory_space<vmem>>, vector<8x128xf32>
    tpu.vector_store %arg10[%c0_111, %c0_112], %100 {strides = array<i32>} : memref<8x128xf32, #tpu.memory_space<vmem>>, vector<8x128xf32>,
    return
  }
  func.func @transform_0(%arg0: i32) -> (i32, i32, i32) {
    %c0_i32 = arith.constant 0 : i32
    %c0_i32_0 = arith.constant 0 : i32
    %c0_i32_1 = arith.constant 0 : i32
    return %arg0, %c0_i32, %c0_i32_0 : i32, i32, i32
  }
  func.func @transform_1(%arg0: i32) -> (i32, i32, i32) {
    %c0_i32 = arith.constant 0 : i32
    %c0_i32_0 = arith.constant 0 : i32
    %c0_i32_1 = arith.constant 0 : i32
    %c0_i32_2 = arith.constant 0 : i32
    return %c0_i32, %c0_i32_0, %c0_i32_1 : i32, i32, i32
  }
  func.func @transform_2(%arg0: i32) -> (i32, i32) {
    %c0_i32 = arith.constant 0 : i32
    %c0_i32_0 = arith.constant 0 : i32
    %c0_i32_1 = arith.constant 0 : i32
    return %c0_i32, %c0_i32_0 : i32, i32
  }
  func.func @transform_3(%arg0: i32) -> (i32, i32) {
    %c0_i32 = arith.constant 0 : i32
    %c0_i32_0 = arith.constant 0 : i32
    %c0_i32_1 = arith.constant 0 : i32
    return %c0_i32, %c0_i32_0 : i32, i32
  }
  func.func @transform_4(%arg0: i32) -> (i32, i32) {
    %c0_i32 = arith.constant 0 : i32
    %c0_i32_0 = arith.constant 0 : i32
    %c0_i32_1 = arith.constant 0 : i32
    return %c0_i32, %c0_i32_0 : i32, i32
  }
  func.func @transform_5(%arg0: i32) -> (i32, i32) {
    %c0_i32 = arith.constant 0 : i32
    %c0_i32_0 = arith.constant 0 : i32
    %c0_i32_1 = arith.constant 0 : i32
    return %c0_i32, %c0_i32_0 : i32, i32
  }
  func.func @transform_6(%arg0: i32) -> (i32, i32) {
    %c0_i32 = arith.constant 0 : i32
    %c0_i32_0 = arith.constant 0 : i32
    %c0_i32_1 = arith.constant 0 : i32
    return %c0_i32, %c0_i32_0 : i32, i32
  }
  func.func @transform_7(%arg0: i32) -> (i32, i32) {
    %c0_i32 = arith.constant 0 : i32
    %c0_i32_0 = arith.constant 0 : i32
    %c0_i32_1 = arith.constant 0 : i32
    return %c0_i32, %c0_i32_0 : i32, i32
  }
  func.func @transform_8(%arg0: i32) -> (i32, i32) {
    %c0_i32 = arith.constant 0 : i32
    %c0_i32_0 = arith.constant 0 : i32
    %c0_i32_1 = arith.constant 0 : i32
    return %c0_i32, %c0_i32_0 : i32, i32
  }
  func.func @transform_9(%arg0: i32) -> (i32, i32) {
    %c0_i32 = arith.constant 0 : i32
    %c0_i32_0 = arith.constant 0 : i32
    return %arg0, %c0_i32 : i32, i32
  }
}

</mosaic_0001>

<bundles_post_ra>
// kernel: tpu_custom_call.1
= control target key start
LH: loop header
LB: loop body
LE: loop exit
PB: predicated region body
PF: predicated region fallthrough
CT: control target
= control target key end

     0   :  { %14 = vsyncpa [#allocation5], 0  ;;  %s8915_s0 = inlined_call_operand.vmem [shape: f32[8,24,4], index: 0, kind: input, shape index: {}]   ;;  %s8916_s1 = inlined_call_operand.vmem [shape: f32[8,4,128], index: 1, kind: input, shape index: {}]   ;;  %s8917_s2 = inlined_call_operand.vmem [shape: f32[1,128], index: 2, kind: input, shape index: {}]   ;;  %s8918_s3 = inlined_call_operand.hbm [shape: bf16[640,256], index: 3, kind: input, shape index: {}]   ;;  %s8919_s4 = inlined_call_operand.vmem [shape: f32[1,256], index: 4, kind: input, shape index: {}]   ;;  %s8920_s5 = inlined_call_operand.hbm [shape: bf16[768,128], index: 5, kind: input, shape index: {}]   ;;  %s8921_s6 = inlined_call_operand.vmem [shape: f32[1,128], index: 6, kind: input, shape index: {}]   ;;  %s8922_s7 = inlined_call_operand.vmem [shape: f32[128,128], index: 7, kind: input, shape index: {}]   ;;  %s8923_s8 = inlined_call_operand.vmem [shape: f32[1,128], index: 8, kind: input, shape index: {}]   ;;  %s8924_s9 = inlined_call_operand.hbm [shape: f32[8,128], index: 9, kind: output, shape index: {}]  }
   0x1   :  { %15 = vsyncpa [#allocation8], 0 }
   0x2   :  { %16 = vsyncpa [#allocation6], 0  ;;  %s6788_s30 = smov [#allocation4]  }
   0x3   :  { %s28_s10 = sshll.u32 %s6788_s30, 4  ;;  %s29_s10 = int_to_ptr.vmem [resolvable:$true] %s28_s10 }
   0x4   :  { %s6730_s11 = scalar_lea.vmem %s29_s10, 10240  ;;  %p6735_p1 = scmp.lt.s32.totalorder %s29_s10, %s29_s10 }
   0x5   :  { %p6731_p0 = scmp.ne.s32.totalorder %s29_s10, %s6730_s11  ;;  %p6736_p2 = scmp.lt.s32.totalorder %s6730_s11, %s6730_s11 }
   0x7   :  { %p6737_p3 = por %p6736_p2, %p6735_p1 }
   0x9   :  { %p6738_p4 = pnand %p6737_p3, %p6731_p0 }
   0xb   :  { %6741 = shalt.err (!%p6738_p4)
}
   0xc   :  { %s6789_s12 = smov 128   ;;  %s6790_s13 = smov 8  }
   0xd   :  { %34 = dma.hbm_to_vmem [thread:$0]  %s8918_s3, 10240, %s29_s10, [#allocation5], %s6789_s12, %s6789_s12, %s6790_s13  }
   0xe   :  { %s6791_s16 = smov [#allocation7]  }
   0xf   :  { %s42_s17 = sshll.u32 %s6791_s16, 4  ;;  %s43_s17 = int_to_ptr.vmem [resolvable:$true] %s42_s17 }
  0x10   :  { %s6750_s18 = scalar_lea.vmem %s43_s17, 6144  ;;  %p6755_p6 = scmp.lt.s32.totalorder %s43_s17, %s43_s17 }
  0x11   :  { %p6751_p5 = scmp.ne.s32.totalorder %s43_s17, %s6750_s18  ;;  %p6756_p7 = scmp.lt.s32.totalorder %s6750_s18, %s6750_s18 }
  0x13   :  { %p6757_p8 = por %p6756_p7, %p6755_p6 }
  0x15   :  { %p6758_p9 = pnand %p6757_p8, %p6751_p5 }
  0x17   :  { %6761 = shalt.err (!%p6758_p9)
}
  0x18   :  { %s6792_s19 = smov 64   ;;  %s6793_s20 = smov 4  }
  0x19   :  { %48 = dma.hbm_to_vmem [thread:$0]  %s8920_s5, 6144, %s43_s17, [#allocation8], %s6792_s19, %s6792_s19, %s6793_s20  }
  0x1a   :  { %6782 = dma.done.wait [#allocation5], 10240  }
  0x1b   :  { %6783 = vsyncadd [#allocation5], 4294957056 }
  0x1c   :  { %6784 = dma.done.wait [#allocation8], 6144  }
  0x1d   :  { %6785 = vsyncadd [#allocation8], 4294961152  ;;  %vm146_vm0 = vcmask 1043456   ;;  %vm97_vm1 = vcmask 31744   ;;  %v5454_v0 = vld [vmem:[%s8916_s1 + $0x4] sm:$0xf] }
  0x1e   :  { %v78_v1 = vld [vmem:[%s8916_s1] sm:$0xf]  ;;  %6225 = vmatprep.subr.msk.mxu0 %vm146_vm0, %v5454_v0  ;;  %v80_v4 = vld [vmem:[%s8915_s0 + $0x9] sm:$0xff]  ;;  %v64_v9 = vld [vmem:[%s8915_s0 + $0x18] sm:$0xff]  ;;  %vm1958_vm2 = vcmask 1040384   ;;  %vm2435_vm4 = vcmask 1043459  }
  0x1f   :  { %v79_v2 = vld [vmem:[%s8915_s0 + $0x1] sm:$0xff]  ;;  %6251 = vmatprep.subr.msk.mxu1 %vm146_vm0, %v78_v1  ;;  %6226 = vmatpush3.msk.msra.mxu0 %vm146_vm0, %v5454_v0  ;;  %v5507_v7 = vld [vmem:[%s8916_s1 + $0xc] sm:$0xf]  ;;  %v81_v8 = vld [vmem:[%s8915_s0 + $0x19] sm:$0xff]  ;;  %vm2057_vm3 = vsmask.f32 256 }
  0x20   :  { %v62_v3 = vld [vmem:[%s8915_s0] sm:$0xff]  ;;  %v63_v5 = vld [vmem:[%s8915_s0 + $0x8] sm:$0xff]  ;;  %6227 = vmatprep.mubr.msk.f32.mxu0 %vm97_vm1, %v79_v2  ;;  %6252 = vmatpush3.msk.msra.mxu1 %vm146_vm0, %v78_v1  ;;  %v83_v12 = vld [vmem:[%s8915_s0 + $0x31] sm:$0xff]  ;;  %vm2436_vm5 = vsmask.f32 7950  ;;  %vm1959_vm7 = vcmask 1044484  }
  0x21   :  { %v5489_v6 = vld [vmem:[%s8916_s1 + $0x8] sm:$0xf]  ;;  %6253 = vmatprep.mubr.msk.f32.mxu1 %vm97_vm1, %v62_v3  ;;  %6228 = vmatmul.mubr.msk.f32.vlgmr.msra.gmra.mxu0 %vm97_vm1, %v80_v4  ;;  %v65_v11 = vld [vmem:[%s8915_s0 + $0x20] sm:$0xff]  ;;  %v66_v13 = vld [vmem:[%s8915_s0 + $0x30] sm:$0xff]  ;;  %vm2336_vm6 = vsmask.f32 3328 }
  0x22   :  { %6254 = vmatmul.mubr.msk.f32.vlgmr.msra.gmra.mxu1 %vm97_vm1, %v63_v5  ;;  %6277 = vmatprep.subr.msk.mxu0 %vm146_vm0, %v5489_v6  ;;  %v82_v10 = vld [vmem:[%s8915_s0 + $0x21] sm:$0xff]  ;;  %v84_v14 = vld [vmem:[%s8915_s0 + $0x39] sm:$0xff]  ;;  %v85_v16 = vld [vmem:[%s8915_s0 + $0x49] sm:$0xff]  ;;  %vm2058_vm8 = vsmask.f32 4368  ;;  %vm2519_vm9 = vcmask 1042432  }
  0x23   :  { %6303 = vmatprep.subr.msk.mxu1 %vm146_vm0, %v5507_v7  ;;  %6278 = vmatpush3.msk.msra.mxu0 %vm146_vm0, %v5489_v6  ;;  %v67_v15 = vld [vmem:[%s8915_s0 + $0x38] sm:$0xff]  ;;  %v68_v17 = vld [vmem:[%s8915_s0 + $0x48] sm:$0xff]  ;;  %v69_v19 = vld [vmem:[%s8915_s0 + $0x50] sm:$0xff]  ;;  %vm2520_vm10 = vcmask 1046532   ;;  %vm2221_vm11 = vsmask.f32 7938 }
  0x24   :  { %6230 = vmatprep.mubr.msk.f32.mxu0 %vm97_vm1, %v81_v8  ;;  %6256 = vmatprep.mubr.msk.f32.mxu1 %vm97_vm1, %v64_v9  ;;  %v86_v18 = vld [vmem:[%s8915_s0 + $0x51] sm:$0xff]  ;;  %v87_v22 = vld [vmem:[%s8915_s0 + $0x61] sm:$0xff]  ;;  %v88_v24 = vld [vmem:[%s8915_s0 + $0x69] sm:$0xff]  ;;  %vm2337_vm12 = vsmask.f32 7440  ;;  %s6797_s21 = smov [#allocation9]  }
  0x25   :  { %6304 = vmatpush3.msk.msra.mxu1 %vm146_vm0, %v5507_v7  ;;  %6231 = vmatmul.mubr.msk.f32.gmra.mxu0 %vm97_vm1, %v82_v10  ;;  %v5525_v20 = vld [vmem:[%s8916_s1 + $0x10] sm:$0xf]  ;;  %v5543_v21 = vld [vmem:[%s8916_s1 + $0x14] sm:$0xf]  ;;  %v70_v23 = vld [vmem:[%s8915_s0 + $0x60] sm:$0xff]  ;;  %s5444_s22 = sshll.u32 %s6797_s21, 4  ;;  %s5445_s22 = int_to_ptr.vmem [resolvable:$true] %s5444_s22 }
  0x26   :  { %6257 = vmatmul.mubr.msk.f32.gmra.mxu1 %vm97_vm1, %v65_v11  ;;  %6233 = vmatprep.mubr.msk.f32.mxu0 %vm97_vm1, %v83_v12  ;;  %v71_v25 = vld [vmem:[%s8915_s0 + $0x68] sm:$0xff]  ;;  %v89_v26 = vld [vmem:[%s8915_s0 + $0x79] sm:$0xff]  ;;  %v91_v30 = vld [vmem:[%s8915_s0 + $0x91] sm:$0xff]  ;;  %s6762_s3 = scalar_lea.vmem %s5445_s22, 128  ;;  %p6767_p11 = scmp.lt.s32.totalorder %s5445_s22, %s5445_s22 }
  0x27   :  { %6259 = vmatprep.mubr.msk.f32.mxu1 %vm97_vm1, %v66_v13  ;;  %6329 = vmatprep.subr.msk.mxu0 %vm146_vm0, %v5525_v20  ;;  %v72_v27 = vld [vmem:[%s8915_s0 + $0x78] sm:$0xff]  ;;  %v90_v28 = vld [vmem:[%s8915_s0 + $0x81] sm:$0xff]  ;;  %v74_v31 = vld [vmem:[%s8915_s0 + $0x90] sm:$0xff]  ;;  %p6763_p10 = scmp.ne.s32.totalorder %s5445_s22, %s6762_s3  ;;  %p6768_p12 = scmp.lt.s32.totalorder %s6762_s3, %s6762_s3 }
  0x28   :  { %6355 = vmatprep.subr.msk.mxu1 %vm146_vm0, %v5543_v21  ;;  %v73_v29 = vld [vmem:[%s8915_s0 + $0x80] sm:$0xff]  ;;  %v75_v33 = vld [vmem:[%s8915_s0 + $0x98] sm:$0xff]  ;;  %v93_v34 = vld [vmem:[%s8915_s0 + $0xa9] sm:$0xff] }
  0x29   :  { %6234 = vmatmul.mubr.msk.f32.gmra.mxu0 %vm97_vm1, %v84_v14  ;;  %v92_v32 = vld [vmem:[%s8915_s0 + $0x99] sm:$0xff]  ;;  %v76_v35 = vld [vmem:[%s8915_s0 + $0xa8] sm:$0xff]  ;;  %v94_v36 = vld [vmem:[%s8915_s0 + $0xb1] sm:$0xff]  ;;  %p6769_p13 = por %p6768_p12, %p6767_p11 }
  0x2a   :  { %6260 = vmatmul.mubr.msk.f32.gmra.mxu1 %vm97_vm1, %v67_v15  ;;  %6236 = vmatprep.mubr.msk.f32.mxu0 %vm97_vm1, %v85_v16  ;;  %v77_v37 = vld [vmem:[%s8915_s0 + $0xb0] sm:$0xff]  ;;  %v491_v38 = vld [vmem:[%s8915_s0 + $0x2] sm:$0xff]  ;;  %v493_v42 = vld [vmem:[%s8915_s0 + $0x1a] sm:$0xff] }
  0x2b   :  { %6262 = vmatprep.mubr.msk.f32.mxu1 %vm97_vm1, %v68_v17  ;;  %v721_v39 = vld [vmem:[%s8915_s0 + $0x3] sm:$0xff]  ;;  %v722_v41 = vld [vmem:[%s8915_s0 + $0xb] sm:$0xff]  ;;  %v723_v43 = vld [vmem:[%s8915_s0 + $0x1b] sm:$0xff]  ;;  %p6770_p0 = pnand %p6769_p13, %p6763_p10 }
  0x2c   :  { %v492_v40 = vld [vmem:[%s8915_s0 + $0xa] sm:$0xff]  ;;  %v7035_v44 = vld [vmem:[%s8916_s1 + $0x18] sm:$0xf]  ;;  %v7040_v45 = vld [vmem:[%s8916_s1 + $0x1c] sm:$0xf] }
  0x2d   :  { %6237 = vmatmul.mubr.msk.f32.gmra.mxu0 %vm97_vm1, %v86_v18  ;;  %v494_v46 = vld [vmem:[%s8915_s0 + $0x22] sm:$0xff]  ;;  %v495_v48 = vld [vmem:[%s8915_s0 + $0x32] sm:$0xff]  ;;  %v496_v50 = vld [vmem:[%s8915_s0 + $0x3a] sm:$0xff] }
  0x2e   :  { %6263 = vmatmul.mubr.msk.f32.gmra.mxu1 %vm97_vm1, %v69_v19  ;;  %6239 = vmatprep.mubr.msk.f32.mxu0 %vm97_vm1, %v87_v22  ;;  %v724_v47 = vld [vmem:[%s8915_s0 + $0x23] sm:$0xff]  ;;  %v725_v49 = vld [vmem:[%s8915_s0 + $0x33] sm:$0xff]  ;;  %v726_v51 = vld [vmem:[%s8915_s0 + $0x3b] sm:$0xff] }
  0x2f   :  { %6265 = vmatprep.mubr.msk.f32.mxu1 %vm97_vm1, %v70_v23  ;;  %v497_v52 = vld [vmem:[%s8915_s0 + $0x4a] sm:$0xff]  ;;  %v498_v54 = vld [vmem:[%s8915_s0 + $0x52] sm:$0xff]  ;;  %v499_v56 = vld [vmem:[%s8915_s0 + $0x62] sm:$0xff] }
  0x30   :  { %v727_v53 = vld [vmem:[%s8915_s0 + $0x4b] sm:$0xff]  ;;  %v728_v55 = vld [vmem:[%s8915_s0 + $0x53] sm:$0xff]  ;;  %v729_v57 = vld [vmem:[%s8915_s0 + $0x63] sm:$0xff] }
  0x31   :  { %6240 = vmatmul.mubr.msk.f32.gmra.mxu0 %vm97_vm1, %v88_v24  ;;  %v500_v58 = vld [vmem:[%s8915_s0 + $0x6a] sm:$0xff]  ;;  %v501_v60 = vld [vmem:[%s8915_s0 + $0x7a] sm:$0xff]  ;;  %v502_v62 = vld [vmem:[%s8915_s0 + $0x82] sm:$0xff] }
  0x32   :  { %6266 = vmatmul.mubr.msk.f32.gmra.mxu1 %vm97_vm1, %v71_v25  ;;  %6242 = vmatprep.mubr.msk.f32.mxu0 %vm97_vm1, %v89_v26  ;;  %v730_v59 = vld [vmem:[%s8915_s0 + $0x6b] sm:$0xff]  ;;  %v731_v61 = vld [vmem:[%s8915_s0 + $0x7b] sm:$0xff]  ;;  %v732_v63 = vld [vmem:[%s8915_s0 + $0x83] sm:$0xff] }
  0x33   :  { %6268 = vmatprep.mubr.msk.f32.mxu1 %vm97_vm1, %v72_v27  ;;  %v503_v0 = vld [vmem:[%s8915_s0 + $0x92] sm:$0xff]  ;;  %v504_v2 = vld [vmem:[%s8915_s0 + $0x9a] sm:$0xff]  ;;  %v505_v4 = vld [vmem:[%s8915_s0 + $0xaa] sm:$0xff] }
  0x34   :  { %v733_v1 = vld [vmem:[%s8915_s0 + $0x93] sm:$0xff]  ;;  %v734_v3 = vld [vmem:[%s8915_s0 + $0x9b] sm:$0xff]  ;;  %v735_v5 = vld [vmem:[%s8915_s0 + $0xab] sm:$0xff] }
  0x35   :  { %6243 = vmatmul.mubr.msk.f32.gmra.mxu0 %vm97_vm1, %v90_v28  ;;  %v506_v6 = vld [vmem:[%s8915_s0 + $0xb2] sm:$0xff]  ;;  %v951_v8 = vld [vmem:[%s8915_s0 + $0x4] sm:$0xff]  ;;  %v953_v12 = vld [vmem:[%s8915_s0 + $0x1c] sm:$0xff] }
  0x36   :  { %6269 = vmatmul.mubr.msk.f32.gmra.mxu1 %vm97_vm1, %v73_v29  ;;  %6245 = vmatprep.mubr.msk.f32.mxu0 %vm97_vm1, %v91_v30  ;;  %v736_v7 = vld [vmem:[%s8915_s0 + $0xb3] sm:$0xff]  ;;  %v1181_v9 = vld [vmem:[%s8915_s0 + $0x5] sm:$0xff]  ;;  %v1183_v13 = vld [vmem:[%s8915_s0 + $0x1d] sm:$0xff] }
  0x37   :  { %6271 = vmatprep.mubr.msk.f32.mxu1 %vm97_vm1, %v74_v31  ;;  %v952_v10 = vld [vmem:[%s8915_s0 + $0xc] sm:$0xff]  ;;  %v954_v14 = vld [vmem:[%s8915_s0 + $0x24] sm:$0xff]  ;;  %v955_v16 = vld [vmem:[%s8915_s0 + $0x34] sm:$0xff] }
  0x38   :  { %v1182_v11 = vld [vmem:[%s8915_s0 + $0xd] sm:$0xff]  ;;  %v1184_v15 = vld [vmem:[%s8915_s0 + $0x25] sm:$0xff]  ;;  %v1185_v17 = vld [vmem:[%s8915_s0 + $0x35] sm:$0xff] }
  0x39   :  { %6246 = vmatmul.mubr.msk.f32.gmra.mxu0 %vm97_vm1, %v92_v32  ;;  %v956_v18 = vld [vmem:[%s8915_s0 + $0x3c] sm:$0xff]  ;;  %v958_v22 = vld [vmem:[%s8915_s0 + $0x54] sm:$0xff]  ;;  %v959_v24 = vld [vmem:[%s8915_s0 + $0x64] sm:$0xff] }
  0x3a   :  { %6272 = vmatmul.mubr.msk.f32.gmra.mxu1 %vm97_vm1, %v75_v33  ;;  %6248 = vmatprep.mubr.msk.f32.mxu0 %vm97_vm1, %v93_v34  ;;  %v1186_v19 = vld [vmem:[%s8915_s0 + $0x3d] sm:$0xff]  ;;  %v1188_v23 = vld [vmem:[%s8915_s0 + $0x55] sm:$0xff]  ;;  %v1189_v25 = vld [vmem:[%s8915_s0 + $0x65] sm:$0xff] }
  0x3b   :  { %6274 = vmatprep.mubr.msk.f32.mxu1 %vm97_vm1, %v76_v35  ;;  %v960_v26 = vld [vmem:[%s8915_s0 + $0x6c] sm:$0xff]  ;;  %v961_v28 = vld [vmem:[%s8915_s0 + $0x7c] sm:$0xff]  ;;  %v962_v30 = vld [vmem:[%s8915_s0 + $0x84] sm:$0xff] }
  0x3c   :  { %v1190_v27 = vld [vmem:[%s8915_s0 + $0x6d] sm:$0xff]  ;;  %v1191_v29 = vld [vmem:[%s8915_s0 + $0x7d] sm:$0xff]  ;;  %v1192_v31 = vld [vmem:[%s8915_s0 + $0x85] sm:$0xff] }
  0x3d   :  { %6249 = vmatmul.mubr.msk.f32.gmra.mxu0 %vm97_vm1, %v94_v36  ;;  %v963_v32 = vld [vmem:[%s8915_s0 + $0x94] sm:$0xff]  ;;  %v964_v34 = vld [vmem:[%s8915_s0 + $0x9c] sm:$0xff]  ;;  %v965_v36 = vld [vmem:[%s8915_s0 + $0xac] sm:$0xff] }
  0x3e   :  { %6275 = vmatmul.mubr.msk.f32.gmra.mxu1 %vm97_vm1, %v77_v37  ;;  %6279 = vmatprep.mubr.msk.f32.mxu0 %vm97_vm1, %v491_v38  ;;  %v1193_v33 = vld [vmem:[%s8915_s0 + $0x95] sm:$0xff]  ;;  %v1194_v35 = vld [vmem:[%s8915_s0 + $0x9d] sm:$0xff]  ;;  %v1195_v37 = vld [vmem:[%s8915_s0 + $0xad] sm:$0xff] }
  0x3f   :  { %6305 = vmatprep.mubr.msk.f32.mxu1 %vm97_vm1, %v721_v39  ;;  %v966_v38 = vld [vmem:[%s8915_s0 + $0xb4] sm:$0xff]  ;;  %vm7630_vm13 = vmand %vm1958_vm2, %vm2057_vm3 }
  0x40   :  { %v1196_v39 = vld [vmem:[%s8915_s0 + $0xb5] sm:$0xff]  ;;  %vm7636_vm14 = vmand %vm2435_vm4, %vm2436_vm5 }
  0x41   :  { %6280 = vmatmul.mubr.msk.f32.vlgmr.msra.gmra.mxu0 %vm97_vm1, %v492_v40  ;;  %v1411_v40 = vld [vmem:[%s8915_s0 + $0x6] sm:$0xff]  ;;  %vm7647_vm15 = vmand %vm146_vm0, %vm2336_vm6 }
  0x42   :  { %6306 = vmatmul.mubr.msk.f32.vlgmr.msra.gmra.mxu1 %vm97_vm1, %v722_v41  ;;  %6330 = vmatpush3.msk.msra.mxu0 %vm146_vm0, %v5525_v20  ;;  %v957_v20 = vld [vmem:[%s8915_s0 + $0x4c] sm:$0xff]  ;;  %vm7659_vm5 = vmor %vm2057_vm3, %vm2058_vm8 }
  0x43   :  { %6282 = vmatprep.mubr.msk.f32.mxu0 %vm97_vm1, %v493_v42  ;;  %6356 = vmatpush3.msk.msra.mxu1 %vm146_vm0, %v5543_v21  ;;  %v1187_v21 = vld [vmem:[%s8915_s0 + $0x4d] sm:$0xff]  ;;  %vm7673_vm3 = vmand %vm146_vm0, %vm2221_vm11  ;;  %vm3985_vm11 = vsmask.f32 4352 }
  0x44   :  { %6308 = vmatprep.mubr.msk.f32.mxu1 %vm97_vm1, %v723_v43  ;;  %6381 = vmatprep.subr.msk.mxu0 %vm146_vm0, %v7035_v44  ;;  %v1641_v41 = vld [vmem:[%s8915_s0 + $0x7] sm:$0xff]  ;;  %v1642_v43 = vld [vmem:[%s8915_s0 + $0xf] sm:$0xff]  ;;  %vm7683_vm8 = vmor %vm2336_vm6, %vm2337_vm12  ;;  %vm4193_vm6 = vsmask.f32 7966  ;;  %vm4200_vm12 = vsmask.f32 7424 }
  0x45   :  { %6407 = vmatprep.subr.msk.mxu1 %vm146_vm0, %v7040_v45  ;;  %6283 = vmatmul.mubr.msk.f32.gmra.mxu0 %vm97_vm1, %v494_v46  ;;  %v1412_v42 = vld [vmem:[%s8915_s0 + $0xe] sm:$0xff]  ;;  %v1414_v46 = vld [vmem:[%s8915_s0 + $0x26] sm:$0xff] }
  0x46   :  { %6309 = vmatmul.mubr.msk.f32.gmra.mxu1 %vm97_vm1, %v724_v47  ;;  %6285 = vmatprep.mubr.msk.f32.mxu0 %vm97_vm1, %v495_v48  ;;  %v1644_v47 = vld [vmem:[%s8915_s0 + $0x27] sm:$0xff]  ;;  %v1415_v48 = vld [vmem:[%s8915_s0 + $0x36] sm:$0xff] }
  0x47   :  { %6311 = vmatprep.mubr.msk.f32.mxu1 %vm97_vm1, %v725_v49  ;;  %v1645_v49 = vld [vmem:[%s8915_s0 + $0x37] sm:$0xff] }
  0x49   :  { %6286 = vmatmul.mubr.msk.f32.gmra.mxu0 %vm97_vm1, %v496_v50  ;;  %v1416_v50 = vld [vmem:[%s8915_s0 + $0x3e] sm:$0xff] }
  0x4a   :  { %6312 = vmatmul.mubr.msk.f32.gmra.mxu1 %vm97_vm1, %v726_v51  ;;  %6288 = vmatprep.mubr.msk.f32.mxu0 %vm97_vm1, %v497_v52  ;;  %v1646_v51 = vld [vmem:[%s8915_s0 + $0x3f] sm:$0xff]  ;;  %v1417_v52 = vld [vmem:[%s8915_s0 + $0x4e] sm:$0xff] }
  0x4b   :  { %6314 = vmatprep.mubr.msk.f32.mxu1 %vm97_vm1, %v727_v53  ;;  %v1647_v53 = vld [vmem:[%s8915_s0 + $0x4f] sm:$0xff] }
  0x4d   :  { %6289 = vmatmul.mubr.msk.f32.gmra.mxu0 %vm97_vm1, %v498_v54  ;;  %v1418_v54 = vld [vmem:[%s8915_s0 + $0x56] sm:$0xff] }
  0x4e   :  { %6315 = vmatmul.mubr.msk.f32.gmra.mxu1 %vm97_vm1, %v728_v55  ;;  %6291 = vmatprep.mubr.msk.f32.mxu0 %vm97_vm1, %v499_v56  ;;  %v1648_v55 = vld [vmem:[%s8915_s0 + $0x57] sm:$0xff]  ;;  %v1419_v56 = vld [vmem:[%s8915_s0 + $0x66] sm:$0xff] }
  0x4f   :  { %6317 = vmatprep.mubr.msk.f32.mxu1 %vm97_vm1, %v729_v57  ;;  %v1649_v57 = vld [vmem:[%s8915_s0 + $0x67] sm:$0xff] }
  0x51   :  { %6292 = vmatmul.mubr.msk.f32.gmra.mxu0 %vm97_vm1, %v500_v58  ;;  %v1420_v58 = vld [vmem:[%s8915_s0 + $0x6e] sm:$0xff] }
  0x52   :  { %6318 = vmatmul.mubr.msk.f32.gmra.mxu1 %vm97_vm1, %v730_v59  ;;  %6294 = vmatprep.mubr.msk.f32.mxu0 %vm97_vm1, %v501_v60  ;;  %v1650_v59 = vld [vmem:[%s8915_s0 + $0x6f] sm:$0xff]  ;;  %v1421_v60 = vld [vmem:[%s8915_s0 + $0x7e] sm:$0xff] }
  0x53   :  { %6320 = vmatprep.mubr.msk.f32.mxu1 %vm97_vm1, %v731_v61  ;;  %v1651_v61 = vld [vmem:[%s8915_s0 + $0x7f] sm:$0xff] }
  0x55   :  { %6295 = vmatmul.mubr.msk.f32.gmra.mxu0 %vm97_vm1, %v502_v62  ;;  %v1422_v62 = vld [vmem:[%s8915_s0 + $0x86] sm:$0xff] }
  0x56   :  { %6321 = vmatmul.mubr.msk.f32.gmra.mxu1 %vm97_vm1, %v732_v63  ;;  %6297 = vmatprep.mubr.msk.f32.mxu0 %vm97_vm1, %v503_v0  ;;  %v1652_v63 = vld [vmem:[%s8915_s0 + $0x87] sm:$0xff]  ;;  %v1423_v0 = vld [vmem:[%s8915_s0 + $0x96] sm:$0xff] }
  0x57   :  { %6323 = vmatprep.mubr.msk.f32.mxu1 %vm97_vm1, %v733_v1  ;;  %v1653_v1 = vld [vmem:[%s8915_s0 + $0x97] sm:$0xff] }
  0x59   :  { %6298 = vmatmul.mubr.msk.f32.gmra.mxu0 %vm97_vm1, %v504_v2  ;;  %v1424_v2 = vld [vmem:[%s8915_s0 + $0x9e] sm:$0xff] }
  0x5a   :  { %6324 = vmatmul.mubr.msk.f32.gmra.mxu1 %vm97_vm1, %v734_v3  ;;  %6300 = vmatprep.mubr.msk.f32.mxu0 %vm97_vm1, %v505_v4  ;;  %v1654_v3 = vld [vmem:[%s8915_s0 + $0x9f] sm:$0xff]  ;;  %v1425_v4 = vld [vmem:[%s8915_s0 + $0xae] sm:$0xff] }
  0x5b   :  { %6326 = vmatprep.mubr.msk.f32.mxu1 %vm97_vm1, %v735_v5  ;;  %v1655_v5 = vld [vmem:[%s8915_s0 + $0xaf] sm:$0xff] }
  0x5d   :  { %6301 = vmatmul.mubr.msk.f32.gmra.mxu0 %vm97_vm1, %v506_v6  ;;  %v1426_v6 = vld [vmem:[%s8915_s0 + $0xb6] sm:$0xff] }
  0x5e   :  { %6327 = vmatmul.mubr.msk.f32.gmra.mxu1 %vm97_vm1, %v736_v7  ;;  %6331 = vmatprep.mubr.msk.f32.mxu0 %vm97_vm1, %v951_v8  ;;  %v1656_v7 = vld [vmem:[%s8915_s0 + $0xb7] sm:$0xff] }
  0x5f   :  { %6357 = vmatprep.mubr.msk.f32.mxu1 %vm97_vm1, %v1181_v9  ;;  %v6480_v8 = vld [vmem:[#allocation4 + $0x74] ss:$8 sps:$4 sm:$0xff]  }
  0x60   :  { %v6483_v9 = vld [vmem:[#allocation4 + $0x174] ss:$8 sps:$4 sm:$0xff]  }
  0x61   :  { %6332 = vmatmul.mubr.msk.f32.vlgmr.msra.gmra.mxu0 %vm97_vm1, %v952_v10  ;;  %v6478_v10 = vld [vmem:[#allocation4 + $0x70] ss:$8 sps:$4 sm:$0xff]  }
  0x62   :  { %6358 = vmatmul.mubr.msk.f32.vlgmr.msra.gmra.mxu1 %vm97_vm1, %v1182_v11  ;;  %6382 = vmatpush3.msk.msra.mxu0 %vm146_vm0, %v7035_v44  ;;  %v1413_v44 = vld [vmem:[%s8915_s0 + $0x1e] sm:$0xff]  ;;  %v6481_v11 = vld [vmem:[#allocation4 + $0x170] ss:$8 sps:$4 sm:$0xff]  }
  0x63   :  { %6334 = vmatprep.mubr.msk.f32.mxu0 %vm97_vm1, %v953_v12  ;;  %6408 = vmatpush3.msk.msra.mxu1 %vm146_vm0, %v7040_v45  ;;  %v1643_v45 = vld [vmem:[%s8915_s0 + $0x1f] sm:$0xff]  ;;  %vm4192_vm0 = vcmask 1047559  }
  0x64   :  { %6360 = vmatprep.mubr.msk.f32.mxu1 %vm97_vm1, %v1183_v13  ;;  %3366 = vmatprep.subr.bf16.mxu0 %v6480_v8  ;;  %v6486_v12 = vld [vmem:[#allocation4 + $0x64] ss:$8 sps:$4 sm:$0xff]  }
  0x65   :  { %6335 = vmatmul.mubr.msk.f32.gmra.mxu0 %vm97_vm1, %v954_v14  ;;  %3479 = vmatprep.subr.bf16.mxu1 %v6483_v9  ;;  %v6489_v13 = vld [vmem:[#allocation4 + $0x164] ss:$8 sps:$4 sm:$0xff]   ;;  %v6484_v14 = vld [vmem:[#allocation4 + $0x60] ss:$8 sps:$4 sm:$0xff]  }
  0x66   :  { %6361 = vmatmul.mubr.msk.f32.gmra.mxu1 %vm97_vm1, %v1184_v15  ;;  %6337 = vmatprep.mubr.msk.f32.mxu0 %vm97_vm1, %v955_v16  ;;  %v6487_v15 = vld [vmem:[#allocation4 + $0x160] ss:$8 sps:$4 sm:$0xff]   ;;  %v6492_v16 = vld [vmem:[#allocation4 + $0x54] ss:$8 sps:$4 sm:$0xff]  }
  0x67   :  { %6363 = vmatprep.mubr.msk.f32.mxu1 %vm97_vm1, %v1185_v17  ;;  %v6495_v17 = vld [vmem:[#allocation4 + $0x154] ss:$8 sps:$4 sm:$0xff]  }
  0x69   :  { %6338 = vmatmul.mubr.msk.f32.gmra.mxu0 %vm97_vm1, %v956_v18  ;;  %v6490_v18 = vld [vmem:[#allocation4 + $0x50] ss:$8 sps:$4 sm:$0xff]  }
  0x6a   :  { %6364 = vmatmul.mubr.msk.f32.gmra.mxu1 %vm97_vm1, %v1186_v19  ;;  %6340 = vmatprep.mubr.msk.f32.mxu0 %vm97_vm1, %v957_v20  ;;  %v6493_v19 = vld [vmem:[#allocation4 + $0x150] ss:$8 sps:$4 sm:$0xff]   ;;  %v6498_v20 = vld [vmem:[#allocation4 + $0x44] ss:$8 sps:$4 sm:$0xff]  }
  0x6b   :  { %6366 = vmatprep.mubr.msk.f32.mxu1 %vm97_vm1, %v1187_v21  ;;  %v6501_v21 = vld [vmem:[#allocation4 + $0x144] ss:$8 sps:$4 sm:$0xff]  }
  0x6d   :  { %6341 = vmatmul.mubr.msk.f32.gmra.mxu0 %vm97_vm1, %v958_v22  ;;  %v6496_v22 = vld [vmem:[#allocation4 + $0x40] ss:$8 sps:$4 sm:$0xff]  }
  0x6e   :  { %6367 = vmatmul.mubr.msk.f32.gmra.mxu1 %vm97_vm1, %v1188_v23  ;;  %6343 = vmatprep.mubr.msk.f32.mxu0 %vm97_vm1, %v959_v24  ;;  %v6499_v23 = vld [vmem:[#allocation4 + $0x140] ss:$8 sps:$4 sm:$0xff]   ;;  %v6504_v24 = vld [vmem:[#allocation4 + $0x34] ss:$8 sps:$4 sm:$0xff]  }
  0x6f   :  { %6369 = vmatprep.mubr.msk.f32.mxu1 %vm97_vm1, %v1189_v25  ;;  %v6507_v25 = vld [vmem:[#allocation4 + $0x134] ss:$8 sps:$4 sm:$0xff]  }
  0x71   :  { %6344 = vmatmul.mubr.msk.f32.gmra.mxu0 %vm97_vm1, %v960_v26  ;;  %v6502_v26 = vld [vmem:[#allocation4 + $0x30] ss:$8 sps:$4 sm:$0xff]  }
  0x72   :  { %6370 = vmatmul.mubr.msk.f32.gmra.mxu1 %vm97_vm1, %v1190_v27  ;;  %6346 = vmatprep.mubr.msk.f32.mxu0 %vm97_vm1, %v961_v28  ;;  %v6505_v27 = vld [vmem:[#allocation4 + $0x130] ss:$8 sps:$4 sm:$0xff]   ;;  %v6510_v28 = vld [vmem:[#allocation4 + $0x24] ss:$8 sps:$4 sm:$0xff]  }
  0x73   :  { %6372 = vmatprep.mubr.msk.f32.mxu1 %vm97_vm1, %v1191_v29  ;;  %v6513_v29 = vld [vmem:[#allocation4 + $0x124] ss:$8 sps:$4 sm:$0xff]  }
  0x75   :  { %6347 = vmatmul.mubr.msk.f32.gmra.mxu0 %vm97_vm1, %v962_v30  ;;  %v6508_v30 = vld [vmem:[#allocation4 + $0x20] ss:$8 sps:$4 sm:$0xff]  }
  0x76   :  { %6373 = vmatmul.mubr.msk.f32.gmra.mxu1 %vm97_vm1, %v1192_v31  ;;  %6349 = vmatprep.mubr.msk.f32.mxu0 %vm97_vm1, %v963_v32  ;;  %v6511_v31 = vld [vmem:[#allocation4 + $0x120] ss:$8 sps:$4 sm:$0xff]   ;;  %v6516_v32 = vld [vmem:[#allocation4 + $0x14] ss:$8 sps:$4 sm:$0xff]  }
  0x77   :  { %6375 = vmatprep.mubr.msk.f32.mxu1 %vm97_vm1, %v1193_v33  ;;  %v6519_v33 = vld [vmem:[#allocation4 + $0x114] ss:$8 sps:$4 sm:$0xff]  }
  0x79   :  { %6350 = vmatmul.mubr.msk.f32.gmra.mxu0 %vm97_vm1, %v964_v34  ;;  %v6514_v34 = vld [vmem:[#allocation4 + $0x10] ss:$8 sps:$4 sm:$0xff]  }
  0x7a   :  { %6376 = vmatmul.mubr.msk.f32.gmra.mxu1 %vm97_vm1, %v1194_v35  ;;  %6352 = vmatprep.mubr.msk.f32.mxu0 %vm97_vm1, %v965_v36  ;;  %v6517_v35 = vld [vmem:[#allocation4 + $0x110] ss:$8 sps:$4 sm:$0xff]   ;;  %v6522_v36 = vld [vmem:[#allocation4 + $0x4] ss:$8 sps:$4 sm:$0xff]  }
  0x7b   :  { %6378 = vmatprep.mubr.msk.f32.mxu1 %vm97_vm1, %v1195_v37  ;;  %v6525_v37 = vld [vmem:[#allocation4 + $0x104] ss:$8 sps:$4 sm:$0xff]  }
  0x7d   :  { %6353 = vmatmul.mubr.msk.f32.gmra.mxu0 %vm97_vm1, %v966_v38  ;;  %v6520_v38 = vld [vmem:[#allocation4] ss:$8 sps:$4 sm:$0xff]  }
  0x7e   :  { %6379 = vmatmul.mubr.msk.f32.gmra.mxu1 %vm97_vm1, %v1196_v39  ;;  %6383 = vmatprep.mubr.msk.f32.mxu0 %vm97_vm1, %v1411_v40  ;;  %v6523_v39 = vld [vmem:[#allocation4 + $0x100] ss:$8 sps:$4 sm:$0xff]   ;;  %v6528_v40 = vld [vmem:[#allocation4 + $0xf4] ss:$8 sps:$4 sm:$0xff]  }
  0x7f   :  { %6409 = vmatprep.mubr.msk.f32.mxu1 %vm97_vm1, %v1641_v41  ;;  %v6531_v41 = vld [vmem:[#allocation4 + $0x1f4] ss:$8 sps:$4 sm:$0xff]  }
  0x81   :  { %6384 = vmatmul.mubr.msk.f32.vlgmr.msra.gmra.mxu0 %vm97_vm1, %v1412_v42  ;;  %v6526_v42 = vld [vmem:[#allocation4 + $0xf0] ss:$8 sps:$4 sm:$0xff]  }
  0x82   :  { %6410 = vmatmul.mubr.msk.f32.vlgmr.msra.gmra.mxu1 %vm97_vm1, %v1642_v43  ;;  %6386 = vmatprep.mubr.msk.f32.mxu0 %vm97_vm1, %v1413_v44  ;;  %v6529_v43 = vld [vmem:[#allocation4 + $0x1f0] ss:$8 sps:$4 sm:$0xff]   ;;  %v6534_v44 = vld [vmem:[#allocation4 + $0xe4] ss:$8 sps:$4 sm:$0xff]  }
  0x83   :  { %6412 = vmatprep.mubr.msk.f32.mxu1 %vm97_vm1, %v1643_v45  ;;  %3367 = vmatpush1.bf16.msra.mxu0 %v6478_v10  ;;  %v6537_v45 = vld [vmem:[#allocation4 + $0x1e4] ss:$8 sps:$4 sm:$0xff]  }
  0x84   :  { %3480 = vmatpush1.bf16.msra.mxu1 %v6481_v11  ;;  %3368 = vmatprep.subr.bf16.mxu0 %v6486_v12 }
  0x85   :  { %6387 = vmatmul.mubr.msk.f32.gmra.mxu0 %vm97_vm1, %v1414_v46  ;;  %3481 = vmatprep.subr.bf16.mxu1 %v6489_v13  ;;  %v6532_v46 = vld [vmem:[#allocation4 + $0xe0] ss:$8 sps:$4 sm:$0xff]   ;;  %v6546_v13 = vld [vmem:[#allocation4 + $0xc4] ss:$8 sps:$4 sm:$0xff]  }
  0x86   :  { %6413 = vmatmul.mubr.msk.f32.gmra.mxu1 %vm97_vm1, %v1644_v47  ;;  %6389 = vmatprep.mubr.msk.f32.mxu0 %vm97_vm1, %v1415_v48  ;;  %v6535_v47 = vld [vmem:[#allocation4 + $0x1e0] ss:$8 sps:$4 sm:$0xff]  }
  0x87   :  { %6415 = vmatprep.mubr.msk.f32.mxu1 %vm97_vm1, %v1645_v49  ;;  %3369 = vmatpush1.bf16.msra.mxu0 %v6484_v14  ;;  %v6549_v14 = vld [vmem:[#allocation4 + $0x1c4] ss:$8 sps:$4 sm:$0xff]  }
  0x88   :  { %3482 = vmatpush1.bf16.msra.mxu1 %v6487_v15  ;;  %3370 = vmatprep.subr.bf16.mxu0 %v6492_v16 }
  0x89   :  { %6390 = vmatmul.mubr.msk.f32.gmra.mxu0 %vm97_vm1, %v1416_v50  ;;  %3483 = vmatprep.subr.bf16.mxu1 %v6495_v17  ;;  %v6544_v17 = vld [vmem:[#allocation4 + $0xc0] ss:$8 sps:$4 sm:$0xff]  }
  0x8a   :  { %6416 = vmatmul.mubr.msk.f32.gmra.mxu1 %vm97_vm1, %v1646_v51  ;;  %6392 = vmatprep.mubr.msk.f32.mxu0 %vm97_vm1, %v1417_v52 }
  0x8b   :  { %6418 = vmatprep.mubr.msk.f32.mxu1 %vm97_vm1, %v1647_v53  ;;  %3371 = vmatpush1.bf16.msra.mxu0 %v6490_v18  ;;  %v6547_v18 = vld [vmem:[#allocation4 + $0x1c0] ss:$8 sps:$4 sm:$0xff]  }
  0x8c   :  { %3484 = vmatpush1.bf16.msra.mxu1 %v6493_v19  ;;  %3372 = vmatprep.subr.bf16.mxu0 %v6498_v20 }
  0x8d   :  { %6393 = vmatmul.mubr.msk.f32.gmra.mxu0 %vm97_vm1, %v1418_v54  ;;  %3485 = vmatprep.subr.bf16.mxu1 %v6501_v21 }
  0x8e   :  { %6419 = vmatmul.mubr.msk.f32.gmra.mxu1 %vm97_vm1, %v1648_v55  ;;  %6395 = vmatprep.mubr.msk.f32.mxu0 %vm97_vm1, %v1419_v56 }
  0x8f   :  { %6421 = vmatprep.mubr.msk.f32.mxu1 %vm97_vm1, %v1649_v57  ;;  %3373 = vmatpush1.bf16.msra.mxu0 %v6496_v22 }
  0x90   :  { %3486 = vmatpush1.bf16.msra.mxu1 %v6499_v23  ;;  %3374 = vmatprep.subr.bf16.mxu0 %v6504_v24 }
  0x91   :  { %6396 = vmatmul.mubr.msk.f32.gmra.mxu0 %vm97_vm1, %v1420_v58  ;;  %3487 = vmatprep.subr.bf16.mxu1 %v6507_v25 }
  0x92   :  { %6422 = vmatmul.mubr.msk.f32.gmra.mxu1 %vm97_vm1, %v1650_v59  ;;  %6398 = vmatprep.mubr.msk.f32.mxu0 %vm97_vm1, %v1421_v60  ;;  %v6540_v59 = vld [vmem:[#allocation4 + $0xd4] ss:$8 sps:$4 sm:$0xff]  }
  0x93   :  { %6424 = vmatprep.mubr.msk.f32.mxu1 %vm97_vm1, %v1651_v61  ;;  %3375 = vmatpush1.bf16.msra.mxu0 %v6502_v26  ;;  %v6543_v60 = vld [vmem:[#allocation4 + $0x1d4] ss:$8 sps:$4 sm:$0xff]  }
  0x94   :  { %3488 = vmatpush1.bf16.msra.mxu1 %v6505_v27  ;;  %3376 = vmatprep.subr.bf16.mxu0 %v6510_v28 }
  0x95   :  { %6399 = vmatmul.mubr.msk.f32.gmra.mxu0 %vm97_vm1, %v1422_v62  ;;  %3489 = vmatprep.subr.bf16.mxu1 %v6513_v29 }
  0x96   :  { %6425 = vmatmul.mubr.msk.f32.gmra.mxu1 %vm97_vm1, %v1652_v63  ;;  %6401 = vmatprep.mubr.msk.f32.mxu0 %vm97_vm1, %v1423_v0  ;;  %v6538_v63 = vld [vmem:[#allocation4 + $0xd0] ss:$8 sps:$4 sm:$0xff]  }
  0x97   :  { %6427 = vmatprep.mubr.msk.f32.mxu1 %vm97_vm1, %v1653_v1  ;;  %3377 = vmatpush1.bf16.msra.mxu0 %v6508_v30  ;;  %v6541_v0 = vld [vmem:[#allocation4 + $0x1d0] ss:$8 sps:$4 sm:$0xff]   ;;  %v6552_v30 = vld [vmem:[#allocation4 + $0xb4] ss:$8 sps:$4 sm:$0xff]  }
  0x98   :  { %3490 = vmatpush1.bf16.msra.mxu1 %v6511_v31  ;;  %3378 = vmatprep.subr.bf16.mxu0 %v6516_v32  ;;  %v6555_v31 = vld [vmem:[#allocation4 + $0x1b4] ss:$8 sps:$4 sm:$0xff]  }
  0x99   :  { %6402 = vmatmul.mubr.msk.f32.gmra.mxu0 %vm97_vm1, %v1424_v2  ;;  %3491 = vmatprep.subr.bf16.mxu1 %v6519_v33  ;;  %v6550_v33 = vld [vmem:[#allocation4 + $0xb0] ss:$8 sps:$4 sm:$0xff]  }
  0x9a   :  { %6428 = vmatmul.mubr.msk.f32.gmra.mxu1 %vm97_vm1, %v1654_v3  ;;  %6404 = vmatprep.mubr.msk.f32.mxu0 %vm97_vm1, %v1425_v4 }
  0x9b   :  { %6430 = vmatprep.mubr.msk.f32.mxu1 %vm97_vm1, %v1655_v5  ;;  %3379 = vmatpush1.bf16.msra.mxu0 %v6514_v34  ;;  %v6553_v34 = vld [vmem:[#allocation4 + $0x1b0] ss:$8 sps:$4 sm:$0xff]  }
  0x9c   :  { %3492 = vmatpush1.bf16.msra.mxu1 %v6517_v35  ;;  %3380 = vmatprep.subr.bf16.mxu0 %v6522_v36 }
  0x9d   :  { %6405 = vmatmul.mubr.msk.f32.gmra.mxu0 %vm97_vm1, %v1426_v6  ;;  %3493 = vmatprep.subr.bf16.mxu1 %v6525_v37 }
  0x9e   :  { %6431 = vmatmul.mubr.msk.f32.gmra.mxu1 %vm97_vm1, %v1656_v7  ;;  %vm7653_vm1 = vmor %vm1958_vm2, %vm1959_vm7 }
  0x9f   :  { %3381 = vmatpush1.bf16.msra.mxu0 %v6520_v38  ;;  %vm7665_vm2 = vmor %vm2519_vm9, %vm2520_vm10  ;;  %vm3977_vm9 = vcmask 1047556   ;;  %vm3978_vm10 = vsmask.f32 7954 }
  0xa0   :  { %3494 = vmatpush1.bf16.msra.mxu1 %v6523_v39  ;;  %3382 = vmatprep.subr.bf16.mxu0 %v6528_v40 }
  0xa1   :  { %3495 = vmatprep.subr.bf16.mxu1 %v6531_v41 }
  0xa3   :  { %3383 = vmatpush2.bf16.msra.mxu0 %v6526_v42 }
  0xa4   :  { %3496 = vmatpush2.bf16.msra.mxu1 %v6529_v43  ;;  %3384 = vmatprep.subr.bf16.mxu0 %v6534_v44 }
  0xa5   :  { %3497 = vmatprep.subr.bf16.mxu1 %v6537_v45 }
  0xa7   :  { %3385 = vmatpush2.bf16.msra.mxu0 %v6532_v46 }
  0xa8   :  { %3498 = vmatpush2.bf16.msra.mxu1 %v6535_v47  ;;  %3386 = vmatprep.subr.bf16.mxu0 %v6540_v59 }
  0xa9   :  { %3499 = vmatprep.subr.bf16.mxu1 %v6543_v60 }
  0xab   :  { %3387 = vmatpush2.bf16.msra.mxu0 %v6538_v63 }
  0xac   :  { %3500 = vmatpush2.bf16.msra.mxu1 %v6541_v0  ;;  %3388 = vmatprep.subr.bf16.mxu0 %v6546_v13 }
  0xad   :  { %3501 = vmatprep.subr.bf16.mxu1 %v6549_v14 }
  0xaf   :  { %3389 = vmatpush2.bf16.msra.mxu0 %v6544_v17 }
  0xb0   :  { %3502 = vmatpush2.bf16.msra.mxu1 %v6547_v18  ;;  %3390 = vmatprep.subr.bf16.mxu0 %v6552_v30  ;;  %v6565_v30 = vld [vmem:[#allocation4 + $0x190] ss:$8 sps:$4 sm:$0xff]  }
  0xb1   :  { %3503 = vmatprep.subr.bf16.mxu1 %v6555_v31 }
  0xb3   :  { %3391 = vmatpush2.bf16.msra.mxu0 %v6550_v33 }
  0xb4   :  { %3504 = vmatpush2.bf16.msra.mxu1 %v6553_v34 }
  0xe1   :  { %v6229_v48 = vpop.f32.mrf.mxu0 }
  0xe2   :  { %v6255_v49 = vpop.f32.mrf.mxu1 }
  0xe3   :  { %v7414_v50 = vadd.f32 %v6255_v49, %v6229_v48  ;;  %v216_v51 = vpop.f32.mrf.mxu0  ;;  %v8925_v48 = vmov 0  }
  0xe4   :  { %v412_v52 = vpop.f32.mrf.mxu1  ;;  %2049 = vst [vmem:[#allocation2 + $0x28] sm:$0x1] %v8925_v48  ;;  %2050 = vst [vmem:[#allocation2 + $0xa0] sm:$0x1] %v8925_v48 }
  0xe5   :  { %v7416_v53 = vadd.f32 %v412_v52, %v216_v51  ;;  %v6232_v54 = vpop.f32.mrf.mxu0  ;;  %2051 = vst [vmem:[#allocation2 + $0x118] sm:$0x1] %v8925_v48  ;;  %2052 = vst [vmem:[#allocation2 + $0x190] sm:$0x1] %v8925_v48 }
  0xe6   :  { %v6258_v55 = vpop.f32.mrf.mxu1  ;;  %2053 = vst [vmem:[#allocation2 + $0x208] sm:$0x1] %v8925_v48  ;;  %2054 = vst [vmem:[#allocation2 + $0x280] sm:$0x1] %v8925_v48 }
  0xe7   :  { %v7418_v56 = vadd.f32 %v6258_v55, %v6232_v54  ;;  %v7420_v57 = vpop.f32.mrf.mxu0  ;;  %2055 = vst [vmem:[#allocation2 + $0x2f8] sm:$0x1] %v8925_v48  ;;  %2056 = vst [vmem:[#allocation2 + $0x370] sm:$0x1] %v8925_v48 }
  0xe8   :  { %v7422_v58 = vpop.f32.mrf.mxu1  ;;  %2610 = vst [vmem:[#allocation2 + $0x4c] sm:$0x8] %v8925_v48  ;;  %2611 = vst [vmem:[#allocation2 + $0xc4] sm:$0x8] %v8925_v48 }
  0xe9   :  { %v6235_v61 = vpop.f32.mrf.mxu0  ;;  %2612 = vst [vmem:[#allocation2 + $0x13c] sm:$0x8] %v8925_v48  ;;  %2613 = vst [vmem:[#allocation2 + $0x1b4] sm:$0x8] %v8925_v48 }
  0xea   :  { %v6261_v62 = vpop.f32.mrf.mxu1  ;;  %2614 = vst [vmem:[#allocation2 + $0x22c] sm:$0x8] %v8925_v48  ;;  %2615 = vst [vmem:[#allocation2 + $0x2a4] sm:$0x8] %v8925_v48 }
  0xeb   :  { %v7424_v1 = vadd.f32 %v6261_v62, %v6235_v61  ;;  %v236_v2 = vpop.f32.mrf.mxu0  ;;  %2616 = vst [vmem:[#allocation2 + $0x31c] sm:$0x8] %v8925_v48  ;;  %2617 = vst [vmem:[#allocation2 + $0x394] sm:$0x8] %v8925_v48  ;;  %v6558_v61 = vld [vmem:[#allocation4 + $0xa4] ss:$8 sps:$4 sm:$0xff]  }
  0xec   :  { %v432_v3 = vpop.f32.mrf.mxu1  ;;  %v6561_v62 = vld [vmem:[#allocation4 + $0x1a4] ss:$8 sps:$4 sm:$0xff]   ;;  %3392 = vmatprep.subr.bf16.mxu0 %v6558_v61 }
  0xed   :  { %v7426_v4 = vadd.f32 %v432_v3, %v236_v2  ;;  %v6238_v5 = vpop.f32.mrf.mxu0  ;;  %v6556_v2 = vld [vmem:[#allocation4 + $0xa0] ss:$8 sps:$4 sm:$0xff]   ;;  %3505 = vmatprep.subr.bf16.mxu1 %v6561_v62 }
  0xee   :  { %v6264_v6 = vpop.f32.mrf.mxu1  ;;  %v6559_v3 = vld [vmem:[#allocation4 + $0x1a0] ss:$8 sps:$4 sm:$0xff]   ;;  %3393 = vmatpush2.bf16.msra.mxu0 %v6556_v2 }
  0xef   :  { %v7428_v7 = vadd.f32 %v6264_v6, %v6238_v5  ;;  %v7430_v8 = vpop.f32.mrf.mxu0  ;;  %3506 = vmatpush2.bf16.msra.mxu1 %v6559_v3 }
  0xf0   :  { %v7432_v9 = vpop.f32.mrf.mxu1 }
  0xf1   :  { %v6241_v10 = vpop.f32.mrf.mxu0 }
  0xf2   :  { %v6267_v11 = vpop.f32.mrf.mxu1 }
  0xf3   :  { %v7434_v12 = vadd.f32 %v6267_v11, %v6241_v10  ;;  %v256_v15 = vpop.f32.mrf.mxu0 }
  0xf4   :  { %v452_v16 = vpop.f32.mrf.mxu1 }
  0xf5   :  { %v7436_v19 = vadd.f32 %v452_v16, %v256_v15  ;;  %v6244_v20 = vpop.f32.mrf.mxu0 }
  0xf6   :  { %v6270_v21 = vpop.f32.mrf.mxu1 }
  0xf7   :  { %v7438_v22 = vadd.f32 %v6270_v21, %v6244_v20  ;;  %v7440_v23 = vpop.f32.mrf.mxu0  ;;  %v6564_v21 = vld [vmem:[#allocation4 + $0x94] ss:$8 sps:$4 sm:$0xff]  }
  0xf8   :  { %v7442_v24 = vpop.f32.mrf.mxu1  ;;  %3394 = vmatprep.subr.bf16.mxu0 %v6564_v21 }
  0xf9   :  { %v6247_v25 = vpop.f32.mrf.mxu0 }
  0xfa   :  { %v6273_v26 = vpop.f32.mrf.mxu1 }
  0xfb   :  { %v7444_v27 = vadd.f32 %v6273_v26, %v6247_v25  ;;  %v276_v28 = vpop.f32.mrf.mxu0  ;;  %v6567_v25 = vld [vmem:[#allocation4 + $0x194] ss:$8 sps:$4 sm:$0xff]  }
  0xfc   :  { %v472_v29 = vpop.f32.mrf.mxu1  ;;  %3507 = vmatprep.subr.bf16.mxu1 %v6567_v25 }
  0xfd   :  { %v7446_v32 = vadd.f32 %v472_v29, %v276_v28  ;;  %v6250_v35 = vpop.f32.mrf.mxu0  ;;  %v6562_v29 = vld [vmem:[#allocation4 + $0x90] ss:$8 sps:$4 sm:$0xff]   ;;  %3508 = vmatpush2.bf16.msra.mxu1 %v6565_v30 }
  0xfe   :  { %v6276_v36 = vpop.f32.mrf.mxu1  ;;  %3395 = vmatpush2.bf16.msra.mxu0 %v6562_v29 }
  0xff   :  { %v7448_v37 = vadd.f32 %v6276_v36, %v6250_v35  ;;  %v7450_v38 = vpop.f32.mrf.mxu0  ;;  %v6570_v35 = vld [vmem:[#allocation4 + $0x84] ss:$8 sps:$4 sm:$0xff]  }
 0x100   :  { %v7452_v39 = vpop.f32.mrf.mxu1  ;;  %v6573_v36 = vld [vmem:[#allocation4 + $0x184] ss:$8 sps:$4 sm:$0xff]   ;;  %3396 = vmatprep.subr.bf16.mxu0 %v6570_v35 }
 0x101   :  { %v7454_v40 = vpop.f32.mrf.mxu0  ;;  %3509 = vmatprep.subr.bf16.mxu1 %v6573_v36 }
 0x102   :  { %v7456_v41 = vpop.f32.mrf.mxu1 }
 0x103   :  { %v7458_v42 = vpop.f32.mrf.mxu0 }
 0x104   :  { %v7460_v43 = vpop.f32.mrf.mxu1 }
 0x105   :  { %v7462_v44 = vpop.f32.mrf.mxu0 }
 0x106   :  { %v7464_v45 = vpop.f32.mrf.mxu1 }
 0x107   :  { %v7466_v46 = vpop.f32.mrf.mxu0 }
 0x108   :  { %v7468_v47 = vpop.f32.mrf.mxu1 }
 0x109   :  { %v6287_v49 = vpop.f32.mrf.mxu0 }
 0x10a   :  { %v6313_v51 = vpop.f32.mrf.mxu1  ;;  %v710_v52 = vadd.f32 %v6287_v49, %v7424_v1 }
 0x10b   :  { %v646_v54 = vpop.f32.mrf.mxu0 }
 0x10c   :  { %v876_v55 = vpop.f32.mrf.mxu1  ;;  %v7487_v59 = vadd.f32 %v6313_v51, %v710_v52  ;;  %v709_v60 = vadd.f32 %v646_v54, %v7426_v4  ;;  %v6568_v51 = vld [vmem:[#allocation4 + $0x80] ss:$8 sps:$4 sm:$0xff]  }
 0x10d   :  { %v6290_v63 = vpop.f32.mrf.mxu0  ;;  %3397 = vmatpush2.bf16.msra.mxu0 %v6568_v51 }
 0x10e   :  { %v6316_v0 = vpop.f32.mrf.mxu1  ;;  %v7490_v5 = vadd.f32 %v876_v55, %v709_v60  ;;  %v712_v6 = vadd.f32 %v6290_v63, %v7428_v7 }
 0x10f   :  { %v7493_v10 = vpop.f32.mrf.mxu0 }
 0x110   :  { %v7495_v1 = vpop.f32.mrf.mxu1  ;;  %v7497_v11 = vadd.f32 %v6316_v0, %v712_v6 }
 0x111   :  { %v6293_v4 = vpop.f32.mrf.mxu0 }
 0x112   :  { %v6319_v13 = vpop.f32.mrf.mxu1  ;;  %v714_v14 = vadd.f32 %v6293_v4, %v7434_v12 }
 0x113   :  { %v666_v15 = vpop.f32.mrf.mxu0 }
 0x114   :  { %v896_v16 = vpop.f32.mrf.mxu1  ;;  %v7500_v17 = vadd.f32 %v6319_v13, %v714_v14  ;;  %v713_v7 = vadd.f32 %v666_v15, %v7436_v19 }
 0x115   :  { %v6296_v18 = vpop.f32.mrf.mxu0 }
 0x116   :  { %v6322_v20 = vpop.f32.mrf.mxu1  ;;  %v7503_v26 = vadd.f32 %v896_v16, %v713_v7  ;;  %v716_v28 = vadd.f32 %v6296_v18, %v7438_v22  ;;  %v6571_v22 = vld [vmem:[#allocation4 + $0x180] ss:$8 sps:$4 sm:$0xff]  }
 0x117   :  { %v7506_v31 = vpop.f32.mrf.mxu0  ;;  %3510 = vmatpush2.bf16.msra.mxu1 %v6571_v22 }
 0x118   :  { %v7508_v33 = vpop.f32.mrf.mxu1  ;;  %v7510_v12 = vadd.f32 %v6322_v20, %v716_v28 }
 0x119   :  { %v6299_v19 = vpop.f32.mrf.mxu0 }
 0x11a   :  { %v6325_v34 = vpop.f32.mrf.mxu1  ;;  %v718_v49 = vadd.f32 %v6299_v19, %v7444_v27  ;;  %v6582_v19 = vld [vmem:[#allocation4 + $0x274] ss:$8 sps:$4 sm:$0xff]  }
 0x11b   :  { %v686_v52 = vpop.f32.mrf.mxu0  ;;  %3592 = vmatprep.subr.bf16.mxu0 %v6582_v19 }
 0x11c   :  { %v916_v54 = vpop.f32.mrf.mxu1  ;;  %v948_v55 = vadd.f32 %v6325_v34, %v718_v49  ;;  %v717_v60 = vadd.f32 %v686_v52, %v7446_v32  ;;  %v706_v52 = vadd.f32 %v7454_v40, %v7414_v50 }
 0x11d   :  { %v6302_v61 = vpop.f32.mrf.mxu0 }
 0x11e   :  { %v6328_v62 = vpop.f32.mrf.mxu1  ;;  %v947_v63 = vadd.f32 %v916_v54, %v717_v60  ;;  %v720_v0 = vadd.f32 %v6302_v61, %v7448_v37  ;;  %v423_v54 = vadd.f32 %v7422_v58, %v7420_v57  ;;  %v443_v57 = vadd.f32 %v7432_v9, %v7430_v8 }
 0x11f   :  { %v696_v2 = vpop.f32.mrf.mxu0 }
 0x120   :  { %v7515_v3 = vpop.f32.mrf.mxu1  ;;  %v950_v27 = vadd.f32 %v6328_v62, %v720_v0  ;;  %v705_v62 = vadd.f32 %v7458_v42, %v7416_v53  ;;  %v708_v0 = vadd.f32 %v7462_v44, %v7418_v56  ;;  %v707_v19 = vadd.f32 %v7466_v46, %v423_v54 }
 0x121   :  { %v6333_v6 = vpop.f32.mrf.mxu0  ;;  %v463_v56 = vadd.f32 %v7442_v24, %v7440_v23  ;;  %v483_v42 = vadd.f32 %v7452_v39, %v7450_v38  ;;  %v711_v9 = vadd.f32 %v7493_v10, %v443_v57 }
 0x122   :  { %v6359_v4 = vpop.f32.mrf.mxu1  ;;  %v937_v44 = vadd.f32 %v7468_v47, %v707_v19 }
 0x123   :  { %v1086_v13 = vpop.f32.mrf.mxu0  ;;  %v941_v10 = vadd.f32 %v7495_v1, %v711_v9 }
 0x124   :  { %v1316_v14 = vpop.f32.mrf.mxu1 }
 0x125   :  { %v6336_v15 = vpop.f32.mrf.mxu0 }
 0x126   :  { %v7517_v16 = vpop.f32.mrf.mxu1 }
 0x127   :  { %v1096_v7 = vpop.f32.mrf.mxu0 }
 0x128   :  { %v7519_v32 = vpop.f32.mrf.mxu1  ;;  %v1167_v38 = vadd.f32 %v1096_v7, %v937_v44 }
 0x129   :  { %v7521_v18 = vpop.f32.mrf.mxu0 }
 0x12a   :  { %v7523_v20 = vpop.f32.mrf.mxu1 }
 0x12b   :  { %v1106_v21 = vpop.f32.mrf.mxu0 }
 0x12c   :  { %v7525_v37 = vpop.f32.mrf.mxu1 }
 0x12d   :  { %v7527_v25 = vpop.f32.mrf.mxu0 }
 0x12e   :  { %v7529_v28 = vpop.f32.mrf.mxu1 }
 0x12f   :  { %v7531_v29 = vpop.f32.mrf.mxu0 }
 0x130   :  { %v7533_v30 = vpop.f32.mrf.mxu1 }
 0x131   :  { %8942 = vst [vmem:[#allocation13_spill] sm:$0xff] %v7533_v30  ;;  %v7535_v34 = vpop.f32.mrf.mxu0 }
 0x132   :  { %v7537_v35 = vpop.f32.mrf.mxu1 }
 0x133   :  { %8943 = vst [vmem:[#allocation14_spill] sm:$0xff] %v7537_v35  ;;  %v7539_v36 = vpop.f32.mrf.mxu0 }
 0x134   :  { %v7541_v49 = vpop.f32.mrf.mxu1 }
 0x135   :  { %8944 = vst [vmem:[#allocation15_spill] sm:$0xff] %v7541_v49  ;;  %v7543_v51 = vpop.f32.mrf.mxu0  ;;  %v936_v49 = vadd.f32 %v7456_v41, %v706_v52  ;;  %v938_v41 = vadd.f32 %v7464_v45, %v708_v0 }
 0x136   :  { %v7545_v22 = vpop.f32.mrf.mxu1 }
 0x137   :  { %8945 = vst [vmem:[#allocation16_spill] sm:$0xff] %v7545_v22  ;;  %v7551_v60 = vpop.f32.mrf.mxu0  ;;  %v1166_v35 = vadd.f32 %v6333_v6, %v936_v49  ;;  %v719_v6 = vadd.f32 %v696_v2, %v483_v42 }
 0x138   :  { %v7553_v61 = vpop.f32.mrf.mxu1  ;;  %v8947_v57 = vld [vmem:[#allocation13_spill] sm:$0xff] }
 0x139   :  { %8946 = vst [vmem:[#allocation17_spill] sm:$0xff] %v7553_v61  ;;  %v6351_v48 = vpop.f32.mrf.mxu0  ;;  %v935_v61 = vadd.f32 %v7460_v43, %v705_v62  ;;  %v1396_v24 = vadd.f32 %v6359_v4, %v1166_v35  ;;  %v949_v2 = vadd.f32 %v7515_v3, %v719_v6  ;;  %v1169_v4 = vadd.f32 %v1106_v21, %v7490_v5 }
 0x13a   :  { %v6377_v22 = vpop.f32.mrf.mxu1  ;;  %v1178_v50 = vadd.f32 %v6351_v48, %v948_v55  ;;  %v1397_v35 = vadd.f32 %v7519_v32, %v1167_v38  ;;  %v1171_v5 = vadd.f32 %v7531_v29, %v941_v10  ;;  %v1174_v3 = vadd.f32 %v7535_v34, %v7500_v17 }
 0x13b   :  { %v1146_v58 = vpop.f32.mrf.mxu0  ;;  %v1165_v48 = vadd.f32 %v1086_v13, %v935_v61  ;;  %v1399_v29 = vadd.f32 %v7525_v37, %v1169_v4  ;;  %v2228_v4 = vld [vmem:[#allocation2 + $0x54] sm:$0x1] }
 0x13c   :  { %v1376_v40 = vpop.f32.mrf.mxu1  ;;  %v7564_v30 = vadd.f32 %v6377_v22, %v1178_v50  ;;  %v1177_v53 = vadd.f32 %v1146_v58, %v947_v63  ;;  %v715_v63 = vadd.f32 %v7506_v31, %v463_v56  ;;  %v1168_v22 = vadd.f32 %v6336_v15, %v938_v41  ;;  %v7587_v15 = vld [vmem:[%s8917_s2] ss:$0 sm:$0xff]  ;;  %v8949_v37 = vld [vmem:[#allocation15_spill] sm:$0xff] }
 0x13d   :  { %v6354_v46 = vpop.f32.mrf.mxu0  ;;  %v1395_v13 = vadd.f32 %v1316_v14, %v1165_v48  ;;  %v7609_v58 = vadd.f32 %v8947_v57, %v1171_v5 }
 0x13e   :  { %v6380_v8 = vpop.f32.mrf.mxu1  ;;  %v7573_v43 = vadd.f32 %v1376_v40, %v1177_v53  ;;  %v1180_v55 = vadd.f32 %v6354_v46, %v950_v27  ;;  %v945_v31 = vadd.f32 %v7508_v33, %v715_v63  ;;  %v1170_v27 = vadd.f32 %v7521_v18, %v7487_v59  ;;  %v8950_v56 = vld [vmem:[#allocation16_spill] sm:$0xff] }
 0x13f   :  { %v1156_v49 = vpop.f32.mrf.mxu0  ;;  %v1398_v7 = vadd.f32 %v7517_v16, %v1168_v22  ;;  %v1172_v59 = vadd.f32 %v7527_v25, %v7497_v11  ;;  %v1173_v18 = vadd.f32 %v7539_v36, %v7503_v26  ;;  %v1176_v16 = vadd.f32 %v7543_v51, %v7510_v12 }
 0x140   :  { %v1386_v23 = vpop.f32.mrf.mxu1  ;;  %v7576_v39 = vadd.f32 %v6380_v8, %v1180_v55  ;;  %v1400_v25 = vadd.f32 %v7523_v20, %v1170_v27  ;;  %v1175_v17 = vadd.f32 %v7551_v60, %v945_v31  ;;  %v1179_v34 = vadd.f32 %v1156_v49, %v949_v2  ;;  %v8948_v20 = vld [vmem:[#allocation14_spill] sm:$0xff] }
 0x141   :  { %v6385_v45 = vpop.f32.mrf.mxu0  ;;  %v7606_v50 = vadd.f32 %v7529_v28, %v1172_v59  ;;  %v7612_v40 = vadd.f32 %v8948_v20, %v1174_v3  ;;  %v7615_v60 = vadd.f32 %v8949_v37, %v1173_v18  ;;  %v7618_v42 = vadd.f32 %v8950_v56, %v1176_v16  ;;  %v8951_v28 = vld [vmem:[#allocation17_spill] sm:$0xff]  ;;  %v2438_v18 = vld [vmem:[#allocation2 + $0x20] sm:$0x8] }
 0x142   :  { %v6411_v47 = vpop.f32.mrf.mxu1  ;;  %v1626_v52 = vadd.f32 %v6385_v45, %v1396_v24  ;;  %v7622_v8 = vadd.f32 %v8951_v28, %v1175_v17  ;;  %v7624_v9 = vadd.f32 %v1386_v23, %v1179_v34  ;;  %v8952_v22 = vmov 0 }
 0x143   :  { %v1546_v1 = vpop.f32.mrf.mxu0  ;;  %v8953_v22 = vsel %vm7630_vm13, 4294967295, %v8952_v22  ;;  %v8955_v23 = vmov 0  ;;  %v8958_v27 = vmov 0  ;;  %v8963_v3 = vmov 0 }
 0x144   :  { %v1776_v14 = vpop.f32.mrf.mxu1  ;;  %v1856_v33 = vadd.f32 %v6411_v47, %v1626_v52  ;;  %v1625_v54 = vadd.f32 %v1546_v1, %v1395_v13  ;;  %8954 = vst [vmem:[#allocation13_spill] sm:$0xff] %v8953_v22  ;;  %v8956_v23 = vsel %vm7636_vm14, 4294967295, %v8955_v23  ;;  %v8959_v27 = vsel %vm7647_vm15, 4294967295, %v8958_v27 }
 0x145   :  { %v6388_v21 = vpop.f32.mrf.mxu0  ;;  %8957 = vst [vmem:[#allocation14_spill] sm:$0xff] %v8956_v23  ;;  %8960 = vst [vmem:[#allocation15_spill] sm:$0xff] %v8959_v27  ;;  %v8964_v3 = vsel %vm7659_vm5, 4294967295, %v8963_v3  ;;  %v8968_v34 = vmov 0  ;;  %v8971_v37 = vmov 0 }
 0x146   :  { %v6414_v61 = vpop.f32.mrf.mxu1  ;;  %v1879_v32 = vadd.f32 %v7587_v15, %v1856_v33  ;;  %v1855_v62 = vadd.f32 %v1776_v14, %v1625_v54  ;;  %v1628_v11 = vadd.f32 %v6388_v21, %v1398_v7  ;;  %8965 = vst [vmem:[#allocation16_spill] sm:$0xff] %v8964_v3  ;;  %v8969_v34 = vsel %vm7673_vm3, 4294967295, %v8968_v34 }
 0x147   :  { %v1556_v26 = vpop.f32.mrf.mxu0  ;;  %8970 = vst [vmem:[#allocation17_spill] sm:$0xff] %v8969_v34  ;;  %v8972_v37 = vsel %vm7683_vm8, 4294967295, %v8971_v37 }
 0x148   :  { %v1895_v36 = vmax.f32 %v1879_v32, 0.0  ;;  %v1878_v0 = vadd.f32 %v7587_v15, %v1855_v62  ;;  %v1627_v19 = vadd.f32 %v1556_v26, %v1397_v35  ;;  %v1858_v12 = vadd.f32 %v6414_v61, %v1628_v11  ;;  %v1786_v51 = vpop.f32.mrf.mxu1  ;;  %v2443_v61 = vld [vmem:[#allocation2 + $0x48] sm:$0xf]  ;;  %v2223_v26 = vld [vmem:[#allocation2 + $0x2c] sm:$0xf]  ;;  %8973 = vst [vmem:[#allocation18_spill] sm:$0xff] %v8972_v37 }
 0x149   :  { %v6391_v53 = vpop.f32.mrf.mxu0 }
 0x14a   :  { %v5849_v41 = vpack.c.bf16 %v1895_v36, %v1895_v36  ;;  %v1894_v44 = vmax.f32 %v1878_v0, 0.0  ;;  %v1881_v46 = vadd.f32 %v7587_v15, %v1858_v12  ;;  %v7626_v48 = vadd.f32 %v6391_v53, %v1400_v25 }
 0x14b   :  { %v1857_v55 = vadd.f32 %v1786_v51, %v1627_v19  ;;  %v1566_v63 = vpop.f32.mrf.mxu0  ;;  %v6417_v19 = vpop.f32.mrf.mxu1 }
 0x14c   :  { %v1963_v6 = vrot.slane %v5849_v41, 7  ;;  %v2069_v49 = vshrl.u32 %v5849_v41, 16  ;;  %v2072_v24 = vshll.u32 %v5849_v41, 16  ;;  %2321 = vst [vmem:[#allocation2 + $0x44] sm:$0xf] %v5849_v41  ;;  %v2524_v38 = vrot.slane %v5849_v41, 5 }
 0x14d   :  { %v5848_v45 = vpack.c.bf16 %v1894_v44, %v1894_v44  ;;  %v1897_v47 = vmax.f32 %v1881_v46, 0.0  ;;  %v7641_v10 = vadd.f32 %v7587_v15, %v1857_v55  ;;  %v7643_v13 = vadd.f32 %v1566_v63, %v1399_v29 }
 0x14e   :  { %v2071_v52 = vrot.slane %v2069_v49, 7  ;;  %v2343_v31 = vrot.slane %v2072_v24, 5  ;;  %v2345_v2 = vrot.slane %v2069_v49, 4  ;;  %v2526_v1 = vrot.slane %v2524_v38, 4 }
 0x14f   :  { %v1961_v7 = vrot.slane %v5848_v45, 7  ;;  %v2061_v35 = vshrl.u32 %v5848_v45, 16  ;;  %v2064_v33 = vshll.u32 %v5848_v45, 16  ;;  %2320 = vst [vmem:[#allocation2 + $0x30] sm:$0xf] %v5848_v45  ;;  %v2522_v21 = vrot.slane %v5848_v45, 5  ;;  %v1796_v45 = vpop.f32.mrf.mxu1 }
 0x150   :  { %v2074_v54 = vor.u32 %v2072_v24, %v2071_v52  ;;  %v2076_v59 = vrot.slane %v2071_v52, 4  ;;  %v2346_v5 = vor.u32 %v2345_v2, %v2343_v31  ;;  %2588 = vst [vmem:[#allocation2 + $0x4c] sm:$0x7] %v2526_v1  ;;  %v7677_v0 = vpack.c.bf16 %v1897_v47, %v1897_v47  ;;  %v2235_v1 = vld [vmem:[#allocation2 + $0xcc] sm:$0x1] }
 0x151   :  { %v1962_v16 = vrot.slane %v1961_v7, 4  ;;  %2025 = vst [vmem:[#allocation2 + $0x28] sm:$0xe] %v1961_v7  ;;  %v2063_v32 = vrot.slane %v2061_v35, 7  ;;  %v2339_v62 = vrot.slane %v2064_v33, 5  ;;  %v2340_v11 = vrot.slane %v2061_v35, 4 }
 0x152   :  { %v2229_v29 = vsel %vm7630_vm13, %v2076_v59, %v2228_v4  ;;  %v2347_v17 = vrot.slane %v2346_v5, 4  ;;  %v2523_v36 = vrot.slane %v2522_v21, 4  ;;  %v1968_v44 = vrot.slane %v7677_v0, 7  ;;  %2323 = vst [vmem:[#allocation2 + $0xbc] sm:$0xf] %v7677_v0 }
 0x153   :  { %2230 = vst [vmem:[#allocation2 + $0x54] sm:$0x1] %v2229_v29  ;;  %v1964_v12 = vsel %vm7653_vm1, %v1962_v16, %v1963_v6  ;;  %v2066_v51 = vor.u32 %v2064_v33, %v2063_v32  ;;  %v2067_v57 = vrot.slane %v2063_v32, 4  ;;  %v2341_v20 = vor.u32 %v2340_v11, %v2339_v62  ;;  %v6394_v6 = vpop.f32.mrf.mxu0  ;;  %v2450_v21 = vld [vmem:[#allocation2 + $0xc0] sm:$0xf] }
 0x154   :  { %v2444_v53 = vsel %vm7647_vm15, %v2347_v17, %v2443_v61  ;;  %2026 = vst [vmem:[#allocation2 + $0x3c] sm:$0xf] %v1964_v12  ;;  %v2439_v56 = vsel %vm7636_vm14, %v2339_v62, %v2438_v18  ;;  %v2525_v41 = vsel %vm7665_vm2, %v2523_v36, %v2524_v38  ;;  %v2086_v63 = vshrl.u32 %v7677_v0, 16  ;;  %v2231_v62 = vld [vmem:[#allocation2 + $0xa4] sm:$0xf] }
 0x155   :  { %2445 = vst [vmem:[#allocation2 + $0x48] sm:$0xf] %v2444_v53  ;;  %v2075_v46 = vsel %vm7659_vm5, %v2067_v57, %v2074_v54  ;;  %v2224_v28 = vsel %vm7673_vm3, %v2066_v51, %v2223_v26  ;;  %v2342_v55 = vrot.slane %v2341_v20, 4  ;;  %2440 = vst [vmem:[#allocation2 + $0x20] sm:$0x8] %v2439_v56  ;;  %v2089_v49 = vshll.u32 %v7677_v0, 16  ;;  %v1576_v26 = vpop.f32.mrf.mxu0 }
 0x156   :  { %2587 = vst [vmem:[#allocation2 + $0x38] sm:$0xf] %v2525_v41  ;;  %2225 = vst [vmem:[#allocation2 + $0x2c] sm:$0xf] %v2224_v28  ;;  %v2529_v24 = vrot.slane %v7677_v0, 5  ;;  %v1896_v38 = vmax.f32 %v7641_v10, 0.0  ;;  %v1860_v4 = vadd.f32 %v6417_v19, %v7626_v48  ;;  %v7709_v54 = vadd.f32 %v6394_v6, %v7606_v50 }
 0x157   :  { %2226 = vst [vmem:[#allocation2 + $0x40] sm:$0xf] %v2075_v46  ;;  %v2344_v47 = vsel %vm7683_vm8, %v2342_v55, %v2343_v31  ;;  %v2088_v52 = vrot.slane %v2086_v63, 7  ;;  %v2354_v2 = vrot.slane %v2086_v63, 4  ;;  %v7706_v7 = vrot.slane %v2089_v49, 5 }
 0x158   :  { %2441 = vst [vmem:[#allocation2 + $0x34] sm:$0xf] %v2344_v47  ;;  %v2531_v35 = vrot.slane %v2529_v24, 4  ;;  %v5850_v33 = vpack.c.bf16 %v1896_v38, %v1896_v38  ;;  %v1883_v10 = vadd.f32 %v7587_v15, %v1860_v4  ;;  %v1859_v18 = vadd.f32 %v1796_v45, %v7643_v13  ;;  %v2446_v50 = vld [vmem:[#allocation2 + $0x98] sm:$0x8]  ;;  %v6420_v45 = vpop.f32.mrf.mxu1  ;;  %v6397_v47 = vpop.f32.mrf.mxu0 }
 0x159   :  { %v2091_v59 = vor.u32 %v2089_v49, %v2088_v52  ;;  %v2093_v5 = vrot.slane %v2088_v52, 4  ;;  %v2355_v31 = vor.u32 %v2354_v2, %v7706_v7 }
 0x15a   :  { %2591 = vst [vmem:[#allocation2 + $0xc4] sm:$0x7] %v2531_v35  ;;  %v1966_v48 = vrot.slane %v5850_v33, 7  ;;  %v2078_v61 = vshrl.u32 %v5850_v33, 16  ;;  %v2081_v16 = vshll.u32 %v5850_v33, 16  ;;  %v2527_v11 = vrot.slane %v5850_v33, 5 }
 0x15b   :  { %2322 = vst [vmem:[#allocation2 + $0xa8] sm:$0xf] %v5850_v33  ;;  %v2236_v32 = vsel %vm7630_vm13, %v2093_v5, %v2235_v1  ;;  %v1899_v29 = vmax.f32 %v1883_v10, 0.0  ;;  %v1882_v17 = vadd.f32 %v7587_v15, %v1859_v18  ;;  %v2356_v13 = vrot.slane %v2355_v31, 4 }
 0x15c   :  { %v2495_v36 = vld [vmem:[#allocation2 + $0x48] sm:$0x8]  ;;  %2237 = vst [vmem:[#allocation2 + $0xcc] sm:$0x1] %v2236_v32  ;;  %v1967_v0 = vrot.slane %v1966_v48, 4  ;;  %v2080_v19 = vrot.slane %v2078_v61, 7  ;;  %v1586_v32 = vpop.f32.mrf.mxu0 }
 0x15d   :  { %2028 = vst [vmem:[#allocation2 + $0xa0] sm:$0xe] %v1966_v48  ;;  %v2348_v12 = vrot.slane %v2081_v16, 5  ;;  %v2496_v51 = vsel %vm7636_vm14, 0, %v2495_v36  ;;  %v2280_v57 = vld [vmem:[#allocation2 + $0x2c] sm:$0x1]  ;;  %v7719_v56 = vpack.c.bf16 %v1899_v29, %v1899_v29  ;;  %v2451_v46 = vsel %vm7647_vm15, %v2356_v13, %v2450_v21 }
 0x15e   :  { %v2349_v20 = vrot.slane %v2078_v61, 4  ;;  %v2528_v53 = vrot.slane %v2527_v11, 4  ;;  %2497 = vst [vmem:[#allocation2 + $0x48] sm:$0x8] %v2496_v51  ;;  %v2281_v41 = vsel %vm7630_vm13, 0, %v2280_v57  ;;  %v1969_v28 = vsel %vm7653_vm1, %v1967_v0, %v1968_v44 }
 0x15f   :  { %v2083_v55 = vor.u32 %v2081_v16, %v2080_v19  ;;  %2282 = vst [vmem:[#allocation2 + $0x2c] sm:$0x1] %v2281_v41  ;;  %2452 = vst [vmem:[#allocation2 + $0xc0] sm:$0xf] %v2451_v46  ;;  %v2084_v63 = vrot.slane %v2080_v19, 4  ;;  %v2447_v49 = vsel %vm7636_vm14, %v2348_v12, %v2446_v50  ;;  %v1973_v44 = vrot.slane %v7719_v56, 7  ;;  %v1806_v16 = vpop.f32.mrf.mxu1 }
 0x160   :  { %2029 = vst [vmem:[#allocation2 + $0xb4] sm:$0xf] %v1969_v28  ;;  %v2350_v6 = vor.u32 %v2349_v20, %v2348_v12  ;;  %v2530_v38 = vsel %vm7665_vm2, %v2528_v53, %v2529_v24  ;;  %2325 = vst [vmem:[#allocation2 + $0x134] sm:$0xf] %v7719_v56  ;;  %v2103_v2 = vshrl.u32 %v7719_v56, 16  ;;  %v2106_v4 = vshll.u32 %v7719_v56, 16 }
 0x161   :  { %v2232_v52 = vsel %vm7673_vm3, %v2083_v55, %v2231_v62  ;;  %2448 = vst [vmem:[#allocation2 + $0x98] sm:$0x8] %v2447_v49  ;;  %2590 = vst [vmem:[#allocation2 + $0xb0] sm:$0xf] %v2530_v38  ;;  %v2092_v1 = vsel %vm7659_vm5, %v2084_v63, %v2091_v59  ;;  %v2534_v35 = vrot.slane %v7719_v56, 5  ;;  %v1898_v33 = vmax.f32 %v1882_v17, 0.0  ;;  %v6423_v63 = vpop.f32.mrf.mxu1 }
 0x162   :  { %2233 = vst [vmem:[#allocation2 + $0xa4] sm:$0xf] %v2232_v52  ;;  %v2351_v24 = vrot.slane %v2350_v6, 4  ;;  %2234 = vst [vmem:[#allocation2 + $0xb8] sm:$0xf] %v2092_v1  ;;  %v2105_v5 = vrot.slane %v2103_v2, 7  ;;  %v1631_v59 = vadd.f32 %v1576_v26, %v7609_v58  ;;  %v1862_v17 = vadd.f32 %v6420_v45, %v7709_v54  ;;  %v6400_v6 = vpop.f32.mrf.mxu0 }
 0x163   :  { %v7740_v10 = vrot.slane %v2106_v4, 5  ;;  %v2363_v18 = vrot.slane %v2103_v2, 4  ;;  %v2242_v21 = vld [vmem:[#allocation2 + $0x144] sm:$0x1]  ;;  %v2536_v48 = vrot.slane %v2534_v35, 4  ;;  %v5852_v61 = vpack.c.bf16 %v1898_v33, %v1898_v33 }
 0x164   :  { %v2353_v31 = vsel %vm7683_vm8, %v2351_v24, %v7706_v7  ;;  %v2108_v62 = vor.u32 %v2106_v4, %v2105_v5  ;;  %v2110_v50 = vrot.slane %v2105_v5, 4  ;;  %v2457_v29 = vld [vmem:[#allocation2 + $0x138] sm:$0xf]  ;;  %v2453_v0 = vld [vmem:[#allocation2 + $0x110] sm:$0x8]  ;;  %v1885_v57 = vadd.f32 %v7587_v15, %v1862_v17  ;;  %v1816_v17 = vpop.f32.mrf.mxu1 }
 0x165   :  { %2449 = vst [vmem:[#allocation2 + $0xac] sm:$0xf] %v2353_v31  ;;  %v2364_v11 = vor.u32 %v2363_v18, %v7740_v10  ;;  %2594 = vst [vmem:[#allocation2 + $0x13c] sm:$0x7] %v2536_v48  ;;  %v1971_v36 = vrot.slane %v5852_v61, 7  ;;  %v2095_v7 = vshrl.u32 %v5852_v61, 16  ;;  %v1634_v20 = vadd.f32 %v6397_v47, %v7612_v40 }
 0x166   :  { %v2098_v13 = vshll.u32 %v5852_v61, 16  ;;  %2324 = vst [vmem:[#allocation2 + $0x120] sm:$0xf] %v5852_v61  ;;  %v2532_v19 = vrot.slane %v5852_v61, 5  ;;  %v2498_v12 = vld [vmem:[#allocation2 + $0xc0] sm:$0x8]  ;;  %v2243_v58 = vsel %vm7630_vm13, %v2110_v50, %v2242_v21 }
 0x167   :  { %v2365_v26 = vrot.slane %v2364_v11, 4  ;;  %v2238_v51 = vld [vmem:[#allocation2 + $0x11c] sm:$0xf]  ;;  %v6580_v41 = vld [vmem:[#allocation4 + $0x270] ss:$8 sps:$4 sm:$0xff]   ;;  %v2499_v54 = vsel %vm7636_vm14, 0, %v2498_v12  ;;  %v1861_v11 = vadd.f32 %v1806_v16, %v1631_v59  ;;  %v1864_v16 = vadd.f32 %v6423_v63, %v1634_v20 }
 0x168   :  { %v6574_v53 = vld [vmem:[#allocation2 + $0x28] ss:$20 sps:$4 sm:$0xff]   ;;  %2244 = vst [vmem:[#allocation2 + $0x144] sm:$0x1] %v2243_v58  ;;  %v1972_v46 = vrot.slane %v1971_v36, 4  ;;  %v2097_v28 = vrot.slane %v2095_v7, 7 }
 0x169   :  { %2031 = vst [vmem:[#allocation2 + $0x118] sm:$0xe] %v1971_v36  ;;  %v2357_v55 = vrot.slane %v2098_v13, 5  ;;  %v6576_v49 = vld [vmem:[#allocation2 + $0x2c] ss:$20 sps:$4 sm:$0xff]   ;;  %v2458_v52 = vsel %vm7647_vm15, %v2365_v26, %v2457_v29  ;;  %v2358_v40 = vrot.slane %v2095_v7, 4  ;;  %v1633_v29 = vadd.f32 %v1586_v32, %v7615_v60  ;;  %v1596_v36 = vpop.f32.mrf.mxu0 }
 0x16a   :  { %v6591_v38 = vld [vmem:[#allocation4 + $0x264] ss:$8 sps:$4 sm:$0xff]   ;;  %2500 = vst [vmem:[#allocation2 + $0xc0] sm:$0x8] %v2499_v54  ;;  %v2533_v47 = vrot.slane %v2532_v19, 4  ;;  %v1901_v2 = vmax.f32 %v1885_v57, 0.0  ;;  %v1974_v1 = vsel %vm7653_vm1, %v1972_v46, %v1973_v44  ;;  %v2100_v24 = vor.u32 %v2098_v13, %v2097_v28  ;;  %3398 = vmatprep.mubr.bf16.mxu0 %v6576_v49 }
 0x16b   :  { %v2283_v45 = vld [vmem:[#allocation2 + $0xa4] sm:$0x1]  ;;  %2459 = vst [vmem:[#allocation2 + $0x138] sm:$0xf] %v2458_v52  ;;  %v2101_v33 = vrot.slane %v2097_v28, 4  ;;  %v2359_v31 = vor.u32 %v2358_v40, %v2357_v55  ;;  %v2454_v21 = vsel %vm7636_vm14, %v2357_v55, %v2453_v0  ;;  %3399 = vmatmul.mubr.bf16.vlgmr.msra.gmra.mxu0 %v6574_v53  ;;  %v1884_v60 = vadd.f32 %v7587_v15, %v1861_v11 }
 0x16c   :  { %v2284_v4 = vsel %vm7630_vm13, 0, %v2283_v45  ;;  %v6577_v5 = vld [vmem:[#allocation2 + $0x30] ss:$20 sps:$4 sm:$0xff]   ;;  %v6579_v18 = vld [vmem:[#allocation2 + $0x34] ss:$20 sps:$4 sm:$0xff]   ;;  %v2535_v48 = vsel %vm7665_vm2, %v2533_v47, %v2534_v35  ;;  %v7768_v61 = vpack.c.bf16 %v1901_v2, %v1901_v2  ;;  %v2239_v50 = vsel %vm7673_vm3, %v2100_v24, %v2238_v51  ;;  %3593 = vmatpush1.bf16.msra.mxu0 %v6580_v41  ;;  %v6426_v41 = vpop.f32.mrf.mxu1 }
 0x16d   :  { %2285 = vst [vmem:[#allocation2 + $0xa4] sm:$0x1] %v2284_v4  ;;  %2032 = vst [vmem:[#allocation2 + $0x12c] sm:$0xf] %v1974_v1  ;;  %v2109_v44 = vsel %vm7659_vm5, %v2101_v33, %v2108_v62  ;;  %3511 = vmatprep.mubr.bf16.mxu1 %v6579_v18  ;;  %v6589_v56 = vld [vmem:[#allocation4 + $0x260] ss:$8 sps:$4 sm:$0xff]   ;;  %v1636_v32 = vadd.f32 %v6400_v6, %v7618_v42  ;;  %3594 = vmatprep.subr.bf16.mxu0 %v6591_v38  ;;  %v6403_v42 = vpop.f32.mrf.mxu0 }
 0x16e   :  { %2455 = vst [vmem:[#allocation2 + $0x110] sm:$0x8] %v2454_v21  ;;  %2593 = vst [vmem:[#allocation2 + $0x128] sm:$0xf] %v2535_v48  ;;  %v2360_v35 = vrot.slane %v2359_v31, 4  ;;  %v1978_v7 = vrot.slane %v7768_v61, 7  ;;  %3512 = vmatmul.mubr.bf16.vlgmr.msra.gmra.mxu1 %v6577_v5  ;;  %v1887_v20 = vadd.f32 %v7587_v15, %v1864_v16  ;;  %v1863_v6 = vadd.f32 %v1816_v17, %v1633_v29 }
 0x16f   :  { %2240 = vst [vmem:[#allocation2 + $0x11c] sm:$0xf] %v2239_v50  ;;  %2241 = vst [vmem:[#allocation2 + $0x130] sm:$0xf] %v2109_v44  ;;  %v2120_v13 = vshrl.u32 %v7768_v61, 16  ;;  %v2123_v62 = vshll.u32 %v7768_v61, 16  ;;  %v7793_v49 = vadd.f32 %v1596_v36, %v7622_v8  ;;  %v7801_v24 = vadd.f32 %v6426_v41, %v1636_v32 }
 0x170   :  { %2327 = vst [vmem:[#allocation2 + $0x1ac] sm:$0xf] %v7768_v61  ;;  %v2539_v59 = vrot.slane %v7768_v61, 5  ;;  %v6600_v0 = vld [vmem:[#allocation4 + $0x254] ss:$8 sps:$4 sm:$0xff]   ;;  %v2362_v19 = vsel %vm7683_vm8, %v2360_v35, %v7740_v10  ;;  %v1900_v53 = vmax.f32 %v1884_v60, 0.0  ;;  %3595 = vmatpush1.bf16.msra.mxu0 %v6589_v56  ;;  %v1886_v8 = vadd.f32 %v7587_v15, %v1863_v6 }
 0x171   :  { %v2122_v12 = vrot.slane %v2120_v13, 7  ;;  %v2249_v58 = vld [vmem:[#allocation2 + $0x1bc] sm:$0x1]  ;;  %v7785_v26 = vrot.slane %v2123_v62, 5  ;;  %2456 = vst [vmem:[#allocation2 + $0x124] sm:$0xf] %v2362_v19  ;;  %3596 = vmatprep.subr.bf16.mxu0 %v6600_v0  ;;  %v7804_v33 = vadd.f32 %v6403_v42, %v7564_v30 }
 0x172   :  { %v2372_v51 = vrot.slane %v2120_v13, 4  ;;  %v2541_v57 = vrot.slane %v2539_v59, 4  ;;  %v6585_v54 = vld [vmem:[#allocation2 + $0xac] ss:$20 sps:$4 sm:$0xff]   ;;  %v6598_v46 = vld [vmem:[#allocation4 + $0x250] ss:$8 sps:$4 sm:$0xff]   ;;  %v5854_v40 = vpack.c.bf16 %v1900_v53, %v1900_v53 }
 0x173   :  { %v2501_v28 = vld [vmem:[#allocation2 + $0x138] sm:$0x8]  ;;  %v7790_v55 = vor.u32 %v2123_v62, %v2122_v12  ;;  %v2127_v10 = vrot.slane %v2122_v12, 4  ;;  %v2464_v63 = vld [vmem:[#allocation2 + $0x1b0] sm:$0xf]  ;;  %v1903_v47 = vmax.f32 %v1887_v20, 0.0  ;;  %3521 = vmatprep.mubr.bf16.mxu1 %v6585_v54 }
 0x174   :  { %v6609_v38 = vld [vmem:[#allocation4 + $0x244] ss:$8 sps:$4 sm:$0xff]   ;;  %v2502_v45 = vsel %vm7636_vm14, 0, %v2501_v28  ;;  %v2373_v52 = vor.u32 %v2372_v51, %v7785_v26  ;;  %2597 = vst [vmem:[#allocation2 + $0x1b4] sm:$0x7] %v2541_v57  ;;  %v1976_v48 = vrot.slane %v5854_v40, 7  ;;  %3597 = vmatpush1.bf16.msra.mxu0 %v6598_v46  ;;  %v1826_v28 = vpop.f32.mrf.mxu1 }
 0x175   :  { %v6583_v2 = vld [vmem:[#allocation2 + $0xa4] ss:$20 sps:$4 sm:$0xff]   ;;  %2503 = vst [vmem:[#allocation2 + $0x138] sm:$0x8] %v2502_v45  ;;  %v2250_v4 = vsel %vm7630_vm13, %v2127_v10, %v2249_v58  ;;  %v2460_v1 = vld [vmem:[#allocation2 + $0x188] sm:$0x8]  ;;  %v7808_v36 = vpack.c.bf16 %v1903_v47, %v1903_v47  ;;  %3598 = vmatprep.subr.bf16.mxu0 %v6609_v38 }
 0x176   :  { %v6587_v5 = vld [vmem:[#allocation2 + $0xa0] ss:$20 sps:$4 sm:$0xff]   ;;  %v6588_v18 = vld [vmem:[#allocation2 + $0xa8] ss:$20 sps:$4 sm:$0xff]   ;;  %2251 = vst [vmem:[#allocation2 + $0x1bc] sm:$0x1] %v2250_v4  ;;  %3408 = vmatprep.mubr.bf16.mxu0 %v6583_v2  ;;  %v1889_v4 = vadd.f32 %v7587_v15, %v7801_v24 }
 0x177   :  { %v2286_v31 = vld [vmem:[#allocation2 + $0x11c] sm:$0x1]  ;;  %v2374_v21 = vrot.slane %v2373_v52, 4  ;;  %v2112_v44 = vshrl.u32 %v5854_v40, 16  ;;  %v2115_v50 = vshll.u32 %v5854_v40, 16  ;;  %v2537_v17 = vrot.slane %v5854_v40, 5  ;;  %3409 = vmatmul.mubr.bf16.gmra.mxu0 %v6587_v5  ;;  %3522 = vmatmul.mubr.bf16.gmra.mxu1 %v6588_v18 }
 0x178   :  { %2326 = vst [vmem:[#allocation2 + $0x198] sm:$0xf] %v5854_v40  ;;  %v2287_v11 = vsel %vm7630_vm13, 0, %v2286_v31  ;;  %v2245_v29 = vld [vmem:[#allocation2 + $0x194] sm:$0xf]  ;;  %v1902_v56 = vmax.f32 %v1886_v8, 0.0 }
 0x179   :  { %v6607_v30 = vld [vmem:[#allocation4 + $0x240] ss:$8 sps:$4 sm:$0xff]   ;;  %2288 = vst [vmem:[#allocation2 + $0x11c] sm:$0x1] %v2287_v11  ;;  %v2465_v35 = vsel %vm7647_vm15, %v2374_v21, %v2464_v63  ;;  %v1977_v13 = vrot.slane %v1976_v48, 4  ;;  %v2114_v62 = vrot.slane %v2112_v44, 7 }
 0x17a   :  { %2034 = vst [vmem:[#allocation2 + $0x190] sm:$0xe] %v1976_v48  ;;  %v2366_v60 = vrot.slane %v2115_v50, 5  ;;  %v6618_v16 = vld [vmem:[#allocation4 + $0x234] ss:$8 sps:$4 sm:$0xff]   ;;  %v2367_v32 = vrot.slane %v2112_v44, 4  ;;  %3599 = vmatpush1.bf16.msra.mxu0 %v6607_v30  ;;  %v5856_v40 = vpack.c.bf16 %v1902_v56, %v1902_v56 }
 0x17b   :  { %2466 = vst [vmem:[#allocation2 + $0x1b0] sm:$0xf] %v2465_v35  ;;  %v2538_v0 = vrot.slane %v2537_v17, 4  ;;  %v1983_v19 = vrot.slane %v7808_v36, 7  ;;  %v2137_v12 = vshrl.u32 %v7808_v36, 16  ;;  %v1979_v58 = vsel %vm7653_vm1, %v1977_v13, %v1978_v7  ;;  %3600 = vmatprep.subr.bf16.mxu0 %v6618_v16 }
 0x17c   :  { %2329 = vst [vmem:[#allocation2 + $0x224] sm:$0xf] %v7808_v36  ;;  %v2117_v51 = vor.u32 %v2115_v50, %v2114_v62  ;;  %v2118_v57 = vrot.slane %v2114_v62, 4  ;;  %v2461_v53 = vsel %vm7636_vm14, %v2366_v60, %v2460_v1  ;;  %v2256_v20 = vld [vmem:[#allocation2 + $0x234] sm:$0x1]  ;;  %v2368_v42 = vor.u32 %v2367_v32, %v2366_v60 }
 0x17d   :  { %v6616_v41 = vld [vmem:[#allocation4 + $0x230] ss:$8 sps:$4 sm:$0xff]   ;;  %2035 = vst [vmem:[#allocation2 + $0x1a4] sm:$0xf] %v1979_v58  ;;  %2462 = vst [vmem:[#allocation2 + $0x188] sm:$0x8] %v2461_v53  ;;  %v2540_v54 = vsel %vm7665_vm2, %v2538_v0, %v2539_v59  ;;  %v1865_v1 = vadd.f32 %v1826_v28, %v7793_v49 }
 0x17e   :  { %v2139_v46 = vrot.slane %v2137_v12, 7  ;;  %v6627_v10 = vld [vmem:[#allocation4 + $0x224] ss:$8 sps:$4 sm:$0xff]   ;;  %v2126_v7 = vsel %vm7659_vm5, %v2118_v57, %v7790_v55  ;;  %v2246_v63 = vsel %vm7673_vm3, %v2117_v51, %v2245_v29  ;;  %2596 = vst [vmem:[#allocation2 + $0x1a0] sm:$0xf] %v2540_v54  ;;  %v2140_v6 = vshll.u32 %v7808_v36, 16  ;;  %3601 = vmatpush1.bf16.msra.mxu0 %v6616_v41 }
 0x17f   :  { %v2381_v38 = vrot.slane %v2137_v12, 4  ;;  %v6594_v45 = vld [vmem:[#allocation2 + $0x124] ss:$20 sps:$4 sm:$0xff]   ;;  %2247 = vst [vmem:[#allocation2 + $0x194] sm:$0xf] %v2246_v63  ;;  %v2369_v61 = vrot.slane %v2368_v42, 4  ;;  %v1888_v35 = vadd.f32 %v7587_v15, %v1865_v1  ;;  %3602 = vmatprep.subr.bf16.mxu0 %v6627_v10  ;;  %v1606_v63 = vpop.f32.mrf.mxu0 }
 0x180   :  { %2248 = vst [vmem:[#allocation2 + $0x1a8] sm:$0xf] %v2126_v7  ;;  %v2144_v59 = vrot.slane %v2139_v46, 4  ;;  %v2544_v52 = vrot.slane %v7808_v36, 5  ;;  %v6597_v47 = vld [vmem:[#allocation2 + $0x120] ss:$20 sps:$4 sm:$0xff]   ;;  %v7832_v2 = vor.u32 %v2140_v6, %v2139_v46  ;;  %3531 = vmatprep.mubr.bf16.mxu1 %v6594_v45  ;;  %v6429_v46 = vpop.f32.mrf.mxu1 }
 0x181   :  { %v7834_v55 = vrot.slane %v2140_v6, 5  ;;  %v6625_v8 = vld [vmem:[#allocation4 + $0x220] ss:$8 sps:$4 sm:$0xff]   ;;  %v2371_v5 = vsel %vm7683_vm8, %v2369_v61, %v7785_v26  ;;  %v1981_v48 = vrot.slane %v5856_v40, 7  ;;  %2328 = vst [vmem:[#allocation2 + $0x210] sm:$0xf] %v5856_v40  ;;  %3532 = vmatmul.mubr.bf16.gmra.mxu1 %v6597_v47 }
 0x182   :  { %v2257_v18 = vsel %vm7630_vm13, %v2144_v59, %v2256_v20  ;;  %v2471_v31 = vld [vmem:[#allocation2 + $0x228] sm:$0xf]  ;;  %v2546_v21 = vrot.slane %v2544_v52, 4  ;;  %v6592_v44 = vld [vmem:[#allocation2 + $0x11c] ss:$20 sps:$4 sm:$0xff]   ;;  %v2129_v24 = vshrl.u32 %v5856_v40, 16  ;;  %3603 = vmatpush1.bf16.msra.mxu0 %v6625_v8 }
 0x183   :  { %v6636_v50 = vld [vmem:[#allocation4 + $0x214] ss:$8 sps:$4 sm:$0xff]   ;;  %v2504_v11 = vld [vmem:[#allocation2 + $0x1b0] sm:$0x8]  ;;  %2463 = vst [vmem:[#allocation2 + $0x19c] sm:$0xf] %v2371_v5  ;;  %v2382_v49 = vor.u32 %v2381_v38, %v7834_v55  ;;  %3418 = vmatprep.mubr.bf16.mxu0 %v6592_v44  ;;  %v7876_v5 = vadd.f32 %v1606_v63, %v7573_v43  ;;  %v6406_v43 = vpop.f32.mrf.mxu0 }
 0x184   :  { %2258 = vst [vmem:[#allocation2 + $0x234] sm:$0x1] %v2257_v18  ;;  %v2132_v29 = vshll.u32 %v5856_v40, 16  ;;  %v2542_v17 = vrot.slane %v5856_v40, 5  ;;  %v2505_v26 = vsel %vm7636_vm14, 0, %v2504_v11  ;;  %v1982_v56 = vrot.slane %v1981_v48, 4  ;;  %3604 = vmatprep.subr.bf16.mxu0 %v6636_v50  ;;  %v7878_v18 = vpop.f32.mrf.mxu1 }
 0x185   :  { %2600 = vst [vmem:[#allocation2 + $0x22c] sm:$0x7] %v2546_v21  ;;  %2037 = vst [vmem:[#allocation2 + $0x208] sm:$0xe] %v1981_v48  ;;  %v1905_v30 = vmax.f32 %v1889_v4, 0.0  ;;  %v2383_v62 = vrot.slane %v2382_v49, 4 }
 0x186   :  { %v6596_v13 = vld [vmem:[#allocation2 + $0x118] ss:$20 sps:$4 sm:$0xff]   ;;  %2506 = vst [vmem:[#allocation2 + $0x1b0] sm:$0x8] %v2505_v26  ;;  %v2131_v60 = vrot.slane %v2129_v24, 7  ;;  %v2375_v16 = vrot.slane %v2132_v29, 5  ;;  %v1984_v12 = vsel %vm7653_vm1, %v1982_v56, %v1983_v19 }
 0x187   :  { %v2376_v32 = vrot.slane %v2129_v24, 4  ;;  %v2467_v0 = vld [vmem:[#allocation2 + $0x200] sm:$0x8]  ;;  %v2252_v58 = vld [vmem:[#allocation2 + $0x20c] sm:$0xf]  ;;  %v2543_v51 = vrot.slane %v2542_v17, 4  ;;  %v7852_v57 = vpack.c.bf16 %v1905_v30, %v1905_v30  ;;  %3419 = vmatmul.mubr.bf16.gmra.mxu0 %v6596_v13  ;;  %v2472_v20 = vsel %vm7647_vm15, %v2383_v62, %v2471_v31 }
 0x188   :  { %v1904_v53 = vmax.f32 %v1888_v35, 0.0  ;;  %v2289_v15 = vld [vmem:[#allocation2 + $0x194] sm:$0x1]  ;;  %2038 = vst [vmem:[#allocation2 + $0x21c] sm:$0xf] %v1984_v12  ;;  %v2134_v41 = vor.u32 %v2132_v29, %v2131_v60  ;;  %v2135_v42 = vrot.slane %v2131_v60, 4  ;;  %v2468_v28 = vsel %vm7636_vm14, %v2375_v16, %v2467_v0 }
 0x189   :  { %v2377_v54 = vor.u32 %v2376_v32, %v2375_v16  ;;  %v6634_v36 = vld [vmem:[#allocation4 + $0x210] ss:$8 sps:$4 sm:$0xff]   ;;  %v2290_v19 = vsel %vm7630_vm13, 0, %v2289_v15  ;;  %2473 = vst [vmem:[#allocation2 + $0x228] sm:$0xf] %v2472_v20  ;;  %v2545_v10 = vsel %vm7665_vm2, %v2543_v51, %v2544_v52  ;;  %v1988_v7 = vrot.slane %v7852_v57, 7  ;;  %v6432_v51 = vpop.f32.mrf.mxu1 }
 0x18a   :  { %2331 = vst [vmem:[#allocation2 + $0x29c] sm:$0xf] %v7852_v57  ;;  %v6645_v6 = vld [vmem:[#allocation4 + $0x204] ss:$8 sps:$4 sm:$0xff]   ;;  %2291 = vst [vmem:[#allocation2 + $0x194] sm:$0x1] %v2290_v19  ;;  %v2143_v38 = vsel %vm7659_vm5, %v2135_v42, %v7832_v2  ;;  %v2253_v45 = vsel %vm7673_vm3, %v2134_v41, %v2252_v58  ;;  %v5858_v4 = vpack.c.bf16 %v1904_v53, %v1904_v53  ;;  %3605 = vmatpush1.bf16.msra.mxu0 %v6634_v36  ;;  %v1616_v19 = vpop.f32.mrf.mxu0 }
 0x18b   :  { %v2378_v61 = vrot.slane %v2377_v54, 4  ;;  %2469 = vst [vmem:[#allocation2 + $0x200] sm:$0x8] %v2468_v28  ;;  %2599 = vst [vmem:[#allocation2 + $0x218] sm:$0xf] %v2545_v10  ;;  %v2154_v59 = vshrl.u32 %v7852_v57, 16  ;;  %3606 = vmatprep.subr.bf16.mxu0 %v6645_v6  ;;  %v1868_v58 = vadd.f32 %v6429_v46, %v7804_v33 }
 0x18c   :  { %2254 = vst [vmem:[#allocation2 + $0x20c] sm:$0xf] %v2253_v45  ;;  %2255 = vst [vmem:[#allocation2 + $0x220] sm:$0xf] %v2143_v38  ;;  %v2157_v52 = vshll.u32 %v7852_v57, 16  ;;  %v2549_v47 = vrot.slane %v7852_v57, 5 }
 0x18d   :  { %v2263_v40 = vld [vmem:[#allocation2 + $0x2ac] sm:$0x1]  ;;  %v2380_v2 = vsel %vm7683_vm8, %v2378_v61, %v7834_v55  ;;  %v2156_v1 = vrot.slane %v2154_v59, 7  ;;  %v2390_v8 = vrot.slane %v2154_v59, 4  ;;  %v6643_v31 = vld [vmem:[#allocation4 + $0x200] ss:$8 sps:$4 sm:$0xff]   ;;  %v1640_v59 = vadd.f32 %v6406_v43, %v7576_v39 }
 0x18e   :  { %2470 = vst [vmem:[#allocation2 + $0x214] sm:$0xf] %v2380_v2  ;;  %v7880_v21 = vrot.slane %v2157_v52, 5  ;;  %v2551_v48 = vrot.slane %v2549_v47, 4  ;;  %v1986_v44 = vrot.slane %v5858_v4, 7  ;;  %v2146_v50 = vshrl.u32 %v5858_v4, 16  ;;  %3607 = vmatpush1.bf16.msra.mxu0 %v6643_v31 }
 0x18f   :  { %2330 = vst [vmem:[#allocation2 + $0x288] sm:$0xf] %v5858_v4  ;;  %v2474_v11 = vld [vmem:[#allocation2 + $0x278] sm:$0x8]  ;;  %v2159_v49 = vor.u32 %v2157_v52, %v2156_v1  ;;  %v2161_v55 = vrot.slane %v2156_v1, 4  ;;  %v2149_v29 = vshll.u32 %v5858_v4, 16  ;;  %v1867_v52 = vadd.f32 %v7878_v18, %v7876_v5 }
 0x190   :  { %v2478_v24 = vld [vmem:[#allocation2 + $0x2a0] sm:$0xf]  ;;  %v2547_v17 = vrot.slane %v5858_v4, 5  ;;  %v6603_v26 = vld [vmem:[#allocation2 + $0x19c] ss:$20 sps:$4 sm:$0xff]   ;;  %v2391_v56 = vor.u32 %v2390_v8, %v7880_v21  ;;  %v1987_v30 = vrot.slane %v1986_v44, 4  ;;  %v1639_v4 = vadd.f32 %v1616_v19, %v7624_v9 }
 0x191   :  { %2603 = vst [vmem:[#allocation2 + $0x2a4] sm:$0x7] %v2551_v48  ;;  %2040 = vst [vmem:[#allocation2 + $0x280] sm:$0xe] %v1986_v44  ;;  %v2148_v35 = vrot.slane %v2146_v50, 7  ;;  %v2385_v13 = vrot.slane %v2146_v50, 4  ;;  %v2264_v16 = vsel %vm7630_vm13, %v2161_v55, %v2263_v40  ;;  %3541 = vmatprep.mubr.bf16.mxu1 %v6603_v26  ;;  %v1846_v40 = vpop.f32.mrf.mxu1  ;;  %v1870_v8 = vadd.f32 %v6432_v51, %v1640_v59 }
 0x192   :  { %v6606_v62 = vld [vmem:[#allocation2 + $0x198] ss:$20 sps:$4 sm:$0xff]   ;;  %v2507_v60 = vld [vmem:[#allocation2 + $0x228] sm:$0x8]  ;;  %v2259_v32 = vld [vmem:[#allocation2 + $0x284] sm:$0xf]  ;;  %v1989_v15 = vsel %vm7653_vm1, %v1987_v30, %v1988_v7  ;;  %v1869_v48 = vadd.f32 %v1846_v40, %v1639_v4 }
 0x193   :  { %v2384_v0 = vrot.slane %v2149_v29, 5  ;;  %v2548_v12 = vrot.slane %v2547_v17, 4  ;;  %v2508_v57 = vsel %vm7636_vm14, 0, %v2507_v60  ;;  %2265 = vst [vmem:[#allocation2 + $0x2ac] sm:$0x1] %v2264_v16  ;;  %v2392_v53 = vrot.slane %v2391_v56, 4  ;;  %3542 = vmatmul.mubr.bf16.gmra.mxu1 %v6606_v62 }
 0x194   :  { %v2151_v20 = vor.u32 %v2149_v29, %v2148_v35  ;;  %v6601_v41 = vld [vmem:[#allocation2 + $0x194] ss:$20 sps:$4 sm:$0xff]   ;;  %2509 = vst [vmem:[#allocation2 + $0x228] sm:$0x8] %v2508_v57  ;;  %v2292_v42 = vld [vmem:[#allocation2 + $0x20c] sm:$0x1] }
 0x195   :  { %2041 = vst [vmem:[#allocation2 + $0x294] sm:$0xf] %v1989_v15  ;;  %v2152_v54 = vrot.slane %v2148_v35, 4  ;;  %v2386_v36 = vor.u32 %v2385_v13, %v2384_v0  ;;  %v2475_v33 = vsel %vm7636_vm14, %v2384_v0, %v2474_v11  ;;  %v2550_v46 = vsel %vm7665_vm2, %v2548_v12, %v2549_v47  ;;  %v6605_v28 = vld [vmem:[#allocation2 + $0x190] ss:$20 sps:$4 sm:$0xff]   ;;  %3428 = vmatprep.mubr.bf16.mxu0 %v6601_v41 }
 0x196   :  { %v2293_v10 = vsel %vm7630_vm13, 0, %v2292_v42  ;;  %v2479_v7 = vsel %vm7647_vm15, %v2392_v53, %v2478_v24  ;;  %v2260_v63 = vsel %vm7673_vm3, %v2151_v20, %v2259_v32  ;;  %2476 = vst [vmem:[#allocation2 + $0x278] sm:$0x8] %v2475_v33  ;;  %2602 = vst [vmem:[#allocation2 + $0x290] sm:$0xf] %v2550_v46  ;;  %3429 = vmatmul.mubr.bf16.gmra.mxu0 %v6605_v28 }
 0x197   :  { %v6705_v6 = vld [vmem:[%s8917_s2] ss:$0 sm:$0xff]  ;;  %2294 = vst [vmem:[#allocation2 + $0x20c] sm:$0x1] %v2293_v10  ;;  %2480 = vst [vmem:[#allocation2 + $0x2a0] sm:$0xf] %v2479_v7  ;;  %v2160_v45 = vsel %vm7659_vm5, %v2152_v54, %v2159_v49 }
 0x198   :  { %v1891_v38 = vadd.f32 %v6705_v6, %v1868_v58  ;;  %2261 = vst [vmem:[#allocation2 + $0x284] sm:$0xf] %v2260_v63  ;;  %v2387_v61 = vrot.slane %v2386_v36, 4  ;;  %2262 = vst [vmem:[#allocation2 + $0x298] sm:$0xf] %v2160_v45  ;;  %v1890_v1 = vadd.f32 %v6705_v6, %v1867_v52  ;;  %v1893_v44 = vadd.f32 %v6705_v6, %v1870_v8 }
 0x199   :  { %v2270_v11 = vld [vmem:[#allocation2 + $0x324] sm:$0x1]  ;;  %v7919_v26 = vadd.f32 %v6705_v6, %v1869_v48  ;;  %v6614_v53 = vld [vmem:[#allocation2 + $0x208] ss:$20 sps:$4 sm:$0xff]   ;;  %v2485_v20 = vld [vmem:[#allocation2 + $0x318] sm:$0xf] }
 0x19a   :  { %v1907_v47 = vmax.f32 %v1891_v38, 0.0  ;;  %v2389_v2 = vsel %vm7683_vm8, %v2387_v61, %v7880_v21  ;;  %v1906_v39 = vmax.f32 %v1890_v1, 0.0  ;;  %v1909_v49 = vmax.f32 %v1893_v44, 0.0  ;;  %v6615_v24 = vld [vmem:[#allocation2 + $0x210] ss:$20 sps:$4 sm:$0xff]  }
 0x19b   :  { %2477 = vst [vmem:[#allocation2 + $0x28c] sm:$0xf] %v2389_v2  ;;  %v6612_v55 = vld [vmem:[#allocation2 + $0x214] ss:$20 sps:$4 sm:$0xff]   ;;  %v1908_v54 = vmax.f32 %v7919_v26, 0.0 }
 0x19c   :  { %v7912_v31 = vpack.c.bf16 %v1907_v47, %v1907_v47  ;;  %v5860_v21 = vpack.c.bf16 %v1906_v39, %v1906_v39  ;;  %3551 = vmatprep.mubr.bf16.mxu1 %v6612_v55  ;;  %v7930_v42 = vpack.c.bf16 %v1909_v49, %v1909_v49  ;;  %v2481_v28 = vld [vmem:[#allocation2 + $0x2f0] sm:$0x8]  ;;  %v2266_v7 = vld [vmem:[#allocation2 + $0x2fc] sm:$0xf]  ;;  %v6623_v49 = vld [vmem:[#allocation2 + $0x280] ss:$20 sps:$4 sm:$0xff]  }
 0x19d   :  { %3552 = vmatmul.mubr.bf16.gmra.mxu1 %v6615_v24  ;;  %v2277_v2 = vld [vmem:[#allocation2 + $0x39c] sm:$0x1] }
 0x19e   :  { %v1993_v5 = vrot.slane %v7912_v31, 7  ;;  %v2171_v18 = vshrl.u32 %v7912_v31, 16  ;;  %v2174_v50 = vshll.u32 %v7912_v31, 16  ;;  %2333 = vst [vmem:[#allocation2 + $0x314] sm:$0xf] %v7912_v31  ;;  %v2554_v9 = vrot.slane %v7912_v31, 5 }
 0x19f   :  { %v2510_v29 = vld [vmem:[#allocation2 + $0x2a0] sm:$0x8]  ;;  %v2295_v17 = vld [vmem:[#allocation2 + $0x284] sm:$0x1]  ;;  %2332 = vst [vmem:[#allocation2 + $0x300] sm:$0xf] %v5860_v21 }
 0x1a0   :  { %v2173_v43 = vrot.slane %v2171_v18, 7  ;;  %v2511_v56 = vsel %vm7636_vm14, 0, %v2510_v29  ;;  %v2296_v30 = vsel %vm7630_vm13, 0, %v2295_v17  ;;  %v7925_v35 = vrot.slane %v2174_v50, 5  ;;  %v6610_v0 = vld [vmem:[#allocation2 + $0x20c] ss:$20 sps:$4 sm:$0xff]  }
 0x1a1   :  { %v2399_v13 = vrot.slane %v2171_v18, 4  ;;  %2512 = vst [vmem:[#allocation2 + $0x2a0] sm:$0x8] %v2511_v56  ;;  %2297 = vst [vmem:[#allocation2 + $0x284] sm:$0x1] %v2296_v30  ;;  %v2556_v16 = vrot.slane %v2554_v9, 4  ;;  %3438 = vmatprep.mubr.bf16.mxu0 %v6610_v0 }
 0x1a2   :  { %v2176_v62 = vor.u32 %v2174_v50, %v2173_v43  ;;  %v2178_v60 = vrot.slane %v2173_v43, 4  ;;  %v1991_v32 = vrot.slane %v5860_v21, 7  ;;  %v2163_v58 = vshrl.u32 %v5860_v21, 16  ;;  %3439 = vmatmul.mubr.bf16.gmra.mxu0 %v6614_v53  ;;  %2335 = vst [vmem:[#allocation2 + $0x38c] sm:$0xf] %v7930_v42 }
 0x1a3   :  { %v2400_v12 = vor.u32 %v2399_v13, %v7925_v35  ;;  %v2166_v51 = vshll.u32 %v5860_v21, 16  ;;  %v2552_v57 = vrot.slane %v5860_v21, 5  ;;  %2606 = vst [vmem:[#allocation2 + $0x31c] sm:$0x7] %v2556_v16  ;;  %v1998_v6 = vrot.slane %v7930_v42, 7 }
 0x1a4   :  { %v2271_v15 = vsel %vm7630_vm13, %v2178_v60, %v2270_v11  ;;  %v1992_v41 = vrot.slane %v1991_v32, 4  ;;  %2043 = vst [vmem:[#allocation2 + $0x2f8] sm:$0xe] %v1991_v32  ;;  %v2165_v33 = vrot.slane %v2163_v58, 7  ;;  %v2394_v19 = vrot.slane %v2163_v58, 4 }
 0x1a5   :  { %2272 = vst [vmem:[#allocation2 + $0x324] sm:$0x1] %v2271_v15  ;;  %v2401_v36 = vrot.slane %v2400_v12, 4  ;;  %v2393_v46 = vrot.slane %v2166_v51, 5  ;;  %v2553_v63 = vrot.slane %v2552_v57, 4  ;;  %v2188_v38 = vshrl.u32 %v7930_v42, 16 }
 0x1a6   :  { %v1994_v10 = vsel %vm7653_vm1, %v1992_v41, %v1993_v5  ;;  %v2168_v61 = vor.u32 %v2166_v51, %v2165_v33  ;;  %v2169_v59 = vrot.slane %v2165_v33, 4  ;;  %v2191_v48 = vshll.u32 %v7930_v42, 16  ;;  %v6624_v55 = vld [vmem:[#allocation2 + $0x288] ss:$20 sps:$4 sm:$0xff]   ;;  %v2492_v56 = vld [vmem:[#allocation2 + $0x390] sm:$0xf] }
 0x1a7   :  { %v2486_v45 = vsel %vm7647_vm15, %v2401_v36, %v2485_v20  ;;  %2044 = vst [vmem:[#allocation2 + $0x30c] sm:$0xf] %v1994_v10  ;;  %v2395_v52 = vor.u32 %v2394_v19, %v2393_v46  ;;  %v2482_v40 = vsel %vm7636_vm14, %v2393_v46, %v2481_v28  ;;  %v2555_v47 = vsel %vm7665_vm2, %v2553_v63, %v2554_v9  ;;  %v2488_v13 = vld [vmem:[#allocation2 + $0x368] sm:$0x8]  ;;  %v2273_v16 = vld [vmem:[#allocation2 + $0x374] sm:$0xf] }
 0x1a8   :  { %2487 = vst [vmem:[#allocation2 + $0x318] sm:$0xf] %v2486_v45  ;;  %v2190_v4 = vrot.slane %v2188_v38, 7  ;;  %v2177_v1 = vsel %vm7659_vm5, %v2169_v59, %v2176_v62  ;;  %v2267_v8 = vsel %vm7673_vm3, %v2168_v61, %v2266_v7  ;;  %2483 = vst [vmem:[#allocation2 + $0x2f0] sm:$0x8] %v2482_v40  ;;  %v2408_v5 = vrot.slane %v2188_v38, 4 }
 0x1a9   :  { %v2396_v31 = vrot.slane %v2395_v52, 4  ;;  %2605 = vst [vmem:[#allocation2 + $0x308] sm:$0xf] %v2555_v47  ;;  %v6619_v39 = vld [vmem:[#allocation2 + $0x284] ss:$20 sps:$4 sm:$0xff]   ;;  %v2559_v18 = vrot.slane %v7930_v42, 5  ;;  %v5862_v50 = vpack.c.bf16 %v1908_v54, %v1908_v54 }
 0x1aa   :  { %2268 = vst [vmem:[#allocation2 + $0x2fc] sm:$0xf] %v2267_v8  ;;  %2269 = vst [vmem:[#allocation2 + $0x310] sm:$0xf] %v2177_v1  ;;  %v2195_v44 = vrot.slane %v2190_v4, 4  ;;  %v2406_v21 = vrot.slane %v2191_v48, 5  ;;  %3448 = vmatprep.mubr.bf16.mxu0 %v6619_v39  ;;  %v2193_v12 = vor.u32 %v2191_v48, %v2190_v4 }
 0x1ab   :  { %v6621_v9 = vld [vmem:[#allocation2 + $0x28c] ss:$20 sps:$4 sm:$0xff]   ;;  %v2398_v11 = vsel %vm7683_vm8, %v2396_v31, %v7925_v35  ;;  %v2561_v29 = vrot.slane %v2559_v18, 4  ;;  %v1996_v17 = vrot.slane %v5862_v50, 7  ;;  %v2180_v43 = vshrl.u32 %v5862_v50, 16  ;;  %3449 = vmatmul.mubr.bf16.gmra.mxu0 %v6623_v49 }
 0x1ac   :  { %2484 = vst [vmem:[#allocation2 + $0x304] sm:$0xf] %v2398_v11  ;;  %v2278_v24 = vsel %vm7630_vm13, %v2195_v44, %v2277_v2  ;;  %2334 = vst [vmem:[#allocation2 + $0x378] sm:$0xf] %v5862_v50  ;;  %3561 = vmatprep.mubr.bf16.mxu1 %v6621_v9  ;;  %v2409_v26 = vor.u32 %v2408_v5, %v2406_v21  ;;  %v2183_v30 = vshll.u32 %v5862_v50, 16  ;;  %v2557_v62 = vrot.slane %v5862_v50, 5 }
 0x1ad   :  { %2279 = vst [vmem:[#allocation2 + $0x39c] sm:$0x1] %v2278_v24  ;;  %3562 = vmatmul.mubr.bf16.gmra.mxu1 %v6624_v55  ;;  %2609 = vst [vmem:[#allocation2 + $0x394] sm:$0x7] %v2561_v29  ;;  %v1997_v35 = vrot.slane %v1996_v17, 4  ;;  %v2182_v60 = vrot.slane %v2180_v43, 7 }
 0x1ae   :  { %2046 = vst [vmem:[#allocation2 + $0x370] sm:$0xe] %v1996_v17  ;;  %v2403_v32 = vrot.slane %v2180_v43, 4  ;;  %v2410_v58 = vrot.slane %v2409_v26, 4  ;;  %v2402_v51 = vrot.slane %v2183_v30, 5  ;;  %v2558_v57 = vrot.slane %v2557_v62, 4 }
 0x1af   :  { %v2513_v0 = vld [vmem:[#allocation2 + $0x318] sm:$0x8]  ;;  %v1999_v15 = vsel %vm7653_vm1, %v1997_v35, %v1998_v6  ;;  %v2185_v20 = vor.u32 %v2183_v30, %v2182_v60  ;;  %v2186_v41 = vrot.slane %v2182_v60, 4  ;;  %v6633_v6 = vld [vmem:[#allocation2 + $0x300] ss:$20 sps:$4 sm:$0xff]   ;;  %v8974_v1 = vmov 0   ;;  %vm8208_vm1 = vmand %vm4192_vm0, %vm4193_vm6 }
 0x1b0   :  { %v2514_v53 = vsel %vm7636_vm14, 0, %v2513_v0  ;;  %v2493_v54 = vsel %vm7647_vm15, %v2410_v58, %v2492_v56  ;;  %2047 = vst [vmem:[#allocation2 + $0x384] sm:$0xf] %v1999_v15  ;;  %v2404_v36 = vor.u32 %v2403_v32, %v2402_v51  ;;  %v2489_v33 = vsel %vm7636_vm14, %v2402_v51, %v2488_v13  ;;  %v6632_v52 = vld [vmem:[#allocation2 + $0x2f8] ss:$20 sps:$4 sm:$0xff]   ;;  %v6656_v9 = vld [vmem:[#allocation7 + $0x70] sm:$0xff]   ;;  %vm8241_vm6 = vmor %vm8208_vm1, %vm7636_vm14 }
 0x1b1   :  { %2515 = vst [vmem:[#allocation2 + $0x318] sm:$0x8] %v2514_v53  ;;  %v2298_v42 = vld [vmem:[#allocation2 + $0x2fc] sm:$0x1]  ;;  %v2560_v46 = vsel %vm7665_vm2, %v2558_v57, %v2559_v18  ;;  %2494 = vst [vmem:[#allocation2 + $0x390] sm:$0xf] %v2493_v54  ;;  %v2194_v14 = vsel %vm7659_vm5, %v2186_v41, %v2193_v12  ;;  %v2274_v28 = vsel %vm7673_vm3, %v2185_v20, %v2273_v16 }
 0x1b2   :  { %v2299_v19 = vsel %vm7630_vm13, 0, %v2298_v42  ;;  %2490 = vst [vmem:[#allocation2 + $0x368] sm:$0x8] %v2489_v33  ;;  %2608 = vst [vmem:[#allocation2 + $0x380] sm:$0xf] %v2560_v46  ;;  %v2405_v10 = vrot.slane %v2404_v36, 4 }
 0x1b3   :  { %2300 = vst [vmem:[#allocation2 + $0x2fc] sm:$0x1] %v2299_v19  ;;  %2275 = vst [vmem:[#allocation2 + $0x374] sm:$0xf] %v2274_v28  ;;  %v6642_v4 = vld [vmem:[#allocation2 + $0x378] ss:$20 sps:$4 sm:$0xff]  }
 0x1b4   :  { %2276 = vst [vmem:[#allocation2 + $0x388] sm:$0xf] %v2194_v14  ;;  %v2407_v25 = vsel %vm7683_vm8, %v2405_v10, %v2406_v21  ;;  %v6646_v8 = vld [vmem:[#allocation2 + $0x38] ss:$20 sps:$4 sm:$0xff]   ;;  %v6647_v31 = vld [vmem:[#allocation2 + $0xb0] ss:$20 sps:$4 sm:$0xff]   ;;  %vm8220_vm2 = vmand %vm3977_vm9, %vm3978_vm10 }
 0x1b5   :  { %2491 = vst [vmem:[#allocation2 + $0x37c] sm:$0xf] %v2407_v25  ;;  %v6648_v48 = vld [vmem:[#allocation2 + $0x128] ss:$20 sps:$4 sm:$0xff]   ;;  %v6649_v39 = vld [vmem:[#allocation2 + $0x1a0] ss:$20 sps:$4 sm:$0xff]   ;;  %vm8253_vm10 = vmor %vm8220_vm2, %vm7673_vm3 }
 0x1b6   :  { %v6650_v44 = vld [vmem:[#allocation2 + $0x218] ss:$20 sps:$4 sm:$0xff]   ;;  %v6651_v50 = vld [vmem:[#allocation2 + $0x290] ss:$20 sps:$4 sm:$0xff]   ;;  %v6652_v21 = vld [vmem:[#allocation2 + $0x308] ss:$20 sps:$4 sm:$0xff]  }
 0x1b7   :  { %v6641_v2 = vld [vmem:[#allocation2 + $0x370] ss:$20 sps:$4 sm:$0xff]   ;;  %v6654_v5 = vld [vmem:[#allocation7 + $0x78] sm:$0xff]   ;;  %v6658_v55 = vld [vmem:[#allocation7 + $0x68] sm:$0xff]  }
 0x1b8   :  { %v6630_v7 = vld [vmem:[#allocation2 + $0x304] ss:$20 sps:$4 sm:$0xff]   ;;  %v2516_v63 = vld [vmem:[#allocation2 + $0x390] sm:$0x8]  ;;  %6016 = vmatprep.subr.bf16.mxu1 %v6654_v5  ;;  %v6659_v24 = vld [vmem:[#allocation7 + $0x28] sm:$0xff]  }
 0x1b9   :  { %v2517_v38 = vsel %vm7636_vm14, 0, %v2516_v63  ;;  %3571 = vmatprep.mubr.bf16.mxu1 %v6630_v7  ;;  %v6655_v18 = vld [vmem:[#allocation7 + $0x38] sm:$0xff]   ;;  %v6657_v11 = vld [vmem:[#allocation7 + $0x30] sm:$0xff]   ;;  %v6662_v43 = vld [vmem:[#allocation7 + $0x60] sm:$0xff]  }
 0x1ba   :  { %v2301_v45 = vld [vmem:[#allocation2 + $0x374] sm:$0x1]  ;;  %v6628_v61 = vld [vmem:[#allocation2 + $0x2fc] ss:$20 sps:$4 sm:$0xff]   ;;  %2518 = vst [vmem:[#allocation2 + $0x390] sm:$0x8] %v2517_v38  ;;  %3572 = vmatmul.mubr.bf16.gmra.mxu1 %v6633_v6  ;;  %vm8265_vm14 = vmand %vm1959_vm7, %vm3985_vm11 }
 0x1bb   :  { %v2302_v59 = vsel %vm7630_vm13, 0, %v2301_v45  ;;  %3458 = vmatprep.mubr.bf16.mxu0 %v6628_v61  ;;  %6017 = vmatpush3.bf16.msra.mxu1 %v6655_v18  ;;  %v6653_v49 = vld [vmem:[#allocation2 + $0x380] ss:$20 sps:$4 sm:$0xff]   ;;  %v6660_v29 = vld [vmem:[#allocation7 + $0xf8] sm:$0xff]   ;;  %v6666_v13 = vld [vmem:[#allocation7 + $0xe8] sm:$0xff]  }
 0x1bc   :  { %2303 = vst [vmem:[#allocation2 + $0x374] sm:$0x1] %v2302_v59  ;;  %3459 = vmatmul.mubr.bf16.gmra.mxu0 %v6632_v52  ;;  %6018 = vmatprep.subr.bf16.mxu1 %v6656_v9  ;;  %v6661_v17 = vld [vmem:[#allocation7 + $0xb8] sm:$0xff]   ;;  %v6663_v26 = vld [vmem:[#allocation7 + $0xf0] sm:$0xff]   ;;  %v6664_v56 = vld [vmem:[#allocation7 + $0x20] sm:$0xff]  }
 0x1bd   :  { %6080 = vmatprep.subr.bf16.mxu0 %v6660_v29  ;;  %v6665_v30 = vld [vmem:[#allocation7 + $0xb0] sm:$0xff]   ;;  %v6667_v62 = vld [vmem:[#allocation7 + $0xa8] sm:$0xff]   ;;  %v6669_v35 = vld [vmem:[#allocation7 + $0xe0] sm:$0xff]  }
 0x1be   :  { %v6671_v60 = vld [vmem:[#allocation7 + $0xa0] sm:$0xff]   ;;  %v6668_v16 = vld [vmem:[#allocation7 + $0x58] sm:$0xff]   ;;  %v6675_v58 = vld [vmem:[#allocation7 + $0xd0] sm:$0xff]  }
 0x1bf   :  { %6019 = vmatpush3.bf16.msra.mxu1 %v6657_v11  ;;  %v6670_v32 = vld [vmem:[#allocation7 + $0x18] sm:$0xff]   ;;  %v6677_v51 = vld [vmem:[#allocation7 + $0x90] sm:$0xff]   ;;  %v6678_v15 = vld [vmem:[#allocation7 + $0xc8] sm:$0xff]  }
 0x1c0   :  { %6020 = vmatprep.subr.bf16.mxu1 %v6658_v55  ;;  %v6672_v0 = vld [vmem:[#allocation7 + $0xd8] sm:$0xff]   ;;  %v6674_v57 = vld [vmem:[#allocation7 + $0x50] sm:$0xff]   ;;  %v6679_v20 = vld [vmem:[#allocation7 + $0x88] sm:$0xff]  }
 0x1c1   :  { %v6639_v40 = vld [vmem:[#allocation2 + $0x37c] ss:$20 sps:$4 sm:$0xff]   ;;  %v6681_v41 = vld [vmem:[#allocation7 + $0xc0] sm:$0xff]   ;;  %v6680_v46 = vld [vmem:[#allocation7 + $0x48] sm:$0xff]  }
 0x1c2   :  { %3581 = vmatprep.mubr.bf16.mxu1 %v6639_v40  ;;  %v6673_v12 = vld [vmem:[#allocation7 + $0x98] sm:$0xff]   ;;  %v6676_v53 = vld [vmem:[#allocation7 + $0x10] sm:$0xff]   ;;  %v6683_v54 = vld [vmem:[#allocation7 + $0x80] sm:$0xff]  }
 0x1c3   :  { %v6637_v47 = vld [vmem:[#allocation2 + $0x374] ss:$20 sps:$4 sm:$0xff]   ;;  %3582 = vmatmul.mubr.bf16.gmra.mxu1 %v6642_v4  ;;  %v6684_v61 = vld [vmem:[#allocation7 + $0x40] sm:$0xff]   ;;  %vm8280_vm3 = vmand %vm3977_vm9, %vm4200_vm12 }
 0x1c4   :  { %3468 = vmatprep.mubr.bf16.mxu0 %v6637_v47  ;;  %6021 = vmatpush3.bf16.msra.mxu1 %v6659_v24  ;;  %v6682_v19 = vld [vmem:[#allocation7 + $0x8] sm:$0xff]   ;;  %v6685_v59 = vld [vmem:[#allocation7] sm:$0xff]   ;;  %vm8292_vm11 = vmor %vm8265_vm14, %vm7630_vm13 }
 0x1c5   :  { %3469 = vmatmul.mubr.bf16.gmra.mxu0 %v6641_v2  ;;  %6022 = vmatprep.subr.bf16.mxu1 %v6662_v43  ;;  %vm8309_vm13 = vmor %vm8280_vm3, %vm7647_vm15  ;;  %vm6796_vm15 = vmmov 0  }
 0x1c6   :  { %3624 = vmatprep.mubr.bf16.mxu0 %v8974_v1 }
 0x1c8   :  { %6023 = vmatpush3.bf16.msra.mxu1 %v6664_v56 }
 0x1c9   :  { %6024 = vmatprep.subr.bf16.mxu1 %v6668_v16 }
 0x1cc   :  { %6025 = vmatpush3.bf16.msra.mxu1 %v6670_v32 }
 0x1cd   :  { %3625 = vmatmul.mubr.bf16.vlgmr.msra.gmra.mxu0 %v6646_v8  ;;  %6026 = vmatprep.subr.bf16.mxu1 %v6674_v57 }
 0x1ce   :  { %3634 = vmatprep.mubr.bf16.mxu0 %v8974_v1  ;;  %6081 = vmatpush3.bf16.msra.mxu0 %v6661_v17 }
 0x1cf   :  { %6082 = vmatprep.subr.bf16.mxu0 %v6663_v26 }
 0x1d0   :  { %6027 = vmatpush3.bf16.msra.mxu1 %v6676_v53 }
 0x1d1   :  { %6028 = vmatprep.subr.bf16.mxu1 %v6680_v46 }
 0x1d2   :  { %6083 = vmatpush3.bf16.msra.mxu0 %v6665_v30 }
 0x1d3   :  { %6084 = vmatprep.subr.bf16.mxu0 %v6666_v13 }
 0x1d4   :  { %6029 = vmatpush3.bf16.msra.mxu1 %v6682_v19 }
 0x1d5   :  { %3635 = vmatmul.mubr.bf16.gmra.mxu0 %v6647_v31  ;;  %6030 = vmatprep.subr.bf16.mxu1 %v6684_v61  ;;  %v6686_v31 = vld [vmem:[#allocation7 + $0x178] sm:$0xff]  }
 0x1d6   :  { %3644 = vmatprep.mubr.bf16.mxu0 %v8974_v1  ;;  %6085 = vmatpush3.bf16.msra.mxu0 %v6667_v62 }
 0x1d7   :  { %6086 = vmatprep.subr.bf16.mxu0 %v6669_v35 }
 0x1d8   :  { %6031 = vmatpush3.bf16.msra.mxu1 %v6685_v59 }
 0x1d9   :  { %6144 = vmatprep.subr.bf16.mxu1 %v6686_v31 }
 0x1da   :  { %6087 = vmatpush3.bf16.msra.mxu0 %v6671_v60 }
 0x1db   :  { %6088 = vmatprep.subr.bf16.mxu0 %v6672_v0 }
 0x1dd   :  { %3645 = vmatmul.mubr.bf16.gmra.mxu0 %v6648_v48 }
 0x1de   :  { %3654 = vmatprep.mubr.bf16.mxu0 %v8974_v1  ;;  %6089 = vmatpush3.bf16.msra.mxu0 %v6673_v12  ;;  %v2748_v12 = vlaneseq }
 0x1df   :  { %6090 = vmatprep.subr.bf16.mxu0 %v6675_v58 }
 0x1e0   :  { %v2749_v57 = vshrl.u32 %v2748_v12, 7 }
 0x1e2   :  { %6091 = vmatpush3.bf16.msra.mxu0 %v6677_v51 }
 0x1e3   :  { %6092 = vmatprep.subr.bf16.mxu0 %v6678_v15 }
 0x1e5   :  { %3655 = vmatmul.mubr.bf16.gmra.mxu0 %v6649_v39 }
 0x1e6   :  { %3664 = vmatprep.mubr.bf16.mxu0 %v8974_v1  ;;  %6093 = vmatpush3.bf16.msra.mxu0 %v6679_v20  ;;  %v2750_v20 = vsub.s32 0, %v2749_v57 }
 0x1e7   :  { %6094 = vmatprep.subr.bf16.mxu0 %v6681_v41  ;;  %v2754_v41 = vsub.s32 1, %v2749_v57 }
 0x1ea   :  { %6095 = vmatpush3.bf16.msra.mxu0 %v6683_v54  ;;  %v2746_v54 = vld [vmem:[%s8919_s4] sm:$0x3] }
 0x1eb   :  { %v8066_v59 = vrot.slane %v2746_v54, %v2750_v20  ;;  %v8068_v31 = vrot.slane %v2746_v54, %v2754_v41 }
 0x1ed   :  { %3665 = vmatmul.mubr.bf16.gmra.mxu0 %v6650_v44 }
 0x1ee   :  { %3674 = vmatprep.mubr.bf16.mxu0 %v8974_v1 }
 0x1f5   :  { %3675 = vmatmul.mubr.bf16.gmra.mxu0 %v6651_v50 }
 0x1f6   :  { %3684 = vmatprep.mubr.bf16.mxu0 %v8974_v1 }
 0x1fd   :  { %3685 = vmatmul.mubr.bf16.gmra.mxu0 %v6652_v21 }
 0x1fe   :  { %3694 = vmatprep.mubr.bf16.mxu0 %v8974_v1 }
 0x205   :  { %3695 = vmatmul.mubr.bf16.gmra.mxu0 %v6653_v49 }
 0x22b   :  { %v7985_v42 = vpop.f32.mrf.mxu0 }
 0x22c   :  { %v3401_v57 = vadd.f32 %v7985_v42, %v8066_v59 }
 0x22d   :  { %v7989_v33 = vpop.f32.mrf.mxu0 }
 0x22e   :  { %v7987_v36 = vpop.f32.mrf.mxu1  ;;  %v3403_v37 = vadd.f32 %v7989_v33, %v8068_v31 }
 0x22f   :  { %v7993_v28 = vpop.f32.mrf.mxu0 }
 0x230   :  { %v7991_v14 = vpop.f32.mrf.mxu1  ;;  %v3405_v22 = vadd.f32 %v7993_v28, %v8066_v59 }
 0x231   :  { %v7997_v25 = vpop.f32.mrf.mxu0  ;;  %v3516_v28 = vadd.f32 %v7991_v14, %v3403_v37 }
 0x232   :  { %v7995_v10 = vpop.f32.mrf.mxu1  ;;  %v3407_v20 = vadd.f32 %v7997_v25, %v8068_v31 }
 0x234   :  { %v7999_v7 = vpop.f32.mrf.mxu1 }
 0x237   :  { %v8001_v63 = vpop.f32.mrf.mxu0  ;;  %v8003_v6 = vpop.f32.mrf.mxu1 }
 0x238   :  { %v3411_v41 = vadd.f32 %v8001_v63, %v8066_v59 }
 0x239   :  { %v8005_v38 = vpop.f32.mrf.mxu0  ;;  %v8007_v45 = vpop.f32.mrf.mxu1 }
 0x23a   :  { %v3413_v54 = vadd.f32 %v8005_v38, %v8068_v31 }
 0x23b   :  { %v3414_v52 = vpop.f32.mrf.mxu0  ;;  %v8009_v40 = vpop.f32.mrf.mxu1 }
 0x23c   :  { %v3415_v42 = vadd.f32 %v3414_v52, %v8066_v59  ;;  %v8106_v52 = vadd.f32 %v8003_v6, %v3411_v41 }
 0x23d   :  { %v8011_v47 = vpop.f32.mrf.mxu1  ;;  %v3416_v4 = vpop.f32.mrf.mxu0 }
 0x23e   :  { %v3417_v33 = vadd.f32 %v3416_v4, %v8068_v31  ;;  %v8113_v14 = vadd.f32 %v8009_v40, %v3415_v42 }
 0x241   :  { %v8013_v2 = vpop.f32.mrf.mxu1 }
 0x243   :  { %v8015_v1 = vpop.f32.mrf.mxu1 }
 0x245   :  { %v8017_v39 = vpop.f32.mrf.mxu1 }
 0x247   :  { %v3420_v8 = vpop.f32.mrf.mxu0  ;;  %v8019_v5 = vpop.f32.mrf.mxu1 }
 0x248   :  { %v3421_v25 = vadd.f32 %v3420_v8, %v8066_v59 }
 0x249   :  { %v3422_v48 = vpop.f32.mrf.mxu0 }
 0x24a   :  { %v3423_v63 = vadd.f32 %v3422_v48, %v8068_v31  ;;  %v8125_v40 = vadd.f32 %v8013_v2, %v3421_v25 }
 0x24b   :  { %v3424_v44 = vpop.f32.mrf.mxu0 }
 0x24d   :  { %v3426_v18 = vpop.f32.mrf.mxu0 }
 0x24e   :  { %v3427_v37 = vadd.f32 %v3426_v18, %v8068_v31 }
 0x253   :  { %v8021_v50 = vpop.f32.mrf.mxu1 }
 0x255   :  { %v8023_v9 = vpop.f32.mrf.mxu1 }
 0x256   :  { %v3430_v11 = vpop.f32.mrf.mxu0 }
 0x257   :  { %v8025_v21 = vpop.f32.mrf.mxu1 }
 0x258   :  { %v3432_v49 = vpop.f32.mrf.mxu0 }
 0x259   :  { %v8027_v24 = vpop.f32.mrf.mxu1  ;;  %v3433_v4 = vadd.f32 %v3432_v49, %v8068_v31 }
 0x25a   :  { %v3434_v55 = vpop.f32.mrf.mxu0 }
 0x25b   :  { %v3435_v6 = vadd.f32 %v3434_v55, %v8066_v59  ;;  %v8136_v55 = vadd.f32 %v8019_v5, %v3427_v37 }
 0x25c   :  { %v3436_v29 = vpop.f32.mrf.mxu0 }
 0x25d   :  { %v8029_v17 = vpop.f32.mrf.mxu1 }
 0x25f   :  { %v8031_v43 = vpop.f32.mrf.mxu1 }
 0x261   :  { %v8033_v56 = vpop.f32.mrf.mxu1 }
 0x262   :  { %v3440_v26 = vpop.f32.mrf.mxu0 }
 0x263   :  { %v8037_v62 = vpop.f32.mrf.mxu1  ;;  %v3441_v8 = vadd.f32 %v3440_v26, %v8066_v59 }
 0x264   :  { %v3442_v30 = vpop.f32.mrf.mxu0 }
 0x265   :  { %v3443_v48 = vadd.f32 %v3442_v30, %v8068_v31  ;;  %v8148_v30 = vadd.f32 %v8023_v9, %v3433_v4 }
 0x266   :  { %v8035_v13 = vpop.f32.mrf.mxu0 }
 0x268   :  { %v8039_v35 = vpop.f32.mrf.mxu0 }
 0x26b   :  { %v8041_v60 = vpop.f32.mrf.mxu0 }
 0x26c   :  { %v3451_v2 = vadd.f32 %v8041_v60, %v8066_v59 }
 0x26d   :  { %v8043_v16 = vpop.f32.mrf.mxu1  ;;  %v8045_v32 = vpop.f32.mrf.mxu0 }
 0x26f   :  { %v8047_v0 = vpop.f32.mrf.mxu1  ;;  %v8049_v58 = vpop.f32.mrf.mxu0 }
 0x270   :  { %v3455_v5 = vadd.f32 %v8049_v58, %v8066_v59 }
 0x271   :  { %v8051_v51 = vpop.f32.mrf.mxu1  ;;  %v8053_v53 = vpop.f32.mrf.mxu0 }
 0x272   :  { %v3457_v58 = vadd.f32 %v8053_v53, %v8068_v31  ;;  %v8187_v53 = vadd.f32 %v8051_v51, %v3455_v5 }
 0x273   :  { %v8055_v15 = vpop.f32.mrf.mxu1 }
 0x274   :  { %8975 = vst [vmem:[#allocation19_spill] sm:$0xff] %v8055_v15  ;;  %v3425_v15 = vadd.f32 %v3424_v44, %v8066_v59 }
 0x276   :  { %v8131_v18 = vadd.f32 %v8017_v39, %v3425_v15 }
 0x27a   :  { %v8062_v19 = vpop.f32.mrf.mxu1 }
 0x27b   :  { %8976 = vst [vmem:[#allocation20_spill] sm:$0xff] %v8062_v19  ;;  %v3518_v19 = vadd.f32 %v7995_v10, %v3405_v22  ;;  %v8116_v10 = vadd.f32 %v8011_v47, %v3417_v33  ;;  %v8128_v47 = vadd.f32 %v8015_v1, %v3423_v63  ;;  %v3453_v1 = vadd.f32 %v8045_v32, %v8068_v31  ;;  %v8981_v51 = vld [vmem:[#allocation19_spill] sm:$0xff] }
 0x27c   :  { %v8060_v46 = vpop.f32.mrf.mxu0  ;;  %v8070_v12 = vpop.f32.mrf.mxu1  ;;  %v8161_v32 = vadd.f32 %v8029_v17, %v3441_v8 }
 0x27d   :  { %8977 = vst [vmem:[#allocation21_spill] sm:$0xff] %v8070_v12  ;;  %v3514_v12 = vadd.f32 %v7987_v36, %v3401_v57  ;;  %v8109_v36 = vadd.f32 %v8007_v45, %v3413_v54  ;;  %v3437_v45 = vadd.f32 %v3436_v29, %v8068_v31  ;;  %v3447_v29 = vadd.f32 %v8039_v35, %v8068_v31 }
 0x27e   :  { %v8064_v61 = vpop.f32.mrf.mxu0  ;;  %v8082_v34 = vpop.f32.mrf.mxu1  ;;  %v8155_v35 = vadd.f32 %v8025_v21, %v3435_v6  ;;  %v3461_v21 = vadd.f32 %v8060_v46, %v8066_v59  ;;  %v8182_v57 = vadd.f32 %v8047_v0, %v3453_v1 }
 0x27f   :  { %8978 = vst [vmem:[#allocation22_spill] sm:$0xff] %v8082_v34  ;;  %v8158_v60 = vadd.f32 %v8027_v24, %v3437_v45  ;;  %v8176_v17 = vadd.f32 %v8037_v62, %v3447_v29 }
 0x280   :  { %v8072_v3 = vpop.f32.mrf.mxu0  ;;  %v8100_v38 = vpop.f32.mrf.mxu1 }
 0x282   :  { %v8074_v27 = vpop.f32.mrf.mxu0  ;;  %v8982_v25 = vld [vmem:[#allocation20_spill] sm:$0xff] }
 0x283   :  { %v3583_v49 = vpop.f32.mrf.mxu1  ;;  %v3467_v0 = vadd.f32 %v8074_v27, %v8068_v31  ;;  %v8202_v63 = vadd.f32 %v8982_v25, %v3461_v21 }
 0x285   :  { %v8090_v23 = vpop.f32.mrf.mxu0 }
 0x286   :  { %8979 = vst [vmem:[#allocation23_spill] sm:$0xff] %v8090_v23  ;;  %v8103_v23 = vadd.f32 %v7999_v7, %v3407_v20  ;;  %v3431_v7 = vadd.f32 %v3430_v11, %v8066_v59  ;;  %v3445_v11 = vadd.f32 %v8035_v13, %v8066_v59  ;;  %v8988_v1 = vld [vmem:[#allocation22_spill] sm:$0xff] }
 0x287   :  { %v3472_v34 = vpop.f32.mrf.mxu0 }
 0x288   :  { %v8145_v39 = vadd.f32 %v8021_v50, %v3431_v7  ;;  %v8164_v50 = vadd.f32 %v8031_v43, %v3443_v48  ;;  %v8167_v9 = vadd.f32 %v8033_v56, %v3445_v11  ;;  %v8179_v43 = vadd.f32 %v8043_v16, %v3451_v2 }
 0x289   :  { %v3474_v22 = vpop.f32.mrf.mxu0  ;;  %v3463_v56 = vadd.f32 %v8064_v61, %v8068_v31  ;;  %v3465_v16 = vadd.f32 %v8072_v3, %v8066_v59  ;;  %v3473_v61 = vadd.f32 %v3472_v34, %v8068_v31  ;;  %v8985_v34 = vld [vmem:[#allocation21_spill] sm:$0xff] }
 0x28a   :  { %v3475_v4 = vadd.f32 %v3474_v22, %v8066_v59 }
 0x28b   :  { %v3476_v44 = vpop.f32.mrf.mxu0  ;;  %v8214_v7 = vadd.f32 %v8985_v34, %v3463_v56 }
 0x28c   :  { %v3477_v6 = vadd.f32 %v3476_v44, %v8068_v31 }
 0x28d   :  { %v3626_v26 = vpop.f32.mrf.mxu0  ;;  %v8980_v54 = vld [vmem:[#allocation23_spill] sm:$0xff] }
 0x28e   :  { %v8152_v13 = vadd.f32 %v3626_v26, %v3514_v12  ;;  %v3585_v12 = vpop.f32.mrf.mxu1  ;;  %v3471_v42 = vadd.f32 %v8980_v54, %v8066_v59  ;;  %v8228_v26 = vadd.f32 %v8988_v1, %v3465_v16  ;;  %v8231_v59 = vadd.f32 %v8100_v38, %v3467_v0  ;;  %v3981_v16 = vld [vmem:[#allocation3 + $0x438] sm:$0xff] }
 0x28f   :  { %v3628_v15 = vpop.f32.mrf.mxu0  ;;  %v8235_v22 = vadd.f32 %v3585_v12, %v3473_v61 }
 0x290   :  { %v8173_v24 = vadd.f32 %v3628_v15, %v3516_v28  ;;  %v3705_v46 = vmax.f32 %v8152_v13, 0.0  ;;  %v8199_v28 = vadd.f32 %v8981_v51, %v3457_v58  ;;  %v3587_v37 = vpop.f32.mrf.mxu1  ;;  %v8233_v31 = vadd.f32 %v3583_v49, %v3471_v42 }
 0x291   :  { %v3630_v20 = vpop.f32.mrf.mxu0 }
 0x292   :  { %v3706_v41 = vmax.f32 %v8173_v24, 0.0  ;;  %v3631_v62 = vadd.f32 %v3630_v20, %v3518_v19  ;;  %v3589_v15 = vpop.f32.mrf.mxu1  ;;  %v8245_v20 = vadd.f32 %v3587_v37, %v3475_v4 }
 0x293   :  { %v3632_v33 = vpop.f32.mrf.mxu0  ;;  %v8247_v49 = vadd.f32 %v3589_v15, %v3477_v6 }
 0x294   :  { %v5864_v19 = vpack.c.bf16 %v3706_v41, %v3705_v46  ;;  %v3633_v3 = vadd.f32 %v3632_v33, %v8103_v23  ;;  %v3707_v45 = vmax.f32 %v3631_v62, 0.0 }
 0x295   :  { %v3636_v8 = vpop.f32.mrf.mxu0 }
 0x296   :  { %v3818_v48 = vshrl.u32 %v5864_v19, 16  ;;  %v3821_v11 = vshll.u32 %v5864_v19, 16  ;;  %v3708_v2 = vmax.f32 %v3633_v3, 0.0  ;;  %v8225_v23 = vadd.f32 %v3636_v8, %v8106_v52  ;;  %v4196_v52 = vld [vmem:[#allocation3 + $0x268] sm:$0x88] }
 0x297   :  { %v3638_v13 = vpop.f32.mrf.mxu0 }
 0x298   :  { %v3820_v58 = vrot.slane %v3818_v48, 7  ;;  %v4096_v21 = vrot.slane %v3821_v11, 5  ;;  %v4097_v56 = vrot.slane %v3818_v48, 4  ;;  %v5865_v38 = vpack.c.bf16 %v3708_v2, %v3707_v45 }
 0x299   :  { %v3709_v0 = vmax.f32 %v8225_v23, 0.0  ;;  %v8259_v54 = vadd.f32 %v3638_v13, %v8109_v36  ;;  %v3640_v42 = vpop.f32.mrf.mxu0  ;;  %v6706_v48 = vpack.c.bf16 %v3707_v45, %v3705_v46  ;;  %v3988_v46 = vld [vmem:[#allocation3 + $0xe0] sm:$0x11] }
 0x29a   :  { %v3823_v61 = vor.u32 %v3821_v11, %v3820_v58  ;;  %v3824_v33 = vrot.slane %v3820_v58, 4  ;;  %v4098_v51 = vor.u32 %v4097_v56, %v4096_v21  ;;  %v4197_v25 = vsel %vm8241_vm6, %v4096_v21, %v4196_v52 }
 0x29b   :  { %4198 = vst [vmem:[#allocation3 + $0x268] sm:$0x88] %v4197_v25  ;;  %v3826_v19 = vshrl.u32 %v5865_v38, 16  ;;  %v3829_v27 = vshll.u32 %v5865_v38, 16  ;;  %v3710_v3 = vmax.f32 %v8259_v54, 0.0  ;;  %v8271_v36 = vadd.f32 %v3640_v42, %v8113_v14  ;;  %v3642_v34 = vpop.f32.mrf.mxu0 }
 0x29c   :  { %v3982_v4 = vsel %vm8253_vm10, %v3823_v61, %v3981_v16  ;;  %v4099_v6 = vrot.slane %v4098_v51, 4  ;;  %v8276_v8 = vadd.f32 %v3642_v34, %v8116_v10  ;;  %v6707_v21 = vpack.c.bf16 %v3708_v2, %v3706_v41 }
 0x29d   :  { %3983 = vst [vmem:[#allocation3 + $0x438] sm:$0xff] %v3982_v4  ;;  %v3828_v29 = vrot.slane %v3826_v19, 7  ;;  %v4100_v1 = vrot.slane %v3829_v27, 5  ;;  %v4102_v14 = vrot.slane %v3826_v19, 4  ;;  %v5866_v44 = vpack.c.bf16 %v3710_v3, %v3709_v0  ;;  %v3646_v52 = vpop.f32.mrf.mxu0 }
 0x29e   :  { %v3711_v45 = vmax.f32 %v8271_v36, 0.0  ;;  %v3712_v15 = vmax.f32 %v8276_v8, 0.0  ;;  %v8299_v58 = vadd.f32 %v3646_v52, %v8125_v40  ;;  %v4203_v40 = vld [vmem:[#allocation3 + $0x170] sm:$0xff]  ;;  %5087 = vmatprep.mubr.bf16.mxu0 %v6707_v21 }
 0x29f   :  { %v3831_v56 = vor.u32 %v3829_v27, %v3828_v29  ;;  %v3833_v38 = vrot.slane %v3828_v29, 4  ;;  %v4101_v16 = vsel %vm7683_vm8, %v4099_v6, %v4100_v1  ;;  %v4103_v42 = vor.u32 %v4102_v14, %v4100_v1  ;;  %v3648_v61 = vpop.f32.mrf.mxu0  ;;  %v4206_v6 = vld [vmem:[#allocation3 + $0x300] sm:$0x88]  ;;  %5088 = vmatmul.mubr.bf16.vlgmr.msra.gmra.mxu0 %v6706_v48 }
 0x2a0   :  { %4199 = vst [vmem:[#allocation3 + $0x430] sm:$0xff] %v4101_v16  ;;  %v3835_v37 = vshrl.u32 %v5866_v44, 16  ;;  %v3838_v24 = vshll.u32 %v5866_v44, 16  ;;  %v5867_v41 = vpack.c.bf16 %v3712_v15, %v3711_v45  ;;  %v3713_v2 = vmax.f32 %v8299_v58, 0.0 }
 0x2a1   :  { %v8320_v27 = vsel %vm7659_vm5, %v3824_v33, %v3831_v56  ;;  %v3989_v34 = vsel %vm8292_vm11, %v3833_v38, %v3988_v46  ;;  %v4104_v4 = vrot.slane %v4103_v42, 4  ;;  %v8325_v11 = vadd.f32 %v3648_v61, %v8128_v47  ;;  %v3650_v29 = vpop.f32.mrf.mxu0  ;;  %v3991_v33 = vld [vmem:[#allocation3 + $0xc0] sm:$0xff] }
 0x2a2   :  { %3990 = vst [vmem:[#allocation3 + $0xe0] sm:$0x11] %v3989_v34  ;;  %v3837_v1 = vrot.slane %v3835_v37, 7  ;;  %v4105_v14 = vrot.slane %v3838_v24, 5  ;;  %v4106_v44 = vrot.slane %v3835_v37, 4  ;;  %v3843_v52 = vshrl.u32 %v5867_v41, 16 }
 0x2a3   :  { %v4204_v13 = vsel %vm8309_vm13, %v4104_v4, %v4203_v40  ;;  %v3846_v21 = vshll.u32 %v5867_v41, 16  ;;  %v8935_v56 = vmax.f32 %v8325_v11, 0.0  ;;  %v8331_v46 = vadd.f32 %v3650_v29, %v8131_v18  ;;  %v3652_v38 = vpop.f32.mrf.mxu0  ;;  %v3995_v29 = vld [vmem:[#allocation3 + $0xe8] sm:$0x11] }
 0x2a4   :  { %v4040_v47 = vld [vmem:[#allocation3 + $0x438] sm:$0x11]  ;;  %4205 = vst [vmem:[#allocation3 + $0x170] sm:$0xff] %v4204_v13  ;;  %v3840_v16 = vor.u32 %v3838_v24, %v3837_v1  ;;  %v3841_v48 = vrot.slane %v3837_v1, 4  ;;  %v4107_v42 = vor.u32 %v4106_v44, %v4105_v14  ;;  %v4207_v61 = vsel %vm8241_vm6, %v4105_v14, %v4206_v6 }
 0x2a5   :  { %v4041_v51 = vsel %vm8292_vm11, 0, %v4040_v47  ;;  %4208 = vst [vmem:[#allocation3 + $0x300] sm:$0x88] %v4207_v61  ;;  %v3845_v40 = vrot.slane %v3843_v52, 7  ;;  %v4109_v37 = vrot.slane %v3846_v21, 5  ;;  %v4111_v41 = vrot.slane %v3843_v52, 4  ;;  %v3656_v34 = vpop.f32.mrf.mxu0 }
 0x2a6   :  { %4042 = vst [vmem:[#allocation3 + $0x438] sm:$0x11] %v4041_v51  ;;  %v3992_v18 = vsel %vm8253_vm10, %v3840_v16, %v3991_v33  ;;  %v4108_v4 = vrot.slane %v4107_v42, 4  ;;  %v5868_v24 = vpack.c.bf16 %v8935_v56, %v3713_v2  ;;  %v8937_v6 = vmax.f32 %v8331_v46, 0.0  ;;  %v4210_v47 = vld [vmem:[#allocation3 + $0x390] sm:$0xff] }
 0x2a7   :  { %3993 = vst [vmem:[#allocation3 + $0xc0] sm:$0xff] %v3992_v18  ;;  %v3848_v1 = vor.u32 %v3846_v21, %v3845_v40  ;;  %v3850_v14 = vrot.slane %v3845_v40, 4  ;;  %v4112_v44 = vor.u32 %v4111_v41, %v4109_v37  ;;  %v8345_v52 = vadd.f32 %v3652_v38, %v8136_v55  ;;  %v3658_v13 = vpop.f32.mrf.mxu0 }
 0x2a8   :  { %v4110_v33 = vsel %vm7683_vm8, %v4108_v4, %v4109_v37  ;;  %v3852_v16 = vshrl.u32 %v5868_v24, 16  ;;  %v3855_v42 = vshll.u32 %v5868_v24, 16  ;;  %v8350_v61 = vadd.f32 %v3656_v34, %v8145_v39  ;;  %v4213_v4 = vld [vmem:[#allocation3 + $0x3a0] sm:$0x88]  ;;  %v3998_v24 = vld [vmem:[#allocation3 + $0x428] sm:$0xff] }
 0x2a9   :  { %v8354_v51 = vsel %vm7659_vm5, %v3841_v48, %v3848_v1  ;;  %v3996_v21 = vsel %vm8292_vm11, %v3850_v14, %v3995_v29  ;;  %v4113_v40 = vrot.slane %v4112_v44, 4  ;;  %4209 = vst [vmem:[#allocation3 + $0x2a0] sm:$0xff] %v4110_v33  ;;  %v8936_v55 = vmax.f32 %v8345_v52, 0.0  ;;  %v3660_v38 = vpop.f32.mrf.mxu0 }
 0x2aa   :  { %3997 = vst [vmem:[#allocation3 + $0xe8] sm:$0x11] %v3996_v21  ;;  %v3854_v37 = vrot.slane %v3852_v16, 7  ;;  %v4114_v41 = vrot.slane %v3855_v42, 5  ;;  %v4115_v18 = vrot.slane %v3852_v16, 4  ;;  %v3717_v39 = vmax.f32 %v8350_v61, 0.0 }
 0x2ab   :  { %v4255_v34 = vld [vmem:[#allocation3 + $0x170] sm:$0x88]  ;;  %v4211_v48 = vsel %vm8309_vm13, %v4113_v40, %v4210_v47  ;;  %v5869_v29 = vpack.c.bf16 %v8936_v55, %v8937_v6  ;;  %v8367_v1 = vadd.f32 %v3658_v13, %v8148_v30  ;;  %v8370_v14 = vadd.f32 %v3660_v38, %v8155_v35  ;;  %v3662_v44 = vpop.f32.mrf.mxu0 }
 0x2ac   :  { %v4256_v33 = vsel %vm8241_vm6, 0, %v4255_v34  ;;  %4212 = vst [vmem:[#allocation3 + $0x390] sm:$0xff] %v4211_v48  ;;  %v3857_v16 = vor.u32 %v3855_v42, %v3854_v37  ;;  %v3858_v21 = vrot.slane %v3854_v37, 4  ;;  %v4116_v47 = vor.u32 %v4115_v18, %v4114_v41 }
 0x2ad   :  { %4257 = vst [vmem:[#allocation3 + $0x170] sm:$0x88] %v4256_v33  ;;  %v4214_v40 = vsel %vm8241_vm6, %v4114_v41, %v4213_v4  ;;  %v3860_v56 = vshrl.u32 %v5869_v29, 16  ;;  %v3863_v55 = vshll.u32 %v5869_v29, 16  ;;  %v8938_v30 = vmax.f32 %v8367_v1, 0.0  ;;  %v3666_v13 = vpop.f32.mrf.mxu0 }
 0x2ae   :  { %v4043_v6 = vld [vmem:[#allocation3 + $0xc0] sm:$0x11]  ;;  %v3999_v35 = vsel %vm8253_vm10, %v3857_v16, %v3998_v24  ;;  %v4117_v38 = vrot.slane %v4116_v47, 4  ;;  %4215 = vst [vmem:[#allocation3 + $0x3a0] sm:$0x88] %v4214_v40  ;;  %v3719_v34 = vmax.f32 %v8370_v14, 0.0  ;;  %v8381_v42 = vadd.f32 %v3662_v44, %v8158_v60 }
 0x2af   :  { %v4044_v37 = vsel %vm8292_vm11, 0, %v4043_v6  ;;  %4000 = vst [vmem:[#allocation3 + $0x428] sm:$0xff] %v3999_v35  ;;  %v3862_v41 = vrot.slane %v3860_v56, 7  ;;  %v4118_v18 = vrot.slane %v3863_v55, 5  ;;  %v4120_v4 = vrot.slane %v3860_v56, 4  ;;  %v3668_v48 = vpop.f32.mrf.mxu0  ;;  %v4217_v35 = vld [vmem:[#allocation3 + $0x450] sm:$0xff] }
 0x2b0   :  { %4045 = vst [vmem:[#allocation3 + $0xc0] sm:$0x11] %v4044_v37  ;;  %v4002_v29 = vld [vmem:[#allocation3 + $0x178] sm:$0x11]  ;;  %v5870_v24 = vpack.c.bf16 %v8938_v30, %v3717_v39  ;;  %v8939_v33 = vmax.f32 %v8381_v42, 0.0  ;;  %v6708_v60 = vpack.c.bf16 %v3711_v45, %v3709_v0  ;;  %v6709_v56 = vpack.c.bf16 %v3712_v15, %v3710_v3 }
 0x2b1   :  { %v3865_v6 = vor.u32 %v3863_v55, %v3862_v41  ;;  %v3867_v44 = vrot.slane %v3862_v41, 4  ;;  %v8400_v16 = vsel %vm7683_vm8, %v4117_v38, %v4118_v18  ;;  %v4121_v47 = vor.u32 %v4120_v4, %v4118_v18  ;;  %v3670_v40 = vpop.f32.mrf.mxu0  ;;  %v4220_v45 = vld [vmem:[#allocation3 + $0x330] sm:$0x88]  ;;  %v4005_v18 = vld [vmem:[#allocation3 + $0x308] sm:$0xff] }
 0x2b2   :  { %v3869_v37 = vshrl.u32 %v5870_v24, 16  ;;  %v3872_v30 = vshll.u32 %v5870_v24, 16  ;;  %v5871_v23 = vpack.c.bf16 %v8939_v33, %v3719_v34  ;;  %5095 = vmatprep.mubr.bf16.mxu0 %v6709_v56  ;;  %v8407_v0 = vadd.f32 %v3666_v13, %v8161_v32 }
 0x2b3   :  { %v4258_v54 = vld [vmem:[#allocation3 + $0x390] sm:$0x88]  ;;  %v8411_v3 = vsel %vm7659_vm5, %v3858_v21, %v3865_v6  ;;  %v4003_v36 = vsel %vm8292_vm11, %v3867_v44, %v4002_v29  ;;  %v4122_v8 = vrot.slane %v4121_v47, 4  ;;  %5096 = vmatmul.mubr.bf16.gmra.mxu0 %v6708_v60  ;;  %v8416_v15 = vadd.f32 %v3668_v48, %v8164_v50  ;;  %v3672_v55 = vpop.f32.mrf.mxu0  ;;  %v4279_v60 = vld [vmem:[#allocation3 + $0x438] sm:$0xff] }
 0x2b4   :  { %v4259_v38 = vsel %vm8241_vm6, 0, %v4258_v54  ;;  %4004 = vst [vmem:[#allocation3 + $0x178] sm:$0x11] %v4003_v36  ;;  %v3871_v32 = vrot.slane %v3869_v37, 7  ;;  %v4123_v13 = vrot.slane %v3872_v30, 5  ;;  %v4124_v41 = vrot.slane %v3869_v37, 4 }
 0x2b5   :  { %4260 = vst [vmem:[#allocation3 + $0x390] sm:$0x88] %v4259_v38  ;;  %v4218_v21 = vsel %vm8309_vm13, %v4122_v8, %v4217_v35  ;;  %v3877_v4 = vshrl.u32 %v5871_v23, 16  ;;  %v3880_v29 = vshll.u32 %v5871_v23, 16  ;;  %v3721_v24 = vmax.f32 %v8407_v0, 0.0  ;;  %v3676_v50 = vpop.f32.mrf.mxu0 }
 0x2b6   :  { %v4046_v48 = vld [vmem:[#allocation3 + $0x428] sm:$0x11]  ;;  %4219 = vst [vmem:[#allocation3 + $0x450] sm:$0xff] %v4218_v21  ;;  %v3874_v56 = vor.u32 %v3872_v30, %v3871_v32  ;;  %v3875_v6 = vrot.slane %v3871_v32, 4  ;;  %v4125_v44 = vor.u32 %v4124_v41, %v4123_v13  ;;  %v4221_v47 = vsel %vm8241_vm6, %v4123_v13, %v4220_v45 }
 0x2b7   :  { %v4047_v37 = vsel %vm8292_vm11, 0, %v4046_v48  ;;  %4222 = vst [vmem:[#allocation3 + $0x330] sm:$0x88] %v4221_v47  ;;  %v3879_v35 = vrot.slane %v3877_v4, 7  ;;  %v4127_v54 = vrot.slane %v3880_v29, 5  ;;  %v4129_v36 = vrot.slane %v3877_v4, 4  ;;  %v3678_v23 = vpop.f32.mrf.mxu0 }
 0x2b8   :  { %4048 = vst [vmem:[#allocation3 + $0x428] sm:$0x11] %v4047_v37  ;;  %v4006_v8 = vsel %vm8253_vm10, %v3874_v56, %v4005_v18  ;;  %v4126_v38 = vrot.slane %v4125_v44, 4  ;;  %v4009_v21 = vld [vmem:[#allocation3 + $0x3a8] sm:$0x11]  ;;  %v3722_v30 = vmax.f32 %v8416_v15, 0.0  ;;  %v5751_v32 = vcombine.low %v4279_v60, %v8320_v27 }
 0x2b9   :  { %4007 = vst [vmem:[#allocation3 + $0x308] sm:$0xff] %v4006_v8  ;;  %v3882_v45 = vor.u32 %v3880_v29, %v3879_v35  ;;  %v3884_v13 = vrot.slane %v3879_v35, 4  ;;  %v4130_v41 = vor.u32 %v4129_v36, %v4127_v54  ;;  %v5752_v48 = vcombine.high %v4279_v60, %v8320_v27  ;;  %v6687_v47 = vld [vmem:[#allocation7 + $0x138] sm:$0xff]   ;;  %v3680_v33 = vpop.f32.mrf.mxu0  ;;  %v4224_v37 = vld [vmem:[#allocation3 + $0x328] sm:$0xff]  ;;  %v6688_v44 = vld [vmem:[#allocation7 + $0x170] sm:$0xff]  }
 0x2ba   :  { %v8434_v4 = vsel %vm7683_vm8, %v4126_v38, %v4127_v54  ;;  %v5872_v18 = vpack.c.bf16 %v3722_v30, %v3721_v24  ;;  %v8441_v56 = vadd.f32 %v3670_v40, %v8167_v9  ;;  %v8444_v29 = vadd.f32 %v3672_v55, %v8176_v17  ;;  %v4285_v8 = vld [vmem:[#allocation3 + $0xc0] sm:$0xff] }
 0x2bb   :  { %v8448_v27 = vsel %vm7659_vm5, %v3875_v6, %v3882_v45  ;;  %v4010_v60 = vsel %vm8292_vm11, %v3884_v13, %v4009_v21  ;;  %v4131_v35 = vrot.slane %v4130_v41, 4  ;;  %4990 = vmatprep.mubr.bf16.mxu1 %v5752_v48  ;;  %v9007_v54 = vmax.f32 %v8331_v46, 0.0  ;;  %v8456_v9 = vpop.f32.mrf.mxu0  ;;  %v4227_v45 = vld [vmem:[#allocation3 + $0x148] sm:$0x88] }
 0x2bc   :  { %4011 = vst [vmem:[#allocation3 + $0x3a8] sm:$0x11] %v4010_v60  ;;  %v3886_v17 = vshrl.u32 %v5872_v18, 16  ;;  %v3889_v40 = vshll.u32 %v5872_v18, 16  ;;  %v3723_v55 = vmax.f32 %v8441_v56, 0.0  ;;  %4991 = vmatmul.mubr.bf16.vlgmr.msra.gmra.mxu1 %v5751_v32  ;;  %v3724_v6 = vmax.f32 %v8444_v29, 0.0 }
 0x2bd   :  { %v6710_v36 = vpack.c.bf16 %v9007_v54, %v3713_v2  ;;  %v4261_v38 = vld [vmem:[#allocation3 + $0x450] sm:$0x88]  ;;  %v4225_v21 = vsel %vm8309_vm13, %v4131_v35, %v4224_v37  ;;  %6145 = vmatpush3.bf16.msra.mxu1 %v6687_v47  ;;  %v9008_v58 = vmax.f32 %v8325_v11, 0.0  ;;  %v9009_v2 = vmax.f32 %v8345_v52, 0.0  ;;  %v8472_v48 = vpop.f32.mrf.mxu0  ;;  %v6690_v52 = vld [vmem:[#allocation7 + $0x168] sm:$0xff]   ;;  %v4012_v60 = vld [vmem:[#allocation3 + $0x398] sm:$0xff] }
 0x2be   :  { %v8467_v13 = vadd.f32 %v3676_v50, %v8179_v43  ;;  %v8470_v41 = vadd.f32 %v3678_v23, %v8182_v57  ;;  %v6689_v32 = vld [vmem:[#allocation7 + $0x130] sm:$0xff]   ;;  %v4262_v18 = vsel %vm8241_vm6, 0, %v4261_v38  ;;  %4226 = vst [vmem:[#allocation3 + $0x328] sm:$0xff] %v4225_v21  ;;  %v8476_v37 = vrot.slane %v3886_v17, 7  ;;  %6146 = vmatprep.subr.bf16.mxu1 %v6688_v44 }
 0x2bf   :  { %v6711_v46 = vpack.c.bf16 %v9009_v2, %v9008_v58  ;;  %v4132_v47 = vrot.slane %v3889_v40, 5  ;;  %v4133_v11 = vrot.slane %v3886_v17, 4  ;;  %4263 = vst [vmem:[#allocation3 + $0x450] sm:$0x88] %v4262_v18  ;;  %v5873_v43 = vpack.c.bf16 %v3724_v6, %v3723_v55  ;;  %v8485_v35 = vpop.f32.mrf.mxu0 }
 0x2c0   :  { %v8941_v57 = vmax.f32 %v8467_v13, 0.0  ;;  %v8940_v50 = vmax.f32 %v8470_v41, 0.0  ;;  %v5758_v23 = vcombine.high %v4285_v8, %v8354_v51  ;;  %v4049_v54 = vld [vmem:[#allocation3 + $0x308] sm:$0x11]  ;;  %v3891_v44 = vor.u32 %v3889_v40, %v8476_v37 }
 0x2c1   :  { %5103 = vmatprep.mubr.bf16.mxu0 %v6711_v46  ;;  %v3892_v17 = vrot.slane %v8476_v37, 4  ;;  %v4134_v38 = vor.u32 %v4133_v11, %v4132_v47  ;;  %v4228_v21 = vsel %vm8241_vm6, %v4132_v47, %v4227_v45  ;;  %v4050_v58 = vsel %vm8292_vm11, 0, %v4049_v54  ;;  %6147 = vmatpush3.bf16.msra.mxu1 %v6689_v32  ;;  %v8497_v40 = vpop.f32.mrf.mxu0  ;;  %v6691_v37 = vld [vmem:[#allocation7 + $0x128] sm:$0xff]  }
 0x2c2   :  { %5104 = vmatmul.mubr.bf16.gmra.mxu0 %v6710_v36  ;;  %4229 = vst [vmem:[#allocation3 + $0x148] sm:$0x88] %v4228_v21  ;;  %v3894_v2 = vshrl.u32 %v5873_v43, 16  ;;  %v3897_v46 = vshll.u32 %v5873_v43, 16  ;;  %v5874_v18 = vpack.c.bf16 %v8940_v50, %v8941_v57  ;;  %4998 = vmatprep.mubr.bf16.mxu1 %v5758_v23  ;;  %4051 = vst [vmem:[#allocation3 + $0x308] sm:$0x11] %v4050_v58 }
 0x2c3   :  { %v4013_v36 = vsel %vm8253_vm10, %v3891_v44, %v4012_v60  ;;  %v4135_v45 = vrot.slane %v4134_v38, 4  ;;  %v8502_v47 = vadd.f32 %v3680_v33, %v8187_v53  ;;  %v5757_v11 = vcombine.low %v4285_v8, %v8354_v51  ;;  %6148 = vmatprep.subr.bf16.mxu1 %v6690_v52  ;;  %v6692_v43 = vld [vmem:[#allocation7 + $0x160] sm:$0xff]   ;;  %v4016_v50 = vld [vmem:[#allocation3 + $0x290] sm:$0x11]  ;;  %v4234_v38 = vld [vmem:[#allocation3 + $0x1f0] sm:$0x88] }
 0x2c4   :  { %4014 = vst [vmem:[#allocation3 + $0x398] sm:$0xff] %v4013_v36  ;;  %v3896_v54 = vrot.slane %v3894_v2, 7  ;;  %v4136_v21 = vrot.slane %v3897_v46, 5  ;;  %v4138_v23 = vrot.slane %v3894_v2, 4  ;;  %v3903_v32 = vshrl.u32 %v5874_v18, 16  ;;  %v3692_v2 = vpop.f32.mrf.mxu0 }
 0x2c5   :  { %v3906_v57 = vshll.u32 %v5874_v18, 16  ;;  %v3727_v58 = vmax.f32 %v8502_v47, 0.0  ;;  %4999 = vmatmul.mubr.bf16.gmra.mxu1 %v5757_v11  ;;  %v8508_v60 = vadd.f32 %v8456_v9, %v8199_v28  ;;  %v6712_v53 = vpack.c.bf16 %v3719_v34, %v3717_v39  ;;  %v4264_v51 = vld [vmem:[#allocation3 + $0x328] sm:$0x88]  ;;  %v6693_v18 = vld [vmem:[#allocation7 + $0x120] sm:$0xff]   ;;  %v6694_v34 = vld [vmem:[#allocation7 + $0x158] sm:$0xff]  }
 0x2c6   :  { %v3899_v33 = vor.u32 %v3897_v46, %v3896_v54  ;;  %v3901_v8 = vrot.slane %v3896_v54, 4  ;;  %v8516_v52 = vsel %vm7683_vm8, %v4135_v45, %v4136_v21  ;;  %v4139_v44 = vor.u32 %v4138_v23, %v4136_v21  ;;  %6149 = vmatpush3.bf16.msra.mxu1 %v6691_v37  ;;  %v4231_v9 = vld [vmem:[#allocation3 + $0x288] sm:$0xff]  ;;  %v4019_v45 = vld [vmem:[#allocation3 + $0x270] sm:$0xff] }
 0x2c7   :  { %v4265_v28 = vsel %vm8241_vm6, 0, %v4264_v51  ;;  %v8520_v61 = vrot.slane %v3903_v32, 7  ;;  %v4141_v14 = vrot.slane %v3906_v57, 5  ;;  %v4142_v39 = vrot.slane %v3903_v32, 4  ;;  %6150 = vmatprep.subr.bf16.mxu1 %v6692_v43  ;;  %v4291_v54 = vld [vmem:[#allocation3 + $0x428] sm:$0xff] }
 0x2c8   :  { %4266 = vst [vmem:[#allocation3 + $0x328] sm:$0x88] %v4265_v28  ;;  %v8524_v46 = vsel %vm7659_vm5, %v3892_v17, %v3899_v33  ;;  %v4017_v37 = vsel %vm8292_vm11, %v3901_v8, %v4016_v50  ;;  %v4140_v36 = vrot.slane %v4139_v44, 4  ;;  %v3728_v11 = vmax.f32 %v8508_v60, 0.0  ;;  %v3696_v44 = vpop.f32.mrf.mxu0 }
 0x2c9   :  { %4018 = vst [vmem:[#allocation3 + $0x290] sm:$0x11] %v4017_v37  ;;  %v3908_v21 = vor.u32 %v3906_v57, %v8520_v61  ;;  %v3909_v23 = vrot.slane %v8520_v61, 4  ;;  %v4143_v43 = vor.u32 %v4142_v39, %v4141_v14  ;;  %v4235_v32 = vsel %vm8241_vm6, %v4141_v14, %v4234_v38  ;;  %v6695_v38 = vld [vmem:[#allocation7 + $0x118] sm:$0xff]  }
 0x2ca   :  { %v4232_v17 = vsel %vm8309_vm13, %v4140_v36, %v4231_v9  ;;  %4236 = vst [vmem:[#allocation3 + $0x1f0] sm:$0x88] %v4235_v32  ;;  %v5875_v50 = vpack.c.bf16 %v3728_v11, %v3727_v58  ;;  %v9010_v51 = vmax.f32 %v8367_v1, 0.0  ;;  %v9011_v33 = vmax.f32 %v8381_v42, 0.0  ;;  %6151 = vmatpush3.bf16.msra.mxu1 %v6693_v18  ;;  %v6696_v42 = vld [vmem:[#allocation7 + $0x150] sm:$0xff]  }
 0x2cb   :  { %v8545_v8 = vadd.f32 %v8472_v48, %v8202_v63  ;;  %v4052_v28 = vld [vmem:[#allocation3 + $0x398] sm:$0x11]  ;;  %4233 = vst [vmem:[#allocation3 + $0x288] sm:$0xff] %v4232_v17  ;;  %v4020_v9 = vsel %vm8253_vm10, %v3908_v21, %v4019_v45  ;;  %v4144_v61 = vrot.slane %v4143_v43, 4  ;;  %v8551_v14 = vadd.f32 %v8485_v35, %v8214_v7  ;;  %6152 = vmatprep.subr.bf16.mxu1 %v6694_v34  ;;  %v3698_v43 = vpop.f32.mrf.mxu0  ;;  %v6697_v32 = vld [vmem:[#allocation7 + $0x110] sm:$0xff]  }
 0x2cc   :  { %v6713_v57 = vpack.c.bf16 %v9011_v33, %v9010_v51  ;;  %v5764_v1 = vcombine.high %v4291_v54, %v8411_v3  ;;  %v4053_v63 = vsel %vm8292_vm11, 0, %v4052_v28  ;;  %4021 = vst [vmem:[#allocation3 + $0x270] sm:$0xff] %v4020_v9  ;;  %v3911_v48 = vshrl.u32 %v5875_v50, 16  ;;  %v4023_v17 = vld [vmem:[#allocation3 + $0x1d8] sm:$0x11] }
 0x2cd   :  { %v3914_v18 = vshll.u32 %v5875_v50, 16  ;;  %v3729_v39 = vmax.f32 %v8545_v8, 0.0  ;;  %4054 = vst [vmem:[#allocation3 + $0x398] sm:$0x11] %v4053_v63  ;;  %v3730_v37 = vmax.f32 %v8551_v14, 0.0  ;;  %v8560_v7 = vadd.f32 %v8497_v40, %v8228_v26  ;;  %v3700_v9 = vpop.f32.mrf.mxu0 }
 0x2ce   :  { %5111 = vmatprep.mubr.bf16.mxu0 %v6713_v57  ;;  %5006 = vmatprep.mubr.bf16.mxu1 %v5764_v1  ;;  %v5763_v35 = vcombine.low %v4291_v54, %v8411_v3  ;;  %v8564_v34 = vadd.f32 %v3692_v2, %v8231_v59  ;;  %v3913_v36 = vrot.slane %v3911_v48, 7  ;;  %v4147_v21 = vrot.slane %v3911_v48, 4  ;;  %v4238_v54 = vld [vmem:[#allocation3 + $0x168] sm:$0xff]  ;;  %v4241_v33 = vld [vmem:[#allocation3 + $0x38] sm:$0x88]  ;;  %v6700_v1 = vld [vmem:[#allocation7 + $0x140] sm:$0xff]  }
 0x2cf   :  { %5112 = vmatmul.mubr.bf16.gmra.mxu0 %v6712_v53  ;;  %v4145_v45 = vrot.slane %v3914_v18, 5  ;;  %v6714_v53 = vpack.c.bf16 %v3723_v55, %v3721_v24  ;;  %6153 = vmatpush3.bf16.msra.mxu1 %v6695_v38  ;;  %v5876_v26 = vpack.c.bf16 %v3730_v37, %v3729_v39  ;;  %v3731_v59 = vmax.f32 %v8560_v7, 0.0  ;;  %v6698_v24 = vld [vmem:[#allocation7 + $0x148] sm:$0xff]  }
 0x2d0   :  { %5007 = vmatmul.mubr.bf16.gmra.mxu1 %v5763_v35  ;;  %v3732_v3 = vmax.f32 %v8564_v34, 0.0  ;;  %v6715_v0 = vpack.c.bf16 %v3724_v6, %v3722_v30  ;;  %6154 = vmatprep.subr.bf16.mxu1 %v6696_v42  ;;  %v3916_v56 = vor.u32 %v3914_v18, %v3913_v36  ;;  %v3918_v55 = vrot.slane %v3913_v36, 4  ;;  %v4026_v18 = vld [vmem:[#allocation3 + $0x440] sm:$0xff] }
 0x2d1   :  { %v8582_v40 = vsel %vm7683_vm8, %v4144_v61, %v4145_v45  ;;  %v4148_v2 = vor.u32 %v4147_v21, %v4145_v45  ;;  %v3920_v50 = vshrl.u32 %v5876_v26, 16  ;;  %v3923_v51 = vshll.u32 %v5876_v26, 16  ;;  %v6699_v61 = vld [vmem:[#allocation7 + $0x108] sm:$0xff]  }
 0x2d2   :  { %v5877_v15 = vpack.c.bf16 %v3732_v3, %v3731_v59  ;;  %5119 = vmatprep.mubr.bf16.mxu0 %v6715_v0  ;;  %v8589_v30 = vadd.f32 %v3696_v44, %v8233_v31  ;;  %v4267_v29 = vld [vmem:[#allocation3 + $0x288] sm:$0x88]  ;;  %v8593_v6 = vsel %vm7659_vm5, %v3909_v23, %v3916_v56  ;;  %v4024_v57 = vsel %vm8292_vm11, %v3918_v55, %v4023_v17  ;;  %v3702_v55 = vpop.f32.mrf.mxu0 }
 0x2d3   :  { %v4149_v38 = vrot.slane %v4148_v2, 4  ;;  %v8598_v28 = vadd.f32 %v3698_v43, %v8235_v22  ;;  %6155 = vmatpush3.bf16.msra.mxu1 %v6697_v32  ;;  %v4268_v31 = vsel %vm8241_vm6, 0, %v4267_v29  ;;  %v4055_v44 = vld [vmem:[#allocation3 + $0x270] sm:$0x11]  ;;  %4025 = vst [vmem:[#allocation3 + $0x1d8] sm:$0x11] %v4024_v57  ;;  %v6719_v60 = vpack.c.bf16 %v3732_v3, %v3730_v37 }
 0x2d4   :  { %v3922_v42 = vrot.slane %v3920_v50, 7  ;;  %v4150_v63 = vrot.slane %v3923_v51, 5  ;;  %v4151_v23 = vrot.slane %v3920_v50, 4  ;;  %6156 = vmatprep.subr.bf16.mxu1 %v6698_v24  ;;  %4269 = vst [vmem:[#allocation3 + $0x288] sm:$0x88] %v4268_v31  ;;  %v4056_v48 = vsel %vm8292_vm11, 0, %v4055_v44 }
 0x2d5   :  { %v4239_v22 = vsel %vm8309_vm13, %v4149_v38, %v4238_v54  ;;  %v3928_v35 = vshrl.u32 %v5877_v15, 16  ;;  %v3931_v36 = vshll.u32 %v5877_v15, 16  ;;  %v4297_v45 = vld [vmem:[#allocation3 + $0x308] sm:$0xff]  ;;  %4057 = vst [vmem:[#allocation3 + $0x270] sm:$0x11] %v4056_v48  ;;  %v3733_v56 = vmax.f32 %v8589_v30, 0.0 }
 0x2d6   :  { %4240 = vst [vmem:[#allocation3 + $0x168] sm:$0xff] %v4239_v22  ;;  %v3925_v21 = vor.u32 %v3923_v51, %v3922_v42  ;;  %v3926_v43 = vrot.slane %v3922_v42, 4  ;;  %v4152_v32 = vor.u32 %v4151_v23, %v4150_v63  ;;  %v4242_v17 = vsel %vm8241_vm6, %v4150_v63, %v4241_v33  ;;  %v6701_v2 = vld [vmem:[#allocation7 + $0x100] sm:$0xff]   ;;  %v4030_v51 = vld [vmem:[#allocation3 + $0x318] sm:$0x11] }
 0x2d7   :  { %5120 = vmatmul.mubr.bf16.gmra.mxu0 %v6714_v53  ;;  %4243 = vst [vmem:[#allocation3 + $0x38] sm:$0x88] %v4242_v17  ;;  %v3930_v26 = vrot.slane %v3928_v35, 7  ;;  %v4154_v0 = vrot.slane %v3931_v36, 5  ;;  %v4156_v24 = vrot.slane %v3928_v35, 4  ;;  %6157 = vmatpush3.bf16.msra.mxu1 %v6699_v61  ;;  %v3734_v15 = vmax.f32 %v8598_v28, 0.0 }
 0x2d8   :  { %v4027_v54 = vsel %vm8253_vm10, %v3925_v21, %v4026_v18  ;;  %v4153_v50 = vrot.slane %v4152_v32, 4  ;;  %v5770_v29 = vcombine.high %v4297_v45, %v8448_v27  ;;  %6158 = vmatprep.subr.bf16.mxu1 %v6700_v1  ;;  %v3701_v38 = vadd.f32 %v3700_v9, %v8245_v20  ;;  %v4245_v31 = vld [vmem:[#allocation3 + $0xb8] sm:$0xff] }
 0x2d9   :  { %4028 = vst [vmem:[#allocation3 + $0x440] sm:$0xff] %v4027_v54  ;;  %v3933_v53 = vor.u32 %v3931_v36, %v3930_v26  ;;  %v3935_v33 = vrot.slane %v3930_v26, 4  ;;  %v4157_v57 = vor.u32 %v4156_v24, %v4154_v0  ;;  %v5878_v44 = vpack.c.bf16 %v3734_v15, %v3733_v56  ;;  %v4303_v63 = vld [vmem:[#allocation3 + $0x398] sm:$0xff] }
 0x2da   :  { %v8616_v61 = vsel %vm7683_vm8, %v4153_v50, %v4154_v0  ;;  %5014 = vmatprep.mubr.bf16.mxu1 %v5770_v29  ;;  %v5769_v42 = vcombine.low %v4297_v45, %v8448_v27  ;;  %v3703_v1 = vadd.f32 %v3702_v55, %v8247_v49  ;;  %v9012_v35 = vmax.f32 %v8467_v13, 0.0  ;;  %v4248_v45 = vld [vmem:[#allocation3 + $0x60] sm:$0x88] }
 0x2db   :  { %v8626_v23 = vsel %vm7659_vm5, %v3926_v43, %v3933_v53  ;;  %v4031_v20 = vsel %vm8292_vm11, %v3935_v33, %v4030_v51  ;;  %v4158_v9 = vrot.slane %v4157_v57, 4  ;;  %6159 = vmatpush3.bf16.msra.mxu1 %v6701_v2  ;;  %v3937_v48 = vshrl.u32 %v5878_v44, 16  ;;  %v4033_v0 = vld [vmem:[#allocation3 + $0x280] sm:$0xff]  ;;  %v4037_v57 = vld [vmem:[#allocation3 + $0xf0] sm:$0x11] }
 0x2dc   :  { %4032 = vst [vmem:[#allocation3 + $0x318] sm:$0x11] %v4031_v20  ;;  %v3940_v22 = vshll.u32 %v5878_v44, 16  ;;  %5015 = vmatmul.mubr.bf16.gmra.mxu1 %v5769_v42  ;;  %v3736_v18 = vmax.f32 %v3703_v1, 0.0  ;;  %v6716_v49 = vpack.c.bf16 %v3727_v58, %v9012_v35  ;;  %v3735_v21 = vmax.f32 %v3701_v38, 0.0 }
 0x2dd   :  { %v4270_v27 = vld [vmem:[#allocation3 + $0x168] sm:$0x88]  ;;  %v4246_v36 = vsel %vm8309_vm13, %v4158_v9, %v4245_v31  ;;  %v9013_v43 = vmax.f32 %v8470_v41, 0.0  ;;  %v5776_v17 = vcombine.high %v4303_v63, %v8524_v46  ;;  %v3939_v13 = vrot.slane %v3937_v48, 7 }
 0x2de   :  { %v4271_v26 = vsel %vm8241_vm6, 0, %v4270_v27  ;;  %4247 = vst [vmem:[#allocation3 + $0xb8] sm:$0xff] %v4246_v36  ;;  %v4159_v47 = vrot.slane %v3940_v22, 5  ;;  %v4160_v58 = vrot.slane %v3937_v48, 4  ;;  %v5879_v24 = vpack.c.bf16 %v3736_v18, %v3735_v21  ;;  %v4284_v27 = vld [vmem:[#allocation3 + $0x170] sm:$0xff] }
 0x2df   :  { %v6717_v32 = vpack.c.bf16 %v3728_v11, %v9013_v43  ;;  %4272 = vst [vmem:[#allocation3 + $0x168] sm:$0x88] %v4271_v26  ;;  %5022 = vmatprep.mubr.bf16.mxu1 %v5776_v17  ;;  %v6718_v41 = vpack.c.bf16 %v3731_v59, %v3729_v39  ;;  %v4309_v11 = vld [vmem:[#allocation3 + $0x270] sm:$0xff]  ;;  %v3942_v2 = vor.u32 %v3940_v22, %v3939_v13  ;;  %v3943_v33 = vrot.slane %v3939_v13, 4  ;;  %v4308_v13 = vld [vmem:[#allocation3 + $0x288] sm:$0xff] }
 0x2e0   :  { %v4058_v55 = vld [vmem:[#allocation3 + $0x440] sm:$0x11]  ;;  %v4161_v54 = vor.u32 %v4160_v58, %v4159_v47  ;;  %v4249_v50 = vsel %vm8241_vm6, %v4159_v47, %v4248_v45  ;;  %v5775_v51 = vcombine.low %v4303_v63, %v8524_v46  ;;  %v3945_v39 = vshrl.u32 %v5879_v24, 16  ;;  %v4281_v36 = vld [vmem:[#allocation3 + $0x430] sm:$0xff] }
 0x2e1   :  { %5127 = vmatprep.mubr.bf16.mxu0 %v6717_v32  ;;  %v4059_v8 = vsel %vm8292_vm11, 0, %v4058_v55  ;;  %4250 = vst [vmem:[#allocation3 + $0x60] sm:$0x88] %v4249_v50  ;;  %v3948_v7 = vshll.u32 %v5879_v24, 16  ;;  %v4034_v14 = vsel %vm8253_vm10, %v3942_v2, %v4033_v0  ;;  %v5782_v34 = vcombine.high %v4309_v11, %v8593_v6  ;;  %v6702_v43 = vld [vmem:[#allocation3 + $0x2a0] ss:$240 sps:$4 sm:$0xff]  }
 0x2e2   :  { %5128 = vmatmul.mubr.bf16.gmra.mxu0 %v6716_v49  ;;  %4060 = vst [vmem:[#allocation3 + $0x440] sm:$0x11] %v4059_v8  ;;  %v4162_v37 = vrot.slane %v4161_v54, 4  ;;  %v6720_v59 = vpack.c.bf16 %v3735_v21, %v3733_v56  ;;  %4035 = vst [vmem:[#allocation3 + $0x280] sm:$0xff] %v4034_v14  ;;  %v3947_v3 = vrot.slane %v3945_v39, 7  ;;  %v4165_v29 = vrot.slane %v3945_v39, 4 }
 0x2e3   :  { %5135 = vmatprep.mubr.bf16.mxu0 %v6719_v60  ;;  %v4163_v46 = vrot.slane %v3948_v7, 5  ;;  %v6721_v53 = vpack.c.bf16 %v3736_v18, %v3734_v15  ;;  %v4252_v56 = vld [vmem:[#allocation3 + $0x3c0] sm:$0xff]  ;;  %v5781_v12 = vcombine.low %v4309_v11, %v8593_v6  ;;  %v5756_v10 = vcombine.high %v4281_v36, %v4284_v27  ;;  %v4302_v32 = vld [vmem:[#allocation3 + $0x328] sm:$0xff]  ;;  %v5336_v54 = vld [vmem:[%s8922_s7 + $0x78] sm:$0xff] }
 0x2e4   :  { %5023 = vmatmul.mubr.bf16.gmra.mxu1 %v5775_v51  ;;  %v3950_v31 = vor.u32 %v3948_v7, %v3947_v3  ;;  %v3952_v62 = vrot.slane %v3947_v3, 4  ;;  %v5755_v45 = vcombine.low %v4281_v36, %v4284_v27  ;;  %v6704_v21 = vld [vmem:[#allocation3 + $0x2a4] ss:$240 sps:$4 sm:$0xff]   ;;  %v5774_v26 = vcombine.high %v8434_v4, %v4302_v32  ;;  %v5332_v8 = vld [vmem:[%s8922_s7 + $0x58] sm:$0xff]  ;;  %v5330_v7 = vld [vmem:[%s8922_s7 + $0x48] sm:$0xff] }
 0x2e5   :  { %v4273_v38 = vld [vmem:[#allocation3 + $0xb8] sm:$0x88]  ;;  %v8665_v44 = vsel %vm7683_vm8, %v4162_v37, %v4163_v46  ;;  %v4166_v42 = vor.u32 %v4165_v29, %v4163_v46  ;;  %5030 = vmatprep.mubr.bf16.mxu1 %v5782_v34  ;;  %v5773_v47 = vcombine.low %v8434_v4, %v4302_v32  ;;  %v5780_v58 = vcombine.high %v8516_v52, %v4308_v13  ;;  %v5333_v51 = vld [vmem:[%s8922_s7 + $0x60] sm:$0xff]  ;;  %v5331_v39 = vld [vmem:[%s8922_s7 + $0x50] sm:$0xff] }
 0x2e6   :  { %v4274_v30 = vsel %vm8241_vm6, 0, %v4273_v38  ;;  %v3951_v28 = vsel %vm7659_vm5, %v3943_v33, %v3950_v31  ;;  %v4038_v15 = vsel %vm8292_vm11, %v3952_v62, %v4037_v57  ;;  %v4314_v0 = vld [vmem:[#allocation3 + $0x168] sm:$0xff]  ;;  %v5779_v24 = vcombine.low %v8516_v52, %v4308_v13  ;;  %v5329_v33 = vld [vmem:[%s8922_s7 + $0x40] sm:$0xff]  ;;  %v5328_v57 = vld [vmem:[%s8922_s7 + $0x38] sm:$0xff] }
 0x2e7   :  { %4275 = vst [vmem:[#allocation3 + $0xb8] sm:$0x88] %v4274_v30  ;;  %v4167_v1 = vrot.slane %v4166_v42, 4  ;;  %4039 = vst [vmem:[#allocation3 + $0xf0] sm:$0x11] %v4038_v15  ;;  %v6795_v50 = vmov 0.0  }
 0x2e8   :  { %6433 = vmatprep.subr.mxu0 %v6795_v50  ;;  %v5327_v15 = vld [vmem:[%s8922_s7 + $0x30] sm:$0xff]  ;;  %v5322_v27 = vld [vmem:[%s8922_s7 + $0x8] sm:$0xff]  ;;  %v5321_v36 = vld [vmem:[%s8922_s7] sm:$0xff]  ;;  %vm5352_vm5 = vcmask 1041409   ;;  %vm5354_vm8 = vcmask 1042434  }
 0x2e9   :  { %v4253_v63 = vsel %vm8309_vm13, %v4167_v1, %v4252_v56  ;;  %v4315_v20 = vld [vmem:[#allocation3 + $0x440] sm:$0xff]  ;;  %6434 = vmatpush3.msra.mxu0 %v5336_v54  ;;  %v5326_v1 = vld [vmem:[%s8922_s7 + $0x28] sm:$0xff] }
 0x2ea   :  { %5136 = vmatmul.mubr.bf16.gmra.mxu0 %v6718_v41  ;;  %v4061_v9 = vld [vmem:[#allocation3 + $0x280] sm:$0x11]  ;;  %4254 = vst [vmem:[#allocation3 + $0x3c0] sm:$0xff] %v4253_v63  ;;  %v5788_v48 = vcombine.high %v4315_v20, %v8626_v23  ;;  %v5787_v22 = vcombine.low %v4315_v20, %v8626_v23  ;;  %v4296_v23 = vld [vmem:[#allocation3 + $0x450] sm:$0xff]  ;;  %v5786_v41 = vcombine.high %v8582_v40, %v4314_v0 }
 0x2eb   :  { %5143 = vmatprep.mubr.bf16.mxu0 %v6721_v53  ;;  %v4062_v19 = vsel %vm8292_vm11, 0, %v4061_v9  ;;  %v5768_v5 = vcombine.high %v8400_v16, %v4296_v23  ;;  %v5767_v17 = vcombine.low %v8400_v16, %v4296_v23  ;;  %v5785_v16 = vcombine.low %v8582_v40, %v4314_v0  ;;  %6435 = vmatprep.subr.mxu0 %v6795_v50  ;;  %v5335_v40 = vld [vmem:[%s8922_s7 + $0x70] sm:$0xff] }
 0x2ec   :  { %4063 = vst [vmem:[#allocation3 + $0x280] sm:$0x11] %v4062_v19  ;;  %5031 = vmatmul.mubr.bf16.gmra.mxu1 %v5781_v12  ;;  %6436 = vmatpush3.msra.mxu0 %v5335_v40 }
 0x2ed   :  { %5038 = vmatprep.mubr.bf16.mxu1 %v5788_v48  ;;  %6437 = vmatprep.subr.mxu0 %v6795_v50 }
 0x2ee   :  { %v4320_v60 = vld [vmem:[#allocation3 + $0xb8] sm:$0xff] }
 0x2ef   :  { %v5792_v11 = vcombine.high %v8616_v61, %v4320_v60  ;;  %v5791_v4 = vcombine.low %v8616_v61, %v4320_v60  ;;  %v5334_v61 = vld [vmem:[%s8922_s7 + $0x68] sm:$0xff] }
 0x2f0   :  { %6438 = vmatpush3.msra.mxu0 %v5334_v61 }
 0x2f1   :  { %v4276_v18 = vld [vmem:[#allocation3 + $0x3c0] sm:$0x88]  ;;  %6439 = vmatprep.subr.mxu0 %v6795_v50 }
 0x2f2   :  { %5144 = vmatmul.mubr.bf16.gmra.mxu0 %v6720_v59  ;;  %v4277_v25 = vsel %vm8241_vm6, 0, %v4276_v18  ;;  %v5324_v18 = vld [vmem:[%s8922_s7 + $0x18] sm:$0xff] }
 0x2f3   :  { %4278 = vst [vmem:[#allocation3 + $0x3c0] sm:$0x88] %v4277_v25  ;;  %v4321_v6 = vld [vmem:[#allocation3 + $0x280] sm:$0xff]  ;;  %6440 = vmatpush3.msra.mxu0 %v5333_v51  ;;  %6465 = vmatprep.mubr.msk.f32.mxu0 %vm6796_vm15, %v6795_v50 }
 0x2f4   :  { %5039 = vmatmul.mubr.bf16.gmra.mxu1 %v5787_v22  ;;  %v5794_v35 = vcombine.high %v4321_v6, %v3951_v28  ;;  %v5793_v49 = vcombine.low %v4321_v6, %v3951_v28  ;;  %6441 = vmatprep.subr.mxu0 %v6795_v50  ;;  %v5325_v22 = vld [vmem:[%s8922_s7 + $0x20] sm:$0xff] }
 0x2f5   :  { %6442 = vmatpush3.msra.mxu0 %v5332_v8 }
 0x2f6   :  { %5046 = vmatprep.mubr.bf16.mxu1 %v5794_v35  ;;  %6443 = vmatprep.subr.mxu0 %v6795_v50  ;;  %v5323_v35 = vld [vmem:[%s8922_s7 + $0x10] sm:$0xff] }
 0x2f7   :  { %6444 = vmatpush3.msra.mxu0 %v5331_v39 }
 0x2f8   :  { %6445 = vmatprep.subr.mxu0 %v6795_v50 }
 0x2f9   :  { %6446 = vmatpush3.msra.mxu0 %v5330_v7 }
 0x2fa   :  { %v4326_v55 = vld [vmem:[#allocation3 + $0x3c0] sm:$0xff]  ;;  %6447 = vmatprep.subr.mxu0 %v6795_v50 }
 0x2fb   :  { %v5798_v2 = vcombine.high %v8665_v44, %v4326_v55  ;;  %v5797_v52 = vcombine.low %v8665_v44, %v4326_v55  ;;  %6448 = vmatpush3.msra.mxu0 %v5329_v33 }
 0x2fc   :  { %5047 = vmatmul.mubr.bf16.gmra.mxu1 %v5793_v49  ;;  %6449 = vmatprep.subr.mxu0 %v6795_v50 }
 0x2fd   :  { %5184 = vmatprep.mubr.bf16.mxu1 %v5756_v10  ;;  %6450 = vmatpush3.msra.mxu0 %v5328_v57 }
 0x2fe   :  { %6451 = vmatprep.subr.mxu0 %v6795_v50 }
 0x2ff   :  { %6452 = vmatpush3.msra.mxu0 %v5327_v15 }
 0x300   :  { %6453 = vmatprep.subr.mxu0 %v6795_v50 }
 0x301   :  { %6454 = vmatpush3.msra.mxu0 %v5326_v1 }
 0x302   :  { %6455 = vmatprep.subr.mxu0 %v6795_v50 }
 0x303   :  { %6456 = vmatpush3.msra.mxu0 %v5325_v22 }
 0x304   :  { %5185 = vmatmul.mubr.bf16.vlgmr.msra.gmra.mxu1 %v5755_v45  ;;  %6457 = vmatprep.subr.mxu0 %v6795_v50 }
 0x305   :  { %5192 = vmatprep.mubr.bf16.mxu1 %v6704_v21  ;;  %6458 = vmatpush3.msra.mxu0 %v5324_v18 }
 0x306   :  { %6459 = vmatprep.subr.mxu0 %v6795_v50 }
 0x307   :  { %6460 = vmatpush3.msra.mxu0 %v5323_v35 }
 0x308   :  { %6461 = vmatprep.subr.mxu0 %v6795_v50 }
 0x309   :  { %6462 = vmatpush3.msra.mxu0 %v5322_v27 }
 0x30a   :  { %6463 = vmatprep.subr.mxu0 %v6795_v50 }
 0x30b   :  { %6464 = vmatpush3.msra.mxu0 %v5321_v36 }
 0x30c   :  { %5193 = vmatmul.mubr.bf16.gmra.mxu1 %v6702_v43 }
 0x30d   :  { %5200 = vmatprep.mubr.bf16.mxu1 %v5768_v5 }
 0x314   :  { %5201 = vmatmul.mubr.bf16.gmra.mxu1 %v5767_v17 }
 0x315   :  { %5208 = vmatprep.mubr.bf16.mxu1 %v5774_v26 }
 0x31c   :  { %5209 = vmatmul.mubr.bf16.gmra.mxu1 %v5773_v47 }
 0x31d   :  { %5216 = vmatprep.mubr.bf16.mxu1 %v5780_v58 }
 0x324   :  { %5217 = vmatmul.mubr.bf16.gmra.mxu1 %v5779_v24 }
 0x325   :  { %5224 = vmatprep.mubr.bf16.mxu1 %v5786_v41 }
 0x32c   :  { %5225 = vmatmul.mubr.bf16.gmra.mxu1 %v5785_v16 }
 0x32d   :  { %5232 = vmatprep.mubr.bf16.mxu1 %v5792_v11 }
 0x334   :  { %5233 = vmatmul.mubr.bf16.gmra.mxu1 %v5791_v4 }
 0x335   :  { %5240 = vmatprep.mubr.bf16.mxu1 %v5798_v2 }
 0x33c   :  { %5241 = vmatmul.mubr.bf16.gmra.mxu1 %v5797_v52 }
 0x35f   :  { %v8722_v34 = vpop.f32.mrf.mxu0 }
 0x361   :  { %v8727_v29 = vpop.f32.mrf.mxu0 }
 0x363   :  { %v8738_v62 = vpop.f32.mrf.mxu0 }
 0x365   :  { %v8743_v56 = vpop.f32.mrf.mxu0 }
 0x366   :  { %v6101_v35 = vadd.f32 %v8743_v56, %v8738_v62 }
 0x373   :  { %v8754_v63 = vpop.f32.mrf.mxu0 }
 0x375   :  { %v8759_v19 = vpop.f32.mrf.mxu0 }
 0x377   :  { %v8774_v49 = vpop.f32.mrf.mxu0 }
 0x379   :  { %v8784_v45 = vpop.f32.mrf.mxu0 }
 0x37c   :  { %v6032_v14 = vpop.f32.mrf.mxu1 }
 0x37e   :  { %v6033_v37 = vpop.f32.mrf.mxu1 }
 0x37f   :  { %v8724_v59 = vadd.f32 %v6033_v37, %v6032_v14 }
 0x380   :  { %v6035_v3 = vpop.f32.mrf.mxu1 }
 0x382   :  { %v6036_v46 = vpop.f32.mrf.mxu1  ;;  %v8789_v5 = vpop.f32.mrf.mxu0 }
 0x383   :  { %v8729_v53 = vadd.f32 %v6036_v46, %v6035_v3 }
 0x384   :  { %v8793_v13 = vpop.f32.mrf.mxu0 }
 0x385   :  { %v6038_v38 = vpop.f32.mrf.mxu1 }
 0x386   :  { %v8797_v24 = vpop.f32.mrf.mxu0 }
 0x387   :  { %v6039_v31 = vpop.f32.mrf.mxu1 }
 0x388   :  { %v8740_v44 = vadd.f32 %v6039_v31, %v6038_v38  ;;  %v8801_v11 = vpop.f32.mrf.mxu0 }
 0x389   :  { %v6041_v42 = vpop.f32.mrf.mxu1 }
 0x38b   :  { %v6042_v30 = vpop.f32.mrf.mxu1 }
 0x38c   :  { %v8745_v28 = vadd.f32 %v6042_v30, %v6041_v42  ;;  %v8828_v42 = vld [vmem:[%s8921_s6] ss:$0 sm:$0xff] }
 0x38d   :  { %v4993_v1 = vadd.f32 %v8724_v59, %v8828_v42  ;;  %v4996_v22 = vadd.f32 %v8729_v53, %v8828_v42  ;;  %v6104_v53 = vadd.f32 %v8759_v19, %v8754_v63 }
 0x38e   :  { %v5004_v62 = vadd.f32 %v8745_v28, %v8828_v42 }
 0x38f   :  { %v8805_v52 = vpop.f32.mrf.mxu0  ;;  %v5093_v59 = vadd.f32 %v6101_v35, %v4996_v22 }
 0x390   :  { %v6044_v12 = vpop.f32.mrf.mxu1 }
 0x391   :  { %v8809_v61 = vpop.f32.mrf.mxu0 }
 0x392   :  { %v6045_v20 = vpop.f32.mrf.mxu1 }
 0x393   :  { %v8757_v9 = vadd.f32 %v6045_v20, %v6044_v12  ;;  %v8813_v7 = vpop.f32.mrf.mxu0 }
 0x394   :  { %v6047_v48 = vpop.f32.mrf.mxu1 }
 0x395   :  { %v8817_v46 = vpop.f32.mrf.mxu0  ;;  %v5009_v28 = vadd.f32 %v8757_v9, %v8828_v42 }
 0x396   :  { %v6048_v25 = vpop.f32.mrf.mxu1 }
 0x397   :  { %v8768_v6 = vadd.f32 %v6048_v25, %v6047_v48  ;;  %v8823_v31 = vpop.f32.mrf.mxu0  ;;  %v6098_v48 = vadd.f32 %v8727_v29, %v8722_v34 }
 0x399   :  { %v8834_v12 = vpop.f32.mrf.mxu0  ;;  %v5090_v36 = vadd.f32 %v6098_v48, %v4993_v1  ;;  %v5012_v1 = vadd.f32 %v8768_v6, %v8828_v42 }
 0x39b   :  { %v8842_v27 = vpop.f32.mrf.mxu0 }
 0x39c   :  { %v6050_v10 = vpop.f32.mrf.mxu1 }
 0x39d   :  { %v8846_v34 = vpop.f32.mrf.mxu0 }
 0x39e   :  { %v6051_v21 = vpop.f32.mrf.mxu1 }
 0x39f   :  { %v8787_v23 = vadd.f32 %v6051_v21, %v6050_v10 }
 0x3a0   :  { %v6053_v43 = vpop.f32.mrf.mxu1 }
 0x3a1   :  { %v5017_v6 = vadd.f32 %v8787_v23, %v8828_v42  ;;  %v6119_v23 = vadd.f32 %v8817_v46, %v8813_v7 }
 0x3a2   :  { %v6054_v32 = vpop.f32.mrf.mxu1 }
 0x3a3   :  { %v8791_v17 = vadd.f32 %v6054_v32, %v6053_v43 }
 0x3a4   :  { %v6056_v26 = vpop.f32.mrf.mxu1 }
 0x3a6   :  { %v6057_v47 = vpop.f32.mrf.mxu1 }
 0x3a7   :  { %v8795_v58 = vadd.f32 %v6057_v47, %v6056_v26  ;;  %v5001_v26 = vadd.f32 %v8740_v44, %v8828_v42 }
 0x3a8   :  { %v6059_v0 = vpop.f32.mrf.mxu1 }
 0x3aa   :  { %v6060_v41 = vpop.f32.mrf.mxu1 }
 0x3ab   :  { %v8799_v60 = vadd.f32 %v6060_v41, %v6059_v0 }
 0x3ac   :  { %v6062_v16 = vpop.f32.mrf.mxu1 }
 0x3ae   :  { %v6063_v55 = vpop.f32.mrf.mxu1 }
 0x3af   :  { %v8803_v4 = vadd.f32 %v6063_v55, %v6062_v16  ;;  %v6107_v55 = vadd.f32 %v8784_v45, %v8774_v49  ;;  %v6110_v49 = vadd.f32 %v8793_v13, %v8789_v5 }
 0x3b0   :  { %v6065_v2 = vpop.f32.mrf.mxu1 }
 0x3b2   :  { %v6066_v54 = vpop.f32.mrf.mxu1 }
 0x3b3   :  { %v8807_v50 = vadd.f32 %v6066_v54, %v6065_v2  ;;  %v8854_v2 = vpop.f32.mrf.mxu0  ;;  %v5098_v54 = vadd.f32 %v6104_v53, %v5001_v26 }
 0x3b4   :  { %v6068_v40 = vpop.f32.mrf.mxu1 }
 0x3b6   :  { %v6069_v51 = vpop.f32.mrf.mxu1 }
 0x3b7   :  { %v8811_v8 = vadd.f32 %v6069_v51, %v6068_v40 }
 0x3b8   :  { %v6071_v39 = vpop.f32.mrf.mxu1 }
 0x3ba   :  { %v6072_v14 = vpop.f32.mrf.mxu1 }
 0x3bb   :  { %v8815_v37 = vadd.f32 %v6072_v14, %v6071_v39  ;;  %v5101_v14 = vadd.f32 %v6107_v55, %v5004_v62 }
 0x3bc   :  { %v6074_v3 = vpop.f32.mrf.mxu1 }
 0x3be   :  { %v6075_v33 = vpop.f32.mrf.mxu1 }
 0x3bf   :  { %v8819_v57 = vadd.f32 %v6075_v33, %v6074_v3  ;;  %v8858_v3 = vpop.f32.mrf.mxu0 }
 0x3c0   :  { %v8821_v38 = vpop.f32.mrf.mxu1 }
 0x3c1   :  { %v8866_v35 = vpop.f32.mrf.mxu0 }
 0x3c2   :  { %v8830_v30 = vpop.f32.mrf.mxu1 }
 0x3c3   :  { %v8870_v26 = vpop.f32.mrf.mxu0 }
 0x3c4   :  { %v6160_v15 = vpop.f32.mrf.mxu1 }
 0x3c6   :  { %v6161_v20 = vpop.f32.mrf.mxu1 }
 0x3c7   :  { %v6162_v18 = vadd.f32 %v6161_v20, %v6160_v15 }
 0x3c8   :  { %v6163_v25 = vpop.f32.mrf.mxu1 }
 0x3c9   :  { %v5187_v21 = vadd.f32 %v6162_v18, %v5090_v36 }
 0x3ca   :  { %v6164_v10 = vpop.f32.mrf.mxu1 }
 0x3cb   :  { %v6165_v43 = vadd.f32 %v6164_v10, %v6163_v25  ;;  %v5249_v56 = vmax.f32 %v5187_v21, 0.0  ;;  %v6113_v25 = vadd.f32 %v8801_v11, %v8797_v24  ;;  %v5106_v10 = vadd.f32 %v6110_v49, %v5009_v28 }
 0x3cc   :  { %v6166_v32 = vpop.f32.mrf.mxu1  ;;  %v6116_v24 = vadd.f32 %v8809_v61, %v8805_v52  ;;  %v5020_v11 = vadd.f32 %v8791_v17, %v8828_v42  ;;  %v5025_v28 = vadd.f32 %v8795_v58, %v8828_v42 }
 0x3cd   :  { %v5190_v29 = vadd.f32 %v6165_v43, %v5093_v59  ;;  %v5109_v5 = vadd.f32 %v6113_v25, %v5012_v1  ;;  %v6122_v1 = vadd.f32 %v8834_v12, %v8823_v31 }
 0x3ce   :  { %v6167_v47 = vpop.f32.mrf.mxu1  ;;  %v5114_v55 = vadd.f32 %v6116_v24, %v5017_v6  ;;  %v5117_v17 = vadd.f32 %v6119_v23, %v5020_v11 }
 0x3cf   :  { %v5250_v0 = vmax.f32 %v5190_v29, 0.0  ;;  %v6168_v41 = vadd.f32 %v6167_v47, %v6166_v32  ;;  %v5122_v58 = vadd.f32 %v6122_v1, %v5025_v28 }
 0x3d0   :  { %v6169_v16 = vpop.f32.mrf.mxu1 }
 0x3d1   :  { %v5265_v44 = vadd.f32 %v5250_v0, %v5249_v56  ;;  %v5195_v39 = vadd.f32 %v6168_v41, %v5098_v54  ;;  %v8878_v54 = vpop.f32.mrf.mxu0 }
 0x3d2   :  { %v6170_v40 = vpop.f32.mrf.mxu1 }
 0x3d3   :  { %v5266_v51 = vrot.slane %v5265_v44, 4  ;;  %v6171_v63 = vadd.f32 %v6170_v40, %v6169_v16  ;;  %v5251_v20 = vmax.f32 %v5195_v39, 0.0 }
 0x3d4   :  { %v6172_v19 = vpop.f32.mrf.mxu1 }
 0x3d5   :  { %v5267_v33 = vadd.f32 %v5266_v51, %v5265_v44  ;;  %v5198_v15 = vadd.f32 %v6171_v63, %v5101_v14 }
 0x3d6   :  { %v6173_v45 = vpop.f32.mrf.mxu1 }
 0x3d7   :  { %v5252_v48 = vmax.f32 %v5198_v15, 0.0  ;;  %v6174_v22 = vadd.f32 %v6173_v45, %v6172_v19  ;;  %v5268_v9 = vrot.slane %v5267_v33, 2  ;;  %v6133_v15 = vpop.f32.mrf.mxu0 }
 0x3d8   :  { %v6175_v18 = vpop.f32.mrf.mxu1 }
 0x3d9   :  { %v5272_v36 = vadd.f32 %v5252_v48, %v5251_v20  ;;  %v5203_v43 = vadd.f32 %v6174_v22, %v5106_v10  ;;  %v5269_v29 = vadd.f32 %v5268_v9, %v5267_v33  ;;  %v5028_v20 = vadd.f32 %v8799_v60, %v8828_v42 }
 0x3da   :  { %v6176_v21 = vpop.f32.mrf.mxu1 }
 0x3db   :  { %v5273_v59 = vrot.slane %v5272_v36, 4  ;;  %v6177_v13 = vadd.f32 %v6176_v21, %v6175_v18  ;;  %v5253_v0 = vmax.f32 %v5203_v43, 0.0  ;;  %v5270_v40 = vrot.slane %v5269_v29, 1 }
 0x3dc   :  { %v6178_v32 = vpop.f32.mrf.mxu1  ;;  %v6125_v21 = vadd.f32 %v8846_v34, %v8842_v27  ;;  %v6128_v27 = vadd.f32 %v8858_v3, %v8854_v2  ;;  %v5036_v34 = vadd.f32 %v8807_v50, %v8828_v42 }
 0x3dd   :  { %v5274_v53 = vadd.f32 %v5273_v59, %v5272_v36  ;;  %v5206_v47 = vadd.f32 %v6177_v13, %v5109_v5  ;;  %v5271_v49 = vadd.f32 %v5270_v40, %v5269_v29  ;;  %v6135_v59 = vpop.f32.mrf.mxu0  ;;  %v5033_v29 = vadd.f32 %v8803_v4, %v8828_v42 }
 0x3de   :  { %v6179_v62 = vpop.f32.mrf.mxu1  ;;  %v6131_v40 = vadd.f32 %v8870_v26, %v8866_v35  ;;  %v5044_v35 = vadd.f32 %v8815_v37, %v8828_v42 }
 0x3df   :  { %v5275_v56 = vrot.slane %v5274_v53, 2  ;;  %v5254_v41 = vmax.f32 %v5206_v47, 0.0  ;;  %v6180_v16 = vadd.f32 %v6179_v62, %v6178_v32  ;;  %v5125_v32 = vadd.f32 %v6125_v21, %v5028_v20  ;;  %v6136_v47 = vpop.f32.mrf.mxu0 }
 0x3e0   :  { %v6181_v44 = vpop.f32.mrf.mxu1  ;;  %v5130_v23 = vadd.f32 %v6128_v27, %v5033_v29 }
 0x3e1   :  { %v5276_v51 = vadd.f32 %v5275_v56, %v5274_v53  ;;  %v5279_v39 = vadd.f32 %v5254_v41, %v5253_v0  ;;  %v5211_v14 = vadd.f32 %v6180_v16, %v5114_v55 }
 0x3e2   :  { %v6182_v52 = vpop.f32.mrf.mxu1 }
 0x3e3   :  { %v5277_v61 = vrot.slane %v5276_v51, 1  ;;  %v5280_v63 = vrot.slane %v5279_v39, 4  ;;  %v6183_v19 = vadd.f32 %v6182_v52, %v6181_v44  ;;  %v5255_v48 = vmax.f32 %v5211_v14, 0.0 }
 0x3e4   :  { %v6184_v33 = vpop.f32.mrf.mxu1 }
 0x3e5   :  { %v5278_v45 = vadd.f32 %v5277_v61, %v5276_v51  ;;  %v5281_v7 = vadd.f32 %v5280_v63, %v5279_v39  ;;  %v5214_v46 = vadd.f32 %v6183_v19, %v5117_v17  ;;  %v6138_v51 = vpop.f32.mrf.mxu0  ;;  %v5133_v63 = vadd.f32 %v6131_v40, %v5036_v34 }
 0x3e6   :  { %v6185_v22 = vpop.f32.mrf.mxu1  ;;  %v5041_v17 = vadd.f32 %v8811_v8, %v8828_v42  ;;  %v6137_v8 = vadd.f32 %v6136_v47, %v6135_v59 }
 0x3e7   :  { %v5353_v18 = vsel %vm5352_vm5, %v5278_v45, %v5271_v49  ;;  %v5282_v25 = vrot.slane %v5281_v7, 2  ;;  %v5256_v9 = vmax.f32 %v5214_v46, 0.0  ;;  %v6186_v36 = vadd.f32 %v6185_v22, %v6184_v33  ;;  %v6139_v28 = vpop.f32.mrf.mxu0 }
 0x3e8   :  { %v6187_v10 = vpop.f32.mrf.mxu1 }
 0x3e9   :  { %v5283_v43 = vadd.f32 %v5282_v25, %v5281_v7  ;;  %v5286_v5 = vadd.f32 %v5256_v9, %v5255_v48  ;;  %v5219_v13 = vadd.f32 %v6186_v36, %v5122_v58  ;;  %v6134_v7 = vadd.f32 %v6133_v15, %v8878_v54  ;;  %v6141_v9 = vpop.f32.mrf.mxu0 }
 0x3ea   :  { %v6188_v6 = vpop.f32.mrf.mxu1 }
 0x3eb   :  { %v5284_v31 = vrot.slane %v5283_v43, 1  ;;  %v5287_v12 = vrot.slane %v5286_v5, 4  ;;  %v6189_v60 = vadd.f32 %v6188_v6, %v6187_v10  ;;  %v5257_v56 = vmax.f32 %v5219_v13, 0.0  ;;  %v6142_v6 = vpop.f32.mrf.mxu0 }
 0x3ec   :  { %v6190_v53 = vpop.f32.mrf.mxu1  ;;  %v6079_v10 = vadd.f32 %v8830_v30, %v8821_v38 }
 0x3ed   :  { %v5285_v24 = vadd.f32 %v5284_v31, %v5283_v43  ;;  %v5288_v11 = vadd.f32 %v5287_v12, %v5286_v5  ;;  %v5222_v62 = vadd.f32 %v6189_v60, %v5125_v32  ;;  %v5141_v43 = vadd.f32 %v6137_v8, %v5044_v35  ;;  %v5847_v35 = vld [vmem:[%s8923_s8] ss:$0 sm:$0xff] }
 0x3ee   :  { %v6191_v0 = vpop.f32.mrf.mxu1  ;;  %v5049_v31 = vadd.f32 %v8819_v57, %v8828_v42  ;;  %v6140_v60 = vadd.f32 %v6139_v28, %v6138_v51  ;;  %v5052_v29 = vadd.f32 %v6079_v10, %v8828_v42 }
 0x3ef   :  { %v5355_v41 = vsel %vm5354_vm8, %v5285_v24, %v5353_v18  ;;  %v5289_v16 = vrot.slane %v5288_v11, 2  ;;  %v5258_v55 = vmax.f32 %v5222_v62, 0.0  ;;  %v6192_v44 = vadd.f32 %v6191_v0, %v6190_v53 }
 0x3f0   :  { %v6193_v4 = vpop.f32.mrf.mxu1  ;;  %v5138_v18 = vadd.f32 %v6134_v7, %v5041_v17  ;;  %v6143_v62 = vadd.f32 %v6142_v6, %v6141_v9  ;;  %v5146_v0 = vadd.f32 %v6140_v60, %v5049_v31 }
 0x3f1   :  { %v5290_v39 = vadd.f32 %v5289_v16, %v5288_v11  ;;  %v5293_v14 = vadd.f32 %v5258_v55, %v5257_v56  ;;  %v5227_v52 = vadd.f32 %v6192_v44, %v5130_v23 }
 0x3f2   :  { %v6194_v61 = vpop.f32.mrf.mxu1 }
 0x3f3   :  { %v5291_v2 = vrot.slane %v5290_v39, 1  ;;  %v5294_v3 = vrot.slane %v5293_v14, 4  ;;  %v6195_v50 = vadd.f32 %v6194_v61, %v6193_v4  ;;  %v5259_v26 = vmax.f32 %v5227_v52, 0.0 }
 0x3f4   :  { %v6196_v19 = vpop.f32.mrf.mxu1 }
 0x3f5   :  { %v5292_v33 = vadd.f32 %v5291_v2, %v5290_v39  ;;  %v5295_v49 = vadd.f32 %v5294_v3, %v5293_v14  ;;  %v5230_v45 = vadd.f32 %v6195_v50, %v5133_v63 }
 0x3f6   :  { %v6197_v46 = vpop.f32.mrf.mxu1 }
 0x3f7   :  { %v5357_v1 = vsel %vm2435_vm4, %v5292_v33, %v5355_v41  ;;  %v5296_v20 = vrot.slane %v5295_v49, 2  ;;  %v5260_v48 = vmax.f32 %v5230_v45, 0.0  ;;  %v6198_v22 = vadd.f32 %v6197_v46, %v6196_v19 }
 0x3f8   :  { %v6199_v25 = vpop.f32.mrf.mxu1  ;;  %v5149_v41 = vadd.f32 %v6143_v62, %v5052_v29  ;;  %vm5360_vm4 = vcmask 1045509  }
 0x3f9   :  { %v5297_v36 = vadd.f32 %v5296_v20, %v5295_v49  ;;  %v5300_v58 = vadd.f32 %v5260_v48, %v5259_v26  ;;  %v5235_v54 = vadd.f32 %v6198_v22, %v5138_v18 }
 0x3fa   :  { %v6200_v15 = vpop.f32.mrf.mxu1 }
 0x3fb   :  { %v5298_v21 = vrot.slane %v5297_v36, 1  ;;  %v5301_v37 = vrot.slane %v5300_v58, 4  ;;  %v6201_v5 = vadd.f32 %v6200_v15, %v6199_v25  ;;  %v5261_v53 = vmax.f32 %v5235_v54, 0.0 }
 0x3fc   :  { %v6202_v13 = vpop.f32.mrf.mxu1 }
 0x3fd   :  { %v5299_v12 = vadd.f32 %v5298_v21, %v5297_v36  ;;  %v5302_v32 = vadd.f32 %v5301_v37, %v5300_v58  ;;  %v5238_v59 = vadd.f32 %v6201_v5, %v5141_v43 }
 0x3fe   :  { %v6203_v47 = vpop.f32.mrf.mxu1 }
 0x3ff   :  { %v5303_v38 = vrot.slane %v5302_v32, 2  ;;  %v5262_v30 = vmax.f32 %v5238_v59, 0.0  ;;  %v6204_v24 = vadd.f32 %v6203_v47, %v6202_v13  ;;  %v5359_v11 = vsel %vm1959_vm7, %v5299_v12, %v5357_v1 }
 0x400   :  { %v6205_v27 = vpop.f32.mrf.mxu1  ;;  %vm5362_vm7 = vcmask 1046534  }
 0x401   :  { %v5304_v34 = vadd.f32 %v5303_v38, %v5302_v32  ;;  %v5307_v56 = vadd.f32 %v5262_v30, %v5261_v53  ;;  %v5243_v44 = vadd.f32 %v6204_v24, %v5146_v0 }
 0x402   :  { %v6206_v57 = vpop.f32.mrf.mxu1 }
 0x403   :  { %v5305_v16 = vrot.slane %v5304_v34, 1  ;;  %v5308_v55 = vrot.slane %v5307_v56, 4  ;;  %v6207_v23 = vadd.f32 %v6206_v57, %v6205_v27  ;;  %v5263_v39 = vmax.f32 %v5243_v44, 0.0 }
 0x405   :  { %v5306_v42 = vadd.f32 %v5305_v16, %v5304_v34  ;;  %v5309_v4 = vadd.f32 %v5308_v55, %v5307_v56  ;;  %v5246_v40 = vadd.f32 %v6207_v23, %v5149_v41 }
 0x407   :  { %v5310_v51 = vrot.slane %v5309_v4, 2  ;;  %v5264_v14 = vmax.f32 %v5246_v40, 0.0  ;;  %v5361_v52 = vsel %vm5360_vm4, %v5306_v42, %v5359_v11 }
 0x409   :  { %v5311_v61 = vadd.f32 %v5310_v51, %v5309_v4  ;;  %v5314_v2 = vadd.f32 %v5264_v14, %v5263_v39 }
 0x40b   :  { %v5312_v3 = vrot.slane %v5311_v61, 1  ;;  %v5315_v63 = vrot.slane %v5314_v2, 4 }
 0x40d   :  { %v5313_v50 = vadd.f32 %v5312_v3, %v5311_v61  ;;  %v5316_v17 = vadd.f32 %v5315_v63, %v5314_v2 }
 0x40f   :  { %v5317_v19 = vrot.slane %v5316_v17, 2  ;;  %v5363_v28 = vsel %vm5362_vm7, %v5313_v50, %v5361_v52 }
 0x411   :  { %v5318_v33 = vadd.f32 %v5317_v19, %v5316_v17 }
 0x413   :  { %v5319_v49 = vrot.slane %v5318_v33, 1 }
 0x415   :  { %v5320_v45 = vadd.f32 %v5319_v49, %v5318_v33 }
 0x417   :  { %v5365_v7 = vsel %vm4192_vm0, %v5320_v45, %v5363_v28 }
 0x418   :  { %6466 = vmatmul.mubr.f32.vlgmr.msra.gmra.mxu0 %v5365_v7 }
 0x4d8   :  { %v5433_v26 = vpop.f32.mrf.mxu0 }
 0x4d9   :  { %v5434_v46 = vadd.f32 %v5847_v35, %v5433_v26 }
 0x4da   :  { %v6467_v1 = vpop.f32.mrf.mxu0 }
 0x4db   :  { %5437 = vst [vmem:[#allocation9] sm:$0xff] %v5434_v46 }
 0x4dc   :  { %6773 = shalt.err (!%p6770_p0)
}
 0x4dd   :  { %5447 = dma.vmem_to_hbm [thread:$0]  %s5445_s22, 128, %s8924_s9, [#allocation6]  }
 0x4de   :  { %6786 = dma.done.wait [#allocation6], 128  }
 0x4df   :  { %6787 = vsyncadd [#allocation6], 4294967168 }
 0x4e0   :  { %5451 = vsyncpa [#allocation5], 1 }
 0x4e1   :  { %5452 = vsyncpa [#allocation8], 1 }
 0x4e2   :  { %5453 = vsyncpa [#allocation6], 1 }

</bundles_post_ra>
